<compile_context>
chip_gen: v7x
topology: tpu7x:2x2x1
jax: 0.10.0
libtpu: 0.0.40
codegen_flags: <defaults>
</compile_context>

<pallas_src>
import functools

import jax
import jax.numpy as jnp
from jax.experimental import pallas as pl
from jax.experimental.pallas import tpu as pltpu


def _round_up(v, m):
    return ((v + m - 1) // m) * m


# ----------------------------------------------------------------------------
# Generation-aware VMEM sizing
# ----------------------------------------------------------------------------
def _vmem_caps():
    """(tile-picking budget, scoped vmem_limit_bytes), derived from the chip's VMEM."""
    cap = 64 * 1024 * 1024  # conservative fallback (v7x per-TensorCore VMEM)
    try:
        info = pltpu.get_tpu_info()
        cap = int(getattr(info, "vmem_capacity_bytes", cap)) or cap
    except Exception:
        pass
    budget = min(cap // 2, 40 * 1024 * 1024)          # for lane-tile selection
    limit = min((cap * 3) // 4, 64 * 1024 * 1024)     # scoped limit, never > physical
    return budget, limit


def _pick_lane_tile(nl, per_lane_bytes, resident_bytes, budget):
    """Largest power-of-two lane tile (multiple of 128) whose double-buffered streaming
    footprint plus the resident weight/bias blocks fits the VMEM budget."""
    cap = _round_up(max(nl, 1), 128)
    for tn in (4096, 2048, 1024, 512, 256, 128):
        if tn > cap:
            continue
        if resident_bytes + 2 * tn * per_lane_bytes <= budget:
            return tn
    return 128


# ----------------------------------------------------------------------------
# Pallas kernels
# ----------------------------------------------------------------------------
def _gconv_kernel(w_ref, b_ref, x_ref, o_ref, *, slope):
    # w_ref: (1, M_pad, Kp) bf16    (resident per group)
    # b_ref: (1, M_pad, 1)  f32     (resident per group)
    # x_ref: (1, Kp, TN)    bf16    (streamed lane tiles)
    # o_ref: (1, M_pad, TN) bf16
    acc = jnp.dot(w_ref[0], x_ref[0], preferred_element_type=jnp.float32)
    acc = acc + b_ref[0]                       # VPU bias add, broadcast over lanes
    if slope is not None:
        acc = jnp.where(acc >= 0.0, acc, acc * slope)
    o_ref[0] = acc.astype(o_ref.dtype)


def _final_kernel(w1_ref, b1_ref, w2_ref, b2_ref, x_ref, o_ref, *, slope):
    # Fused final stage: (K=3 conv + bias + LeakyReLU) -> (1x1 conv + bias).
    h = jnp.dot(w1_ref[0], x_ref[0], preferred_element_type=jnp.float32)
    h = h + b1_ref[0]
    h = jnp.where(h >= 0.0, h, h * slope)
    acc = jnp.dot(w2_ref[0], h.astype(jnp.bfloat16),
                  preferred_element_type=jnp.float32)
    acc = acc + b2_ref[0]
    o_ref[0] = acc.astype(o_ref.dtype)


def _grouped_conv_matmul(wp, bp, patches, *, slope, tn, vmem_limit):
    G, M_pad, Kp = wp.shape
    _, _, NL = patches.shape
    return pl.pallas_call(
        functools.partial(_gconv_kernel, slope=slope),
        out_shape=jax.ShapeDtypeStruct((G, M_pad, NL), jnp.bfloat16),
        grid_spec=pltpu.PrefetchScalarGridSpec(
            num_scalar_prefetch=0,
            grid=(G, pl.cdiv(NL, tn)),
            in_specs=[
                # weights / bias depend only on g -> stay VMEM-resident across lane tiles
                pl.BlockSpec((1, M_pad, Kp), lambda g, j: (g, 0, 0)),
                pl.BlockSpec((1, M_pad, 1), lambda g, j: (g, 0, 0)),
                # activation patches: streamed / pipelined over lane tiles
                pl.BlockSpec((1, Kp, tn), lambda g, j: (g, 0, j)),
            ],
            out_specs=pl.BlockSpec((1, M_pad, tn), lambda g, j: (g, 0, j)),
        ),
        compiler_params=pltpu.CompilerParams(
            dimension_semantics=("parallel", "parallel"),
            vmem_limit_bytes=vmem_limit,
        ),
    )(wp, bp, patches)


def _fused_final_matmul(wp1, bp1, wp2, bp2, patches, *, slope, tn, vmem_limit):
    _, M1, Kf1 = wp1.shape
    _, M2, K2 = wp2.shape
    assert K2 == M1, (K2, M1)
    _, _, NL = patches.shape
    return pl.pallas_call(
        functools.partial(_final_kernel, slope=slope),
        out_shape=jax.ShapeDtypeStruct((1, M2, NL), jnp.float32),
        grid_spec=pltpu.PrefetchScalarGridSpec(
            num_scalar_prefetch=0,
            grid=(pl.cdiv(NL, tn),),
            in_specs=[
                pl.BlockSpec((1, M1, Kf1), lambda j: (0, 0, 0)),
                pl.BlockSpec((1, M1, 1), lambda j: (0, 0, 0)),
                pl.BlockSpec((1, M2, K2), lambda j: (0, 0, 0)),
                pl.BlockSpec((1, M2, 1), lambda j: (0, 0, 0)),
                pl.BlockSpec((1, Kf1, tn), lambda j: (0, 0, j)),
            ],
            out_specs=pl.BlockSpec((1, M2, tn), lambda j: (0, 0, j)),
        ),
        compiler_params=pltpu.CompilerParams(
            dimension_semantics=("parallel",),
            vmem_limit_bytes=vmem_limit,
        ),
    )(wp1, bp1, wp2, bp2, patches)


# ----------------------------------------------------------------------------
# One-time weight packing
# ----------------------------------------------------------------------------
def pack_conv_params(w, b, groups, k_pad_to=None):
    """Conv1d weight/bias -> (G, M_pad, Kp) bf16 weights + (G, M_pad, 1) f32 bias."""
    C_out, C_in_g, K = w.shape
    G = groups
    C_out_g = C_out // G
    Kf = C_in_g * K
    Kp = _round_up(Kf if k_pad_to is None else max(Kf, k_pad_to), 16)
    M_pad = _round_up(C_out_g, 16)

    wp = jnp.zeros((G, M_pad, Kp), jnp.bfloat16)
    wp = wp.at[:, :C_out_g, :Kf].set(w.reshape(G, C_out_g, Kf).astype(jnp.bfloat16))
    bp = jnp.zeros((G, M_pad, 1), jnp.float32)
    bp = bp.at[:, :C_out_g, 0].set(b.reshape(G, C_out_g).astype(jnp.float32))
    meta = dict(groups=G, C_in_g=C_in_g, K=K, C_out=C_out, C_out_g=C_out_g,
                Kflat=Kf, Kp=Kp, M_pad=M_pad)
    return wp, bp, meta


# ----------------------------------------------------------------------------
# XLA-side im2col (bf16, stays in channels-on-sublanes (C, N, L) layout)
# ----------------------------------------------------------------------------
def _im2col(x, *, K, stride, padding, groups):
    """x: (C_in, N, L) bf16 -> (G, C_in_g*K, N*L_out) bf16, L_out."""
    C_in, N, L = x.shape
    if padding:
        x = jnp.pad(x, ((0, 0), (0, 0), (padding, padding)))
    Lp = x.shape[-1]
    L_out = (Lp - K) // stride + 1
    span = stride * (L_out - 1) + 1
    if K == 1:
        p = x[:, :, :span:stride][:, None]                    # (C_in, 1, N, L_out)
    else:
        taps = [x[:, :, k: k + span: stride] for k in range(K)]
        p = jnp.stack(taps, axis=1)                           # (C_in, K, N, L_out)
    G = groups
    return p.reshape(G, (C_in // G) * K, N * L_out), L_out


def _maybe_pad_rows(p, kp):
    if p.shape[1] != kp:
        p = jnp.pad(p, ((0, 0), (0, kp - p.shape[1]), (0, 0)))
    return p


# ----------------------------------------------------------------------------
# Layers
# ----------------------------------------------------------------------------
def conv1d_pallas(x, packed, *, stride, padding, slope, vmem_budget, vmem_limit):
    """x: (C_in, N, L) bf16 -> (C_out, N, L_out) bf16."""
    wp, bp, meta = packed
    G, K = meta["groups"], meta["K"]
    C_out, C_out_g, M_pad = meta["C_out"], meta["C_out_g"], meta["M_pad"]
    Kp = wp.shape[-1]
    C_in, N, L = x.shape
    assert C_in == G * meta["C_in_g"]

    p, L_out = _im2col(x, K=K, stride=stride, padding=padding, groups=G)
    p = _maybe_pad_rows(p, Kp)
    NL = N * L_out

    per_lane = 2 * (Kp + M_pad)                       # bf16 RHS + bf16 out per lane
    resident = 2 * (2 * M_pad * Kp) + 2 * (4 * M_pad)  # dbl-buffered weights + bias
    tn = _pick_lane_tile(NL, per_lane, resident, vmem_budget)

    y = _grouped_conv_matmul(wp, bp, p, slope=slope, tn=tn, vmem_limit=vmem_limit)
    if M_pad != C_out_g:
        y = y[:, :C_out_g, :]
    return y.reshape(C_out, N, L_out)                 # contiguous -> free reshape


def final_stage_pallas(x, packed1, packed2, *, slope, vmem_budget, vmem_limit):
    """Fused final_conv: K=3 conv -> LeakyReLU -> 1x1 conv. x: (C, N, L) bf16."""
    wp1, bp1, meta1 = packed1
    wp2, bp2, meta2 = packed2
    _, N, _ = x.shape

    p, L_out = _im2col(x, K=meta1["K"], stride=1, padding=0, groups=1)
    p = _maybe_pad_rows(p, wp1.shape[-1])
    NL = N * L_out

    M1, Kf1 = wp1.shape[1], wp1.shape[2]
    M2, K2 = wp2.shape[1], wp2.shape[2]
    per_lane = 2 * Kf1 + 4 * M2 + 6 * M1              # RHS + f32 out + in-kernel h
    resident = 2 * (2 * (M1 * Kf1 + M2 * K2)) + 2 * 4 * (M1 + M2)
    tn = _pick_lane_tile(NL, per_lane, resident, vmem_budget)

    y = _fused_final_matmul(wp1, bp1, wp2, bp2, p, slope=slope, tn=tn,
                            vmem_limit=vmem_limit)    # (1, M2, NL) f32
    C2_out = meta2["C_out"]
    return y[0, :C2_out, :].reshape(C2_out, N, L_out)


# ----------------------------------------------------------------------------
# MultiScaleDiscriminator parameters + forward
# ----------------------------------------------------------------------------
def init_params(key, channels=16, layers=4, groups=4, chan_max=1024, input_channels=1):
    keys = iter(jax.random.split(key, 2 * (layers + 3)))

    def conv_param(c_out, c_in_g, ksize):
        w = jax.random.normal(next(keys), (c_out, c_in_g, ksize), jnp.float32) * 0.1
        b = jax.random.normal(next(keys), (c_out,), jnp.float32) * 0.1
        return w, b

    raw = {"init": conv_param(channels, input_channels, 7), "layers": []}
    curr = channels
    for _ in range(layers):
        c_out = min(curr * 4, chan_max)
        raw["layers"].append(conv_param(c_out, curr // groups, 8))
        curr = c_out
    raw["final1"] = conv_param(curr, curr, 3)
    raw["final2"] = conv_param(1, curr, 1)

    packed_f1 = pack_conv_params(*raw["final1"], groups=1)
    # final2's contraction dim must match final1's (possibly padded) output rows.
    packed_f2 = pack_conv_params(*raw["final2"], groups=1,
                                 k_pad_to=packed_f1[2]["M_pad"])
    packed = {
        "init": pack_conv_params(*raw["init"], groups=1),
        "layers": [pack_conv_params(w, b, groups=groups) for (w, b) in raw["layers"]],
        "final1": packed_f1,
        "final2": packed_f2,
    }
    return packed, raw


def multi_scale_discriminator_forward(params, x, return_intermediates=False):
    """x: (N, C_in, L) PyTorch NCL layout. Returns (N, 1, L_final) [+ intermediates]."""
    vmem_budget, vmem_limit = _vmem_caps()
    xc = jnp.transpose(x, (1, 0, 2)).astype(jnp.bfloat16)     # (C, N, L) bf16
    xc = conv1d_pallas(xc, params["init"], stride=1, padding=0, slope=None,
                       vmem_budget=vmem_budget, vmem_limit=vmem_limit)
    inter = []
    for packed in params["layers"]:
        xc = conv1d_pallas(xc, packed, stride=4, padding=4, slope=0.1,
                           vmem_budget=vmem_budget, vmem_limit=vmem_limit)
        inter.append(xc)
    out_c = final_stage_pallas(xc, params["final1"], params["final2"], slope=0.1,
                               vmem_budget=vmem_budget, vmem_limit=vmem_limit)
    out = jnp.transpose(out_c, (1, 0, 2))                     # back to (N, C, L)
    if not return_intermediates:
        return out
    return out, [jnp.transpose(t, (1, 0, 2)) for t in inter]


# ----------------------------------------------------------------------------
# Pure-JAX f32 reference (lax.conv) for the correctness check
# ----------------------------------------------------------------------------
def _ref_conv1d(x, w, b, *, stride=1, padding=0, groups=1, slope=None):
    y = jax.lax.conv_general_dilated(
        x, w, window_strides=(stride,), padding=[(padding, padding)],
        dimension_numbers=("NCH", "OIH", "NCH"), feature_group_count=groups)
    y = y + b[None, :, None]
    if slope is not None:
        y = jnp.where(y >= 0.0, y, y * slope)
    return y


def _ref_forward(raw, x, *, groups):
    w, b = raw["init"]
    x = _ref_conv1d(x, w, b)
    inter = []
    for (w, b) in raw["layers"]:
        x = _ref_conv1d(x, w, b, stride=4, padding=4, groups=groups, slope=0.1)
        inter.append(x)
    w, b = raw["final1"]
    x = _ref_conv1d(x, w, b, slope=0.1)
    w, b = raw["final2"]
    return _ref_conv1d(x, w, b), inter


if __name__ == "__main__":
    key = jax.random.PRNGKey(0)
    k_param, k_input = jax.random.split(key)

    # Small-but-structurally-consistent hyperparameters (same kernel sizes / strides /
    # groups pattern as the PyTorch defaults, chan_max trimmed for a small test).
    channels, layers, groups, chan_max, in_ch = 16, 4, 4, 256, 1
    packed, raw = init_params(k_param, channels=channels, layers=layers,
                              groups=groups, chan_max=chan_max,
                              input_channels=in_ch)

    # Input: (batch=2, input_channels=1, seq=512) in NCL layout.
    N, L = 2, 512
    x = jax.random.normal(k_input, (N, in_ch, L), jnp.float32)

    fwd = jax.jit(lambda inp: multi_scale_discriminator_forward(
        packed, inp, return_intermediates=True))
    out, inter = fwd(x)
    out = jax.block_until_ready(out)

    ref_out, ref_inter = _ref_forward(raw, x, groups=groups)
    ref_out = jax.block_until_ready(ref_out)

    assert out.shape == ref_out.shape, (out.shape, ref_out.shape)
    assert len(inter) == layers
    for a, b in zip(inter, ref_inter):
        assert a.shape == b.shape, (a.shape, b.shape)

    def rel_err(a, b):
        a = a.astype(jnp.float32)
        return float(jnp.max(jnp.abs(a - b)) / (jnp.max(jnp.abs(b)) + 1e-6))

    # bf16 operands + bf16 inter-layer storage (f32 accumulate) -> bf16-level tolerances.
    e0 = rel_err(inter[0], ref_inter[0])
    ef = rel_err(out, ref_out)
    assert e0 < 5e-2, e0
    assert ef < 1.5e-1, ef

    print("KERNEL_OK")
</pallas_src>

<mosaic_0001>
module attributes {stable_mosaic.version = 11 : i64} {
  func.func @_gconv_kernel(%arg0: i32, %arg1: i32, %arg2: memref<1x16x16xbf16, #tpu.memory_space<vmem>>, %arg3: memref<1x16x1xf32, #tpu.memory_space<vmem>>, %arg4: memref<1x16x1024xbf16, #tpu.memory_space<vmem>>, %arg5: memref<1x16x1024xbf16, #tpu.memory_space<vmem>>) attributes {dimension_semantics = [#tpu.dimension_semantics<parallel>, #tpu.dimension_semantics<parallel>], iteration_bounds = array<i64: 1, 1>, scalar_prefetch = 0 : i64, scratch_operands = 0 : i64, tpu.core_type = #tpu.core_type<tc>, window_params = [{transform_indices = @transform_0, window_bounds = array<i64: 1, 16, 16>}, {transform_indices = @transform_1, window_bounds = array<i64: 1, 16, 1>}, {transform_indices = @transform_2, window_bounds = array<i64: 1, 16, 1024>}, {transform_indices = @transform_3, window_bounds = array<i64: 1, 16, 1024>}]} {
    %c0 = arith.constant 0 : index
    %c0_0 = arith.constant 0 : index
    %c0_1 = arith.constant 0 : index
    %0 = vector.load %arg2[%c0, %c0_0, %c0_1] : memref<1x16x16xbf16, #tpu.memory_space<vmem>>, vector<1x16x16xbf16>
    %1 = vector.shape_cast %0 : vector<1x16x16xbf16> to vector<16x16xbf16>
    %c0_2 = arith.constant 0 : index
    %c0_3 = arith.constant 0 : index
    %c0_4 = arith.constant 0 : index
    %2 = vector.load %arg4[%c0_2, %c0_3, %c0_4] : memref<1x16x1024xbf16, #tpu.memory_space<vmem>>, vector<1x16x1024xbf16>
    %3 = vector.shape_cast %2 : vector<1x16x1024xbf16> to vector<16x1024xbf16>
    %cst = arith.constant dense<0.000000e+00> : vector<16x1024xf32>
    %4 = tpu.matmul %1, %3, %cst {dimension_numbers = #tpu.dot_dimension_numbers<[1], [0], [0], [1], [0, 0, 1, 1], [], []>} : vector<16x16xbf16>, vector<16x1024xbf16>, vector<16x1024xf32> -> vector<16x1024xf32>
    %c0_5 = arith.constant 0 : index
    %c0_6 = arith.constant 0 : index
    %c0_7 = arith.constant 0 : index
    %5 = vector.load %arg3[%c0_5, %c0_6, %c0_7] : memref<1x16x1xf32, #tpu.memory_space<vmem>>, vector<1x16x1xf32>
    %6 = vector.shape_cast %5 : vector<1x16x1xf32> to vector<16x1xf32>
    %7 = vector.broadcast %6 : vector<16x1xf32> to vector<16x1024xf32>
    %8 = arith.addf %4, %7 : vector<16x1024xf32>
    %9 = arith.truncf %8 : vector<16x1024xf32> to vector<16x1024xbf16>
    %c0_8 = arith.constant 0 : index
    %c0_9 = arith.constant 0 : index
    %c0_10 = arith.constant 0 : index
    %10 = vector.load %arg5[%c0_8, %c0_9, %c0_10] : memref<1x16x1024xbf16, #tpu.memory_space<vmem>>, vector<1x16x1024xbf16>
    %11 = vector.shape_cast %10 : vector<1x16x1024xbf16> to vector<16x1024xbf16>
    %12 = vector.shape_cast %9 : vector<16x1024xbf16> to vector<1x16x1024xbf16>
    tpu.vector_store %arg5[%c0_8, %c0_9, %c0_10], %12 {strides = array<i32>} : memref<1x16x1024xbf16, #tpu.memory_space<vmem>>, vector<1x16x1024xbf16>,
    return
  }
  func.func @transform_0(%arg0: i32, %arg1: i32) -> (i32, i32, i32) {
    %c0_i32 = arith.constant 0 : i32
    %c0_i32_0 = arith.constant 0 : i32
    %c0_i32_1 = arith.constant 0 : i32
    return %arg0, %c0_i32, %c0_i32_0 : i32, i32, i32
  }
  func.func @transform_1(%arg0: i32, %arg1: i32) -> (i32, i32, i32) {
    %c0_i32 = arith.constant 0 : i32
    %c0_i32_0 = arith.constant 0 : i32
    %c0_i32_1 = arith.constant 0 : i32
    return %arg0, %c0_i32, %c0_i32_0 : i32, i32, i32
  }
  func.func @transform_2(%arg0: i32, %arg1: i32) -> (i32, i32, i32) {
    %c0_i32 = arith.constant 0 : i32
    %c0_i32_0 = arith.constant 0 : i32
    return %arg0, %c0_i32, %arg1 : i32, i32, i32
  }
  func.func @transform_3(%arg0: i32, %arg1: i32) -> (i32, i32, i32) {
    %c0_i32 = arith.constant 0 : i32
    %c0_i32_0 = arith.constant 0 : i32
    return %arg0, %c0_i32, %arg1 : i32, i32, i32
  }
}

module attributes {stable_mosaic.version = 11 : i64} {
  func.func @_gconv_kernel(%arg0: i32, %arg1: i32, %arg2: memref<1x16x32xbf16, #tpu.memory_space<vmem>>, %arg3: memref<1x16x1xf32, #tpu.memory_space<vmem>>, %arg4: memref<1x32x256xbf16, #tpu.memory_space<vmem>>, %arg5: memref<1x16x256xbf16, #tpu.memory_space<vmem>>) attributes {dimension_semantics = [#tpu.dimension_semantics<parallel>, #tpu.dimension_semantics<parallel>], iteration_bounds = array<i64: 4, 1>, scalar_prefetch = 0 : i64, scratch_operands = 0 : i64, tpu.core_type = #tpu.core_type<tc>, window_params = [{transform_indices = @transform_0, window_bounds = array<i64: 1, 16, 32>}, {transform_indices = @transform_1, window_bounds = array<i64: 1, 16, 1>}, {transform_indices = @transform_2, window_bounds = array<i64: 1, 32, 256>}, {transform_indices = @transform_3, window_bounds = array<i64: 1, 16, 256>}]} {
    %c0 = arith.constant 0 : index
    %c0_0 = arith.constant 0 : index
    %c0_1 = arith.constant 0 : index
    %0 = vector.load %arg2[%c0, %c0_0, %c0_1] : memref<1x16x32xbf16, #tpu.memory_space<vmem>>, vector<1x16x32xbf16>
    %1 = vector.shape_cast %0 : vector<1x16x32xbf16> to vector<16x32xbf16>
    %c0_2 = arith.constant 0 : index
    %c0_3 = arith.constant 0 : index
    %c0_4 = arith.constant 0 : index
    %2 = vector.load %arg4[%c0_2, %c0_3, %c0_4] : memref<1x32x256xbf16, #tpu.memory_space<vmem>>, vector<1x32x256xbf16>
    %3 = vector.shape_cast %2 : vector<1x32x256xbf16> to vector<32x256xbf16>
    %cst = arith.constant dense<0.000000e+00> : vector<16x256xf32>
    %4 = tpu.matmul %1, %3, %cst {dimension_numbers = #tpu.dot_dimension_numbers<[1], [0], [0], [1], [0, 0, 1, 1], [], []>} : vector<16x32xbf16>, vector<32x256xbf16>, vector<16x256xf32> -> vector<16x256xf32>
    %c0_5 = arith.constant 0 : index
    %c0_6 = arith.constant 0 : index
    %c0_7 = arith.constant 0 : index
    %5 = vector.load %arg3[%c0_5, %c0_6, %c0_7] : memref<1x16x1xf32, #tpu.memory_space<vmem>>, vector<1x16x1xf32>
    %6 = vector.shape_cast %5 : vector<1x16x1xf32> to vector<16x1xf32>
    %7 = vector.broadcast %6 : vector<16x1xf32> to vector<16x256xf32>
    %8 = arith.addf %4, %7 : vector<16x256xf32>
    %cst_8 = arith.constant 0.000000e+00 : f32
    %9 = vector.broadcast %cst_8 : f32 to vector<16x256xf32>
    %10 = arith.cmpf oge, %8, %9 : vector<16x256xf32>
    %cst_9 = arith.constant 1.000000e-01 : f32
    %11 = vector.broadcast %cst_9 : f32 to vector<16x256xf32>
    %12 = arith.mulf %8, %11 : vector<16x256xf32>
    %13 = arith.select %10, %8, %12 : vector<16x256xi1>, vector<16x256xf32>
    %14 = arith.truncf %13 : vector<16x256xf32> to vector<16x256xbf16>
    %c0_10 = arith.constant 0 : index
    %c0_11 = arith.constant 0 : index
    %c0_12 = arith.constant 0 : index
    %15 = vector.load %arg5[%c0_10, %c0_11, %c0_12] : memref<1x16x256xbf16, #tpu.memory_space<vmem>>, vector<1x16x256xbf16>
    %16 = vector.shape_cast %15 : vector<1x16x256xbf16> to vector<16x256xbf16>
    %17 = vector.shape_cast %14 : vector<16x256xbf16> to vector<1x16x256xbf16>
    tpu.vector_store %arg5[%c0_10, %c0_11, %c0_12], %17 {strides = array<i32>} : memref<1x16x256xbf16, #tpu.memory_space<vmem>>, vector<1x16x256xbf16>,
    return
  }
  func.func @transform_0(%arg0: i32, %arg1: i32) -> (i32, i32, i32) {
    %c0_i32 = arith.constant 0 : i32
    %c0_i32_0 = arith.constant 0 : i32
    %c0_i32_1 = arith.constant 0 : i32
    return %arg0, %c0_i32, %c0_i32_0 : i32, i32, i32
  }
  func.func @transform_1(%arg0: i32, %arg1: i32) -> (i32, i32, i32) {
    %c0_i32 = arith.constant 0 : i32
    %c0_i32_0 = arith.constant 0 : i32
    %c0_i32_1 = arith.constant 0 : i32
    return %arg0, %c0_i32, %c0_i32_0 : i32, i32, i32
  }
  func.func @transform_2(%arg0: i32, %arg1: i32) -> (i32, i32, i32) {
    %c0_i32 = arith.constant 0 : i32
    %c0_i32_0 = arith.constant 0 : i32
    return %arg0, %c0_i32, %arg1 : i32, i32, i32
  }
  func.func @transform_3(%arg0: i32, %arg1: i32) -> (i32, i32, i32) {
    %c0_i32 = arith.constant 0 : i32
    %c0_i32_0 = arith.constant 0 : i32
    return %arg0, %c0_i32, %arg1 : i32, i32, i32
  }
}

module attributes {stable_mosaic.version = 11 : i64} {
  func.func @_gconv_kernel(%arg0: i32, %arg1: i32, %arg2: memref<1x64x128xbf16, #tpu.memory_space<vmem>>, %arg3: memref<1x64x1xf32, #tpu.memory_space<vmem>>, %arg4: memref<1x128x128xbf16, #tpu.memory_space<vmem>>, %arg5: memref<1x64x128xbf16, #tpu.memory_space<vmem>>) attributes {dimension_semantics = [#tpu.dimension_semantics<parallel>, #tpu.dimension_semantics<parallel>], iteration_bounds = array<i64: 4, 1>, scalar_prefetch = 0 : i64, scratch_operands = 0 : i64, tpu.core_type = #tpu.core_type<tc>, window_params = [{transform_indices = @transform_0, window_bounds = array<i64: 1, 64, 128>}, {transform_indices = @transform_1, window_bounds = array<i64: 1, 64, 1>}, {transform_indices = @transform_2, window_bounds = array<i64: 1, 128, 128>}, {transform_indices = @transform_3, window_bounds = array<i64: 1, 64, 128>}]} {
    %c0 = arith.constant 0 : index
    %c0_0 = arith.constant 0 : index
    %c0_1 = arith.constant 0 : index
    %0 = vector.load %arg2[%c0, %c0_0, %c0_1] : memref<1x64x128xbf16, #tpu.memory_space<vmem>>, vector<1x64x128xbf16>
    %1 = vector.shape_cast %0 : vector<1x64x128xbf16> to vector<64x128xbf16>
    %c0_2 = arith.constant 0 : index
    %c0_3 = arith.constant 0 : index
    %c0_4 = arith.constant 0 : index
    %2 = vector.load %arg4[%c0_2, %c0_3, %c0_4] : memref<1x128x128xbf16, #tpu.memory_space<vmem>>, vector<1x128x128xbf16>
    %3 = vector.shape_cast %2 : vector<1x128x128xbf16> to vector<128x128xbf16>
    %cst = arith.constant dense<0.000000e+00> : vector<64x128xf32>
    %4 = tpu.matmul %1, %3, %cst {dimension_numbers = #tpu.dot_dimension_numbers<[1], [0], [0], [1], [0, 0, 1, 1], [], []>} : vector<64x128xbf16>, vector<128x128xbf16>, vector<64x128xf32> -> vector<64x128xf32>
    %c0_5 = arith.constant 0 : index
    %c0_6 = arith.constant 0 : index
    %c0_7 = arith.constant 0 : index
    %5 = vector.load %arg3[%c0_5, %c0_6, %c0_7] : memref<1x64x1xf32, #tpu.memory_space<vmem>>, vector<1x64x1xf32>
    %6 = vector.shape_cast %5 : vector<1x64x1xf32> to vector<64x1xf32>
    %7 = vector.broadcast %6 : vector<64x1xf32> to vector<64x128xf32>
    %8 = arith.addf %4, %7 : vector<64x128xf32>
    %cst_8 = arith.constant 0.000000e+00 : f32
    %9 = vector.broadcast %cst_8 : f32 to vector<64x128xf32>
    %10 = arith.cmpf oge, %8, %9 : vector<64x128xf32>
    %cst_9 = arith.constant 1.000000e-01 : f32
    %11 = vector.broadcast %cst_9 : f32 to vector<64x128xf32>
    %12 = arith.mulf %8, %11 : vector<64x128xf32>
    %13 = arith.select %10, %8, %12 : vector<64x128xi1>, vector<64x128xf32>
    %14 = arith.truncf %13 : vector<64x128xf32> to vector<64x128xbf16>
    %c0_10 = arith.constant 0 : index
    %c0_11 = arith.constant 0 : index
    %c0_12 = arith.constant 0 : index
    %15 = vector.load %arg5[%c0_10, %c0_11, %c0_12] : memref<1x64x128xbf16, #tpu.memory_space<vmem>>, vector<1x64x128xbf16>
    %16 = vector.shape_cast %15 : vector<1x64x128xbf16> to vector<64x128xbf16>
    %17 = vector.shape_cast %14 : vector<64x128xbf16> to vector<1x64x128xbf16>
    tpu.vector_store %arg5[%c0_10, %c0_11, %c0_12], %17 {strides = array<i32>} : memref<1x64x128xbf16, #tpu.memory_space<vmem>>, vector<1x64x128xbf16>,
    return
  }
  func.func @transform_0(%arg0: i32, %arg1: i32) -> (i32, i32, i32) {
    %c0_i32 = arith.constant 0 : i32
    %c0_i32_0 = arith.constant 0 : i32
    %c0_i32_1 = arith.constant 0 : i32
    return %arg0, %c0_i32, %c0_i32_0 : i32, i32, i32
  }
  func.func @transform_1(%arg0: i32, %arg1: i32) -> (i32, i32, i32) {
    %c0_i32 = arith.constant 0 : i32
    %c0_i32_0 = arith.constant 0 : i32
    %c0_i32_1 = arith.constant 0 : i32
    return %arg0, %c0_i32, %c0_i32_0 : i32, i32, i32
  }
  func.func @transform_2(%arg0: i32, %arg1: i32) -> (i32, i32, i32) {
    %c0_i32 = arith.constant 0 : i32
    %c0_i32_0 = arith.constant 0 : i32
    return %arg0, %c0_i32, %arg1 : i32, i32, i32
  }
  func.func @transform_3(%arg0: i32, %arg1: i32) -> (i32, i32, i32) {
    %c0_i32 = arith.constant 0 : i32
    %c0_i32_0 = arith.constant 0 : i32
    return %arg0, %c0_i32, %arg1 : i32, i32, i32
  }
}

module attributes {stable_mosaic.version = 11 : i64} {
  func.func @_gconv_kernel(%arg0: i32, %arg1: i32, %arg2: memref<1x64x512xbf16, #tpu.memory_space<vmem>>, %arg3: memref<1x64x1xf32, #tpu.memory_space<vmem>>, %arg4: memref<1x512x128xbf16, #tpu.memory_space<vmem>>, %arg5: memref<1x64x128xbf16, #tpu.memory_space<vmem>>) attributes {dimension_semantics = [#tpu.dimension_semantics<parallel>, #tpu.dimension_semantics<parallel>], iteration_bounds = array<i64: 4, 1>, scalar_prefetch = 0 : i64, scratch_operands = 0 : i64, tpu.core_type = #tpu.core_type<tc>, window_params = [{transform_indices = @transform_0, window_bounds = array<i64: 1, 64, 512>}, {transform_indices = @transform_1, window_bounds = array<i64: 1, 64, 1>}, {transform_indices = @transform_2, window_bounds = array<i64: 1, 512, 128>}, {transform_indices = @transform_3, window_bounds = array<i64: 1, 64, 128>}]} {
    %c0 = arith.constant 0 : index
    %c0_0 = arith.constant 0 : index
    %c0_1 = arith.constant 0 : index
    %0 = vector.load %arg2[%c0, %c0_0, %c0_1] : memref<1x64x512xbf16, #tpu.memory_space<vmem>>, vector<1x64x512xbf16>
    %1 = vector.shape_cast %0 : vector<1x64x512xbf16> to vector<64x512xbf16>
    %c0_2 = arith.constant 0 : index
    %c0_3 = arith.constant 0 : index
    %c0_4 = arith.constant 0 : index
    %2 = vector.load %arg4[%c0_2, %c0_3, %c0_4] : memref<1x512x128xbf16, #tpu.memory_space<vmem>>, vector<1x512x128xbf16>
    %3 = vector.shape_cast %2 : vector<1x512x128xbf16> to vector<512x128xbf16>
    %cst = arith.constant dense<0.000000e+00> : vector<64x128xf32>
    %4 = tpu.matmul %1, %3, %cst {dimension_numbers = #tpu.dot_dimension_numbers<[1], [0], [0], [1], [0, 0, 1, 1], [], []>} : vector<64x512xbf16>, vector<512x128xbf16>, vector<64x128xf32> -> vector<64x128xf32>
    %c0_5 = arith.constant 0 : index
    %c0_6 = arith.constant 0 : index
    %c0_7 = arith.constant 0 : index
    %5 = vector.load %arg3[%c0_5, %c0_6, %c0_7] : memref<1x64x1xf32, #tpu.memory_space<vmem>>, vector<1x64x1xf32>
    %6 = vector.shape_cast %5 : vector<1x64x1xf32> to vector<64x1xf32>
    %7 = vector.broadcast %6 : vector<64x1xf32> to vector<64x128xf32>
    %8 = arith.addf %4, %7 : vector<64x128xf32>
    %cst_8 = arith.constant 0.000000e+00 : f32
    %9 = vector.broadcast %cst_8 : f32 to vector<64x128xf32>
    %10 = arith.cmpf oge, %8, %9 : vector<64x128xf32>
    %cst_9 = arith.constant 1.000000e-01 : f32
    %11 = vector.broadcast %cst_9 : f32 to vector<64x128xf32>
    %12 = arith.mulf %8, %11 : vector<64x128xf32>
    %13 = arith.select %10, %8, %12 : vector<64x128xi1>, vector<64x128xf32>
    %14 = arith.truncf %13 : vector<64x128xf32> to vector<64x128xbf16>
    %c0_10 = arith.constant 0 : index
    %c0_11 = arith.constant 0 : index
    %c0_12 = arith.constant 0 : index
    %15 = vector.load %arg5[%c0_10, %c0_11, %c0_12] : memref<1x64x128xbf16, #tpu.memory_space<vmem>>, vector<1x64x128xbf16>
    %16 = vector.shape_cast %15 : vector<1x64x128xbf16> to vector<64x128xbf16>
    %17 = vector.shape_cast %14 : vector<64x128xbf16> to vector<1x64x128xbf16>
    tpu.vector_store %arg5[%c0_10, %c0_11, %c0_12], %17 {strides = array<i32>} : memref<1x64x128xbf16, #tpu.memory_space<vmem>>, vector<1x64x128xbf16>,
    return
  }
  func.func @transform_0(%arg0: i32, %arg1: i32) -> (i32, i32, i32) {
    %c0_i32 = arith.constant 0 : i32
    %c0_i32_0 = arith.constant 0 : i32
    %c0_i32_1 = arith.constant 0 : i32
    return %arg0, %c0_i32, %c0_i32_0 : i32, i32, i32
  }
  func.func @transform_1(%arg0: i32, %arg1: i32) -> (i32, i32, i32) {
    %c0_i32 = arith.constant 0 : i32
    %c0_i32_0 = arith.constant 0 : i32
    %c0_i32_1 = arith.constant 0 : i32
    return %arg0, %c0_i32, %c0_i32_0 : i32, i32, i32
  }
  func.func @transform_2(%arg0: i32, %arg1: i32) -> (i32, i32, i32) {
    %c0_i32 = arith.constant 0 : i32
    %c0_i32_0 = arith.constant 0 : i32
    return %arg0, %c0_i32, %arg1 : i32, i32, i32
  }
  func.func @transform_3(%arg0: i32, %arg1: i32) -> (i32, i32, i32) {
    %c0_i32 = arith.constant 0 : i32
    %c0_i32_0 = arith.constant 0 : i32
    return %arg0, %c0_i32, %arg1 : i32, i32, i32
  }
}

module attributes {stable_mosaic.version = 11 : i64} {
  func.func @_gconv_kernel(%arg0: i32, %arg1: i32, %arg2: memref<1x64x512xbf16, #tpu.memory_space<vmem>>, %arg3: memref<1x64x1xf32, #tpu.memory_space<vmem>>, %arg4: memref<1x512x128xbf16, #tpu.memory_space<vmem>>, %arg5: memref<1x64x128xbf16, #tpu.memory_space<vmem>>) attributes {dimension_semantics = [#tpu.dimension_semantics<parallel>, #tpu.dimension_semantics<parallel>], iteration_bounds = array<i64: 4, 1>, scalar_prefetch = 0 : i64, scratch_operands = 0 : i64, tpu.core_type = #tpu.core_type<tc>, window_params = [{transform_indices = @transform_0, window_bounds = array<i64: 1, 64, 512>}, {transform_indices = @transform_1, window_bounds = array<i64: 1, 64, 1>}, {transform_indices = @transform_2, window_bounds = array<i64: 1, 512, 128>}, {transform_indices = @transform_3, window_bounds = array<i64: 1, 64, 128>}]} {
    %c0 = arith.constant 0 : index
    %c0_0 = arith.constant 0 : index
    %c0_1 = arith.constant 0 : index
    %0 = vector.load %arg2[%c0, %c0_0, %c0_1] : memref<1x64x512xbf16, #tpu.memory_space<vmem>>, vector<1x64x512xbf16>
    %1 = vector.shape_cast %0 : vector<1x64x512xbf16> to vector<64x512xbf16>
    %c0_2 = arith.constant 0 : index
    %c0_3 = arith.constant 0 : index
    %c0_4 = arith.constant 0 : index
    %2 = vector.load %arg4[%c0_2, %c0_3, %c0_4] : memref<1x512x128xbf16, #tpu.memory_space<vmem>>, vector<1x512x128xbf16>
    %3 = vector.shape_cast %2 : vector<1x512x128xbf16> to vector<512x128xbf16>
    %cst = arith.constant dense<0.000000e+00> : vector<64x128xf32>
    %4 = tpu.matmul %1, %3, %cst {dimension_numbers = #tpu.dot_dimension_numbers<[1], [0], [0], [1], [0, 0, 1, 1], [], []>} : vector<64x512xbf16>, vector<512x128xbf16>, vector<64x128xf32> -> vector<64x128xf32>
    %c0_5 = arith.constant 0 : index
    %c0_6 = arith.constant 0 : index
    %c0_7 = arith.constant 0 : index
    %5 = vector.load %arg3[%c0_5, %c0_6, %c0_7] : memref<1x64x1xf32, #tpu.memory_space<vmem>>, vector<1x64x1xf32>
    %6 = vector.shape_cast %5 : vector<1x64x1xf32> to vector<64x1xf32>
    %7 = vector.broadcast %6 : vector<64x1xf32> to vector<64x128xf32>
    %8 = arith.addf %4, %7 : vector<64x128xf32>
    %cst_8 = arith.constant 0.000000e+00 : f32
    %9 = vector.broadcast %cst_8 : f32 to vector<64x128xf32>
    %10 = arith.cmpf oge, %8, %9 : vector<64x128xf32>
    %cst_9 = arith.constant 1.000000e-01 : f32
    %11 = vector.broadcast %cst_9 : f32 to vector<64x128xf32>
    %12 = arith.mulf %8, %11 : vector<64x128xf32>
    %13 = arith.select %10, %8, %12 : vector<64x128xi1>, vector<64x128xf32>
    %14 = arith.truncf %13 : vector<64x128xf32> to vector<64x128xbf16>
    %c0_10 = arith.constant 0 : index
    %c0_11 = arith.constant 0 : index
    %c0_12 = arith.constant 0 : index
    %15 = vector.load %arg5[%c0_10, %c0_11, %c0_12] : memref<1x64x128xbf16, #tpu.memory_space<vmem>>, vector<1x64x128xbf16>
    %16 = vector.shape_cast %15 : vector<1x64x128xbf16> to vector<64x128xbf16>
    %17 = vector.shape_cast %14 : vector<64x128xbf16> to vector<1x64x128xbf16>
    tpu.vector_store %arg5[%c0_10, %c0_11, %c0_12], %17 {strides = array<i32>} : memref<1x64x128xbf16, #tpu.memory_space<vmem>>, vector<1x64x128xbf16>,
    return
  }
  func.func @transform_0(%arg0: i32, %arg1: i32) -> (i32, i32, i32) {
    %c0_i32 = arith.constant 0 : i32
    %c0_i32_0 = arith.constant 0 : i32
    %c0_i32_1 = arith.constant 0 : i32
    return %arg0, %c0_i32, %c0_i32_0 : i32, i32, i32
  }
  func.func @transform_1(%arg0: i32, %arg1: i32) -> (i32, i32, i32) {
    %c0_i32 = arith.constant 0 : i32
    %c0_i32_0 = arith.constant 0 : i32
    %c0_i32_1 = arith.constant 0 : i32
    return %arg0, %c0_i32, %c0_i32_0 : i32, i32, i32
  }
  func.func @transform_2(%arg0: i32, %arg1: i32) -> (i32, i32, i32) {
    %c0_i32 = arith.constant 0 : i32
    %c0_i32_0 = arith.constant 0 : i32
    return %arg0, %c0_i32, %arg1 : i32, i32, i32
  }
  func.func @transform_3(%arg0: i32, %arg1: i32) -> (i32, i32, i32) {
    %c0_i32 = arith.constant 0 : i32
    %c0_i32_0 = arith.constant 0 : i32
    return %arg0, %c0_i32, %arg1 : i32, i32, i32
  }
}

module attributes {stable_mosaic.version = 11 : i64} {
  func.func @_final_kernel(%arg0: i32, %arg1: memref<1x256x768xbf16, #tpu.memory_space<vmem>>, %arg2: memref<1x256x1xf32, #tpu.memory_space<vmem>>, %arg3: memref<1x16x256xbf16, #tpu.memory_space<vmem>>, %arg4: memref<1x16x1xf32, #tpu.memory_space<vmem>>, %arg5: memref<1x768x128xbf16, #tpu.memory_space<vmem>>, %arg6: memref<1x16x128xf32, #tpu.memory_space<vmem>>) attributes {dimension_semantics = [#tpu.dimension_semantics<parallel>], iteration_bounds = array<i64: 1>, scalar_prefetch = 0 : i64, scratch_operands = 0 : i64, tpu.core_type = #tpu.core_type<tc>, window_params = [{pipeline_mode = #tpu.pipeline_mode<synchronous>, transform_indices = @transform_0, window_bounds = array<i64: 1, 256, 768>}, {pipeline_mode = #tpu.pipeline_mode<synchronous>, transform_indices = @transform_1, window_bounds = array<i64: 1, 256, 1>}, {pipeline_mode = #tpu.pipeline_mode<synchronous>, transform_indices = @transform_2, window_bounds = array<i64: 1, 16, 256>}, {pipeline_mode = #tpu.pipeline_mode<synchronous>, transform_indices = @transform_3, window_bounds = array<i64: 1, 16, 1>}, {transform_indices = @transform_4, window_bounds = array<i64: 1, 768, 128>}, {transform_indices = @transform_5, window_bounds = array<i64: 1, 16, 128>}]} {
    %c0 = arith.constant 0 : index
    %c0_0 = arith.constant 0 : index
    %c0_1 = arith.constant 0 : index
    %0 = vector.load %arg1[%c0, %c0_0, %c0_1] : memref<1x256x768xbf16, #tpu.memory_space<vmem>>, vector<1x256x768xbf16>
    %1 = vector.shape_cast %0 : vector<1x256x768xbf16> to vector<256x768xbf16>
    %c0_2 = arith.constant 0 : index
    %c0_3 = arith.constant 0 : index
    %c0_4 = arith.constant 0 : index
    %2 = vector.load %arg5[%c0_2, %c0_3, %c0_4] : memref<1x768x128xbf16, #tpu.memory_space<vmem>>, vector<1x768x128xbf16>
    %3 = vector.shape_cast %2 : vector<1x768x128xbf16> to vector<768x128xbf16>
    %cst = arith.constant dense<0.000000e+00> : vector<256x128xf32>
    %4 = tpu.matmul %1, %3, %cst {dimension_numbers = #tpu.dot_dimension_numbers<[1], [0], [0], [1], [0, 0, 1, 1], [], []>} : vector<256x768xbf16>, vector<768x128xbf16>, vector<256x128xf32> -> vector<256x128xf32>
    %c0_5 = arith.constant 0 : index
    %c0_6 = arith.constant 0 : index
    %c0_7 = arith.constant 0 : index
    %5 = vector.load %arg2[%c0_5, %c0_6, %c0_7] : memref<1x256x1xf32, #tpu.memory_space<vmem>>, vector<1x256x1xf32>
    %6 = vector.shape_cast %5 : vector<1x256x1xf32> to vector<256x1xf32>
    %7 = vector.broadcast %6 : vector<256x1xf32> to vector<256x128xf32>
    %8 = arith.addf %4, %7 : vector<256x128xf32>
    %cst_8 = arith.constant 0.000000e+00 : f32
    %9 = vector.broadcast %cst_8 : f32 to vector<256x128xf32>
    %10 = arith.cmpf oge, %8, %9 : vector<256x128xf32>
    %cst_9 = arith.constant 1.000000e-01 : f32
    %11 = vector.broadcast %cst_9 : f32 to vector<256x128xf32>
    %12 = arith.mulf %8, %11 : vector<256x128xf32>
    %13 = arith.select %10, %8, %12 : vector<256x128xi1>, vector<256x128xf32>
    %c0_10 = arith.constant 0 : index
    %c0_11 = arith.constant 0 : index
    %c0_12 = arith.constant 0 : index
    %14 = vector.load %arg3[%c0_10, %c0_11, %c0_12] : memref<1x16x256xbf16, #tpu.memory_space<vmem>>, vector<1x16x256xbf16>
    %15 = vector.shape_cast %14 : vector<1x16x256xbf16> to vector<16x256xbf16>
    %16 = arith.truncf %13 : vector<256x128xf32> to vector<256x128xbf16>
    %cst_13 = arith.constant dense<0.000000e+00> : vector<16x128xf32>
    %17 = tpu.matmul %15, %16, %cst_13 {dimension_numbers = #tpu.dot_dimension_numbers<[1], [0], [0], [1], [0, 0, 1, 1], [], []>} : vector<16x256xbf16>, vector<256x128xbf16>, vector<16x128xf32> -> vector<16x128xf32>
    %c0_14 = arith.constant 0 : index
    %c0_15 = arith.constant 0 : index
    %c0_16 = arith.constant 0 : index
    %18 = vector.load %arg4[%c0_14, %c0_15, %c0_16] : memref<1x16x1xf32, #tpu.memory_space<vmem>>, vector<1x16x1xf32>
    %19 = vector.shape_cast %18 : vector<1x16x1xf32> to vector<16x1xf32>
    %20 = vector.broadcast %19 : vector<16x1xf32> to vector<16x128xf32>
    %21 = arith.addf %17, %20 : vector<16x128xf32>
    %c0_17 = arith.constant 0 : index
    %c0_18 = arith.constant 0 : index
    %c0_19 = arith.constant 0 : index
    %22 = vector.load %arg6[%c0_17, %c0_18, %c0_19] : memref<1x16x128xf32, #tpu.memory_space<vmem>>, vector<1x16x128xf32>
    %23 = vector.shape_cast %22 : vector<1x16x128xf32> to vector<16x128xf32>
    %24 = vector.shape_cast %21 : vector<16x128xf32> to vector<1x16x128xf32>
    tpu.vector_store %arg6[%c0_17, %c0_18, %c0_19], %24 {strides = array<i32>} : memref<1x16x128xf32, #tpu.memory_space<vmem>>, vector<1x16x128xf32>,
    return
  }
  func.func @transform_0(%arg0: i32) -> (i32, i32, i32) {
    %c0_i32 = arith.constant 0 : i32
    %c0_i32_0 = arith.constant 0 : i32
    %c0_i32_1 = arith.constant 0 : i32
    %c0_i32_2 = arith.constant 0 : i32
    return %c0_i32, %c0_i32_0, %c0_i32_1 : i32, i32, i32
  }
  func.func @transform_1(%arg0: i32) -> (i32, i32, i32) {
    %c0_i32 = arith.constant 0 : i32
    %c0_i32_0 = arith.constant 0 : i32
    %c0_i32_1 = arith.constant 0 : i32
    %c0_i32_2 = arith.constant 0 : i32
    return %c0_i32, %c0_i32_0, %c0_i32_1 : i32, i32, i32
  }
  func.func @transform_2(%arg0: i32) -> (i32, i32, i32) {
    %c0_i32 = arith.constant 0 : i32
    %c0_i32_0 = arith.constant 0 : i32
    %c0_i32_1 = arith.constant 0 : i32
    %c0_i32_2 = arith.constant 0 : i32
    return %c0_i32, %c0_i32_0, %c0_i32_1 : i32, i32, i32
  }
  func.func @transform_3(%arg0: i32) -> (i32, i32, i32) {
    %c0_i32 = arith.constant 0 : i32
    %c0_i32_0 = arith.constant 0 : i32
    %c0_i32_1 = arith.constant 0 : i32
    %c0_i32_2 = arith.constant 0 : i32
    return %c0_i32, %c0_i32_0, %c0_i32_1 : i32, i32, i32
  }
  func.func @transform_4(%arg0: i32) -> (i32, i32, i32) {
    %c0_i32 = arith.constant 0 : i32
    %c0_i32_0 = arith.constant 0 : i32
    %c0_i32_1 = arith.constant 0 : i32
    return %c0_i32, %c0_i32_0, %arg0 : i32, i32, i32
  }
  func.func @transform_5(%arg0: i32) -> (i32, i32, i32) {
    %c0_i32 = arith.constant 0 : i32
    %c0_i32_0 = arith.constant 0 : i32
    %c0_i32_1 = arith.constant 0 : i32
    return %c0_i32, %c0_i32_0, %arg0 : i32, i32, i32
  }
}

</mosaic_0001>

<bundles_post_ra>
// kernel: _lambda_.6
= control target key start
LH: loop header
LB: loop body
LE: loop exit
PB: predicated region body
PF: predicated region fallthrough
CT: control target
= control target key end

     0   :  { %v350_v3 = vmov 0   ;;  %vm82_vm0 = vcmask 130048   ;;  %s432_s2 = inlined_call_operand.vmem [shape: bf16[1,16,1012], index: 2, kind: input, shape index: {}]   ;;  %s433_s0 = inlined_call_operand.vmem [shape: bf16[1,16,16], index: 0, kind: input, shape index: {}]   ;;  %s434_s1 = inlined_call_operand.vmem [shape: f32[1,16,1], index: 1, kind: input, shape index: {}]   ;;  %s435_s3 = inlined_call_operand.vmem [shape: bf16[1,16,1012], index: 3, kind: output, shape index: {}]  }
   0x1   :  { %v17_v0 = vld [vmem:[%s432_s2] sm:$0xff]  ;;  %v18_v2 = vld [vmem:[%s432_s2 + $0x8] sm:$0xff]  ;;  %118 = vmatprep.mubr.bf16.mxu0 %v350_v3  ;;  %161 = vmatprep.mubr.bf16.mxu1 %v350_v3  ;;  %v19_v10 = vld [vmem:[%s432_s2 + $0x10] sm:$0xff] }
   0x2   :  { %v21_v1 = vld [vmem:[%s432_s2 + $0x20] sm:$0xff]  ;;  %v22_v5 = vld [vmem:[%s432_s2 + $0x28] sm:$0xff]  ;;  %348 = vset.pattern.permute.xlu0 %v350_v3  ;;  %v23_v11 = vld [vmem:[%s432_s2 + $0x30] sm:$0xff] }
   0x3   :  { %v320_v4 = vcombine.high %v17_v0, %v21_v1  ;;  %v319_v6 = vcombine.low %v17_v0, %v21_v1  ;;  %v322_v7 = vcombine.high %v18_v2, %v22_v5  ;;  %v321_v8 = vcombine.low %v18_v2, %v22_v5  ;;  %v349_v9 = vld [vmem:[%s433_s0] sm:$0xff]   ;;  %v20_v13 = vld [vmem:[%s432_s2 + $0x18] sm:$0xff]  ;;  %v26_v19 = vld [vmem:[%s434_s1 + $0x8] sm:$0xff] }
   0x4   :  { %v324_v12 = vcombine.high %v19_v10, %v23_v11  ;;  %v24_v14 = vld [vmem:[%s432_s2 + $0x38] sm:$0xff]  ;;  %v25_v15 = vld [vmem:[%s434_s1] sm:$0xff]  ;;  %v323_v16 = vcombine.low %v19_v10, %v23_v11 }
   0x5   :  { %86 = vmatprep.subr.bf16.mxu0 %v320_v4  ;;  %129 = vmatprep.subr.bf16.mxu1 %v322_v7  ;;  %v326_v17 = vcombine.high %v20_v13, %v24_v14  ;;  %v325_v18 = vcombine.low %v20_v13, %v24_v14 }
   0x6   :  { %87 = vmatpush1.bf16.msra.mxu0 %v319_v6  ;;  %130 = vmatpush1.bf16.msra.mxu1 %v321_v8 }
   0x7   :  { %172 = vmatprep.subr.bf16.mxu0 %v324_v12  ;;  %215 = vmatprep.subr.bf16.mxu1 %v326_v17 }
   0x8   :  { %29 = vperm.xlu0 %348, %v25_v15  }
   0x9   :  { %327 = vmatmul.mubr.msk.bf16.vlgmr.msra.gmra.mrb[0].mxu0 %vm82_vm0, %v349_v9  ;;  %328 = vmatmul.mubr.msk.bf16.vlgmr.msra.gmra.mrb[0].mxu1 %vm82_vm0, %v349_v9 }
   0xa   :  { %173 = vmatpush1.bf16.msra.mxu0 %v323_v16  ;;  %216 = vmatpush1.bf16.msra.mxu1 %v325_v18 }
   0xb   :  { %204 = vmatprep.mubr.bf16.mxu0 %v350_v3  ;;  %247 = vmatprep.mubr.bf16.mxu1 %v350_v3 }
   0xc   :  { %34 = vperm.xlu0 %348, %v26_v19  }
  0x11   :  { %329 = vmatmul.mubr.msk.bf16.vlgmr.msra.gmra.mrb[4].mxu0 %vm82_vm0, %v349_v9  ;;  %330 = vmatmul.mubr.msk.bf16.vlgmr.msra.gmra.mrb[4].mxu1 %vm82_vm0, %v349_v9 }
  0x87   :  { %v30_v20 = vpop.permute.xlu0 %29 }
  0x8b   :  { %v35_v22 = vpop.permute.xlu0 %34 }
  0xdc   :  { %v120_v21 = vpop.f32.mrb[0].mxu0  ;;  %v163_v24 = vpop.f32.mrb[0].mxu1 }
  0xdd   :  { %v121_v23 = vadd.f32 %v120_v21, %v30_v20  ;;  %v122_v25 = vpop.f32.mrb[1].mxu0  ;;  %v164_v26 = vadd.f32 %v163_v24, %v30_v20  ;;  %v165_v28 = vpop.f32.mrb[1].mxu1 }
  0xde   :  { %v123_v27 = vadd.f32 %v122_v25, %v30_v20  ;;  %v124_v29 = vpop.f32.mrb[2].mxu0  ;;  %v166_v30 = vadd.f32 %v165_v28, %v30_v20  ;;  %v167_v32 = vpop.f32.mrb[2].mxu1 }
  0xdf   :  { %v125_v31 = vadd.f32 %v124_v29, %v35_v22  ;;  %v126_v33 = vpop.f32.mrb[3].mxu0  ;;  %v168_v35 = vadd.f32 %v167_v32, %v35_v22  ;;  %v169_v37 = vpop.f32.mrb[3].mxu1 }
  0xe0   :  { %v339_v34 = vpack.c.bf16 %v123_v27, %v121_v23  ;;  %v127_v36 = vadd.f32 %v126_v33, %v35_v22  ;;  %v340_v38 = vpack.c.bf16 %v166_v30, %v164_v26  ;;  %v170_v39 = vadd.f32 %v169_v37, %v35_v22 }
  0xe2   :  { %306 = vst [vmem:[%s435_s3] sm:$0xff] %v339_v34  ;;  %v343_v40 = vpack.c.bf16 %v127_v36, %v125_v31  ;;  %307 = vst [vmem:[%s435_s3 + $0x8] sm:$0xff] %v340_v38  ;;  %v344_v41 = vpack.c.bf16 %v170_v39, %v168_v35 }
  0xe4   :  { %310 = vst [vmem:[%s435_s3 + $0x20] sm:$0xff] %v343_v40  ;;  %v206_v42 = vpop.f32.mrb[4].mxu0  ;;  %311 = vst [vmem:[%s435_s3 + $0x28] sm:$0xff] %v344_v41  ;;  %v249_v44 = vpop.f32.mrb[4].mxu1 }
  0xe5   :  { %v207_v43 = vadd.f32 %v206_v42, %v30_v20  ;;  %v208_v45 = vpop.f32.mrb[5].mxu0  ;;  %v250_v46 = vadd.f32 %v249_v44, %v30_v20  ;;  %v251_v48 = vpop.f32.mrb[5].mxu1 }
  0xe6   :  { %v209_v47 = vadd.f32 %v208_v45, %v30_v20  ;;  %v210_v49 = vpop.f32.mrb[6].mxu0  ;;  %v252_v50 = vadd.f32 %v251_v48, %v30_v20  ;;  %v253_v52 = vpop.f32.mrb[6].mxu1 }
  0xe7   :  { %v211_v51 = vadd.f32 %v210_v49, %v35_v22  ;;  %v212_v53 = vpop.f32.mrb[7].mxu0  ;;  %v254_v55 = vadd.f32 %v253_v52, %v35_v22  ;;  %v255_v57 = vpop.f32.mrb[7].mxu1 }
  0xe8   :  { %v341_v54 = vpack.c.bf16 %v209_v47, %v207_v43  ;;  %v213_v56 = vadd.f32 %v212_v53, %v35_v22  ;;  %v342_v58 = vpack.c.bf16 %v252_v50, %v250_v46  ;;  %v256_v59 = vadd.f32 %v255_v57, %v35_v22 }
  0xea   :  { %308 = vst [vmem:[%s435_s3 + $0x10] sm:$0xff] %v341_v54  ;;  %v345_v60 = vpack.c.bf16 %v213_v56, %v211_v51  ;;  %309 = vst [vmem:[%s435_s3 + $0x18] sm:$0xff] %v342_v58  ;;  %v346_v61 = vpack.c.bf16 %v256_v59, %v254_v55 }
  0xec   :  { %312 = vst [vmem:[%s435_s3 + $0x30] sm:$0xff] %v345_v60  ;;  %313 = vst [vmem:[%s435_s3 + $0x38] sm:$0xff] %v346_v61 }

// kernel: _lambda_.7
= control target key start
LH: loop header
LB: loop body
LE: loop exit
PB: predicated region body
PF: predicated region fallthrough
CT: control target
= control target key end

     0   :  { %s585_s12 = smov 0   ;;  %s587_s13 = smov 0   ;;  %s633_s0 = inlined_call_operand.vmem [shape: bf16[4,16,32], index: 0, kind: input, shape index: {}]   ;;  %s634_s1 = inlined_call_operand.vmem [shape: f32[4,16,1], index: 1, kind: input, shape index: {}]   ;;  %s635_s2 = inlined_call_operand.vmem [shape: bf16[4,32,254], index: 2, kind: input, shape index: {}]   ;;  %s636_s3 = inlined_call_operand.vmem [shape: bf16[4,16,254], index: 3, kind: output, shape index: {}]  }
   0x1   :  { %s589_s14 = smov 0  }
   0x2 LB: > { %s25_s15 = sadd.s32 1, %s558_s13  ;;  %p482_p0 = scmp.ge.s32.totalorder %s562_s14, 1  ;;  %s562_s14 = sphi %s589_s14, %s13_s14   ;;  %s558_s13 = sphi %s587_s13, %s638_s13   ;;  %s554_s12 = sphi %s585_s12, %s637_s12  }
   0x3   : > { %p27_p1 = scmp.ge.s32.totalorder %s25_s15, 4  ;;  %p178_p2 = scmp.lt.s32.totalorder %s562_s14, 5 }
   0x5   : > { %s640_s15 = smov (%p27_p1, %s25_s15), 0  ;;  %p179_p3 = pnand %p482_p0, %p178_p2 }
   0x6   : > { %p220_p4 = scmp.lt.s32.totalorder (!%p179_p3), %s554_s12, 3  ;;  %v564_v0 = vmov (!%p179_p3), 0   ;;  %vm294_vm0 = vcmask (!%p179_p3), 261120  }
   0x7   : > { %182 = sbr.rel (%p179_p3) target bundleno = 249 (0xf9), region = 32  ;;  %330 = vmatprep.mubr.bf16.mxu0 (!%p179_p3), %v564_v0  ;;  %532 = vset.pattern.permute.xlu0 (!%p179_p3), %v564_v0 }
   0xe   : > { %s642_s12 = smov (!%p220_p4, %s554_s12), 3 }
   0xf   : > { %s503_s16 = sshll.u32 %s642_s12, 5  ;;  %s501_s17 = sshll.u32 %s642_s12, 3 }
  0x10   : > { %s238_s20 = scalar_lea.vmem %s635_s2, %s503_s16  ;;  %s502_s21 = sshll.u32 %s642_s12, 4 }
  0x11   : > { %v533_v1 = vld [vmem:[%s238_s20 + $0x4] ss:$8 sps:$4 sm:$0xff]   ;;  %v535_v2 = vld [vmem:[%s238_s20] ss:$8 sps:$4 sm:$0xff]   ;;  %s224_s24 = scalar_lea.vmem %s633_s0, %s501_s17  ;;  %s229_s27 = scalar_lea.vmem %s634_s1, %s502_s21  ;;  %v536_v3 = vld [vmem:[%s238_s20 + $0x14] ss:$8 sps:$4 sm:$0xff]  }
  0x12   : > { %298 = vmatprep.subr.bf16.mxu0 %v533_v1  ;;  %v538_v4 = vld [vmem:[%s238_s20 + $0x10] ss:$8 sps:$4 sm:$0xff]   ;;  %v257_v5 = vld [vmem:[%s229_s27] sm:$0xff]  ;;  %v258_v6 = vld [vmem:[%s229_s27 + $0x8] sm:$0xff]  ;;  %s248_s30 = scalar_lea.vmem %s636_s3, %s502_s21 }
  0x13   : > { %299 = vmatpush1.bf16.msra.mxu0 %v535_v2  ;;  %261 = vperm.xlu0 %532, %v257_v5   ;;  %v539_v7 = vld [vmem:[%s224_s24] sm:$0xff]  }
  0x14   : > { %300 = vmatprep.subr.bf16.mxu0 %v536_v3 }
  0x17   : > { %301 = vmatpush1.bf16.msra.mxu0 %v538_v4  ;;  %266 = vperm.xlu0 %532, %v258_v6  }
  0x1a   : > { %496 = vmatmul.mubr.msk.bf16.vlgmr.msra.gmra.mrb[0].mxu0 %vm294_vm0, %v539_v7 }
  0x92   : > { %v262_v8 = vpop.permute.xlu0 %261 }
  0x96   : > { %v267_v12 = vpop.permute.xlu0 %266 }
  0xed   : > { %v332_v9 = vpop.f32.mrb[0].mxu0 }
  0xee   : > { %v333_v10 = vadd.f32 %v332_v9, %v262_v8  ;;  %v334_v11 = vpop.f32.mrb[1].mxu0 }
  0xef   : > { %v335_v13 = vadd.f32 %v334_v11, %v262_v8  ;;  %v336_v14 = vpop.f32.mrb[2].mxu0 }
  0xf0   : > { %vm341_vm1 = vcmp.ge.f32.partialorder %v333_v10, 0.0  ;;  %v345_v15 = vmul.f32 0.1, %v333_v10  ;;  %v337_v16 = vadd.f32 %v336_v14, %v267_v12  ;;  %v338_v17 = vpop.f32.mrb[3].mxu0 }
  0xf1   : > { %vm342_vm2 = vcmp.ge.f32.partialorder %v335_v13, 0.0  ;;  %v346_v18 = vmul.f32 0.1, %v335_v13  ;;  %v339_v19 = vadd.f32 %v338_v17, %v267_v12 }
  0xf2   : > { %v349_v20 = vsel %vm341_vm1, %v333_v10, %v345_v15  ;;  %vm343_vm3 = vcmp.ge.f32.partialorder %v337_v16, 0.0  ;;  %v347_v21 = vmul.f32 0.1, %v337_v16 }
  0xf3   : > { %v350_v22 = vsel %vm342_vm2, %v335_v13, %v346_v18  ;;  %vm344_vm4 = vcmp.ge.f32.partialorder %v339_v19, 0.0  ;;  %v348_v23 = vmul.f32 0.1, %v339_v19 }
  0xf4   : > { %v505_v24 = vpack.c.bf16 %v350_v22, %v349_v20  ;;  %v351_v25 = vsel %vm343_vm3, %v337_v16, %v347_v21 }
  0xf5   : > { %v352_v26 = vsel %vm344_vm4, %v339_v19, %v348_v23 }
  0xf6   : > { %365 = vst [vmem:[%s248_s30] sm:$0xff] %v505_v24  ;;  %v506_v27 = vpack.c.bf16 %v352_v26, %v351_v25 }
  0xf8   : > { %366 = vst [vmem:[%s248_s30 + $0x8] sm:$0xff] %v506_v27 }
  0xf9 PF: > { %s13_s14 = sadd.s32 1, %s562_s14   ;;  %s637_s12 = smov %s558_s13 }
  0xfa   : > { %p10_p5 = scmp.ge.s32.totalorder %s13_s14, 6   ;;  %s638_s13 = smov %s640_s15 }
  0xfc   :  { %12 = sbr.rel (!%p10_p5) target bundleno = 2 (0x2), region = 68 }

// kernel: _lambda_.8
= control target key start
LH: loop header
LB: loop body
LE: loop exit
PB: predicated region body
PF: predicated region fallthrough
CT: control target
= control target key end

     0   :  { %s829_s12 = smov 0   ;;  %s831_s13 = smov 0   ;;  %s904_s0 = inlined_call_operand.vmem [shape: bf16[4,64,128], index: 0, kind: input, shape index: {}]   ;;  %s905_s1 = inlined_call_operand.vmem [shape: f32[4,64,1], index: 1, kind: input, shape index: {}]   ;;  %s906_s2 = inlined_call_operand.vmem [shape: bf16[4,128,64], index: 2, kind: input, shape index: {}]   ;;  %s907_s3 = inlined_call_operand.vmem [shape: bf16[4,64,64], index: 3, kind: output, shape index: {}]  }
   0x1   :  { %s833_s14 = smov 0  }
   0x2 LB: > { %s25_s15 = sadd.s32 1, %s802_s13  ;;  %p627_p0 = scmp.ge.s32.totalorder %s806_s14, 1  ;;  %s806_s14 = sphi %s833_s14, %s13_s14   ;;  %s802_s13 = sphi %s831_s13, %s909_s13   ;;  %s798_s12 = sphi %s829_s12, %s908_s12  }
   0x3   : > { %p27_p1 = scmp.ge.s32.totalorder %s25_s15, 4  ;;  %p176_p2 = scmp.lt.s32.totalorder %s806_s14, 5 }
   0x5   : > { %s911_s15 = smov (%p27_p1, %s25_s15), 0  ;;  %p177_p3 = pnand %p627_p0, %p176_p2 }
   0x6   : > { %p216_p4 = scmp.lt.s32.totalorder (!%p177_p3), %s798_s12, 3  ;;  %v808_v0 = vmov (!%p177_p3), 0  }
   0x7   : > { %180 = sbr.rel (%p177_p3) target bundleno = 275 (0x113), region = 32  ;;  %771 = vset.pattern.permute.xlu1 (!%p177_p3), %v808_v0  ;;  %770 = vset.pattern.permute.xlu0 (!%p177_p3), %v808_v0 }
   0xe   : > { %s913_s12 = smov (!%p216_p4, %s798_s12), 3 }
   0xf   : > { %s659_s16 = sshll.u32 %s913_s12, 6  ;;  %s658_s20 = sshll.u32 %s913_s12, 5 }
  0x10   : > { %s853_s19 = scalar_lea.vmem %s906_s2, %s659_s16  ;;  %s864_s23 = scalar_lea.vmem %s904_s0, %s658_s20 }
  0x11   : > { %v772_v1 = vld [vmem:[%s853_s19] sm:$0xff]   ;;  %v773_v2 = vld [vmem:[%s853_s19 + $0x8] sm:$0xff]   ;;  %v774_v3 = vld [vmem:[%s853_s19 + $0x10] sm:$0xff]   ;;  %s872_s26 = scalar_lea.vmem %s905_s1, %s659_s16  ;;  %s241_s29 = scalar_lea.vmem %s907_s3, %s658_s20 }
  0x12   : > { %705 = vmatprep.subr.bf16.mxu0 %v772_v1  ;;  %729 = vmatprep.subr.bf16.mxu1 %v772_v1  ;;  %v775_v4 = vld [vmem:[%s853_s19 + $0x18] sm:$0xff]   ;;  %v780_v5 = vld [vmem:[%s864_s23] sm:$0xff]   ;;  %v781_v6 = vld [vmem:[%s864_s23 + $0x10] sm:$0xff]  }
  0x13   : > { %706 = vmatpush3.bf16.msra.mxu0 %v772_v1  ;;  %737 = vmatpush3.bf16.msra.mxu1 %v772_v1  ;;  %v776_v7 = vld [vmem:[%s853_s19 + $0x20] sm:$0xff]   ;;  %v269_v8 = vld [vmem:[%s872_s26 + $0x10] sm:$0xff]  ;;  %v270_v10 = vld [vmem:[%s872_s26 + $0x18] sm:$0xff] }
  0x14   : > { %707 = vmatprep.subr.bf16.mxu0 %v773_v2  ;;  %730 = vmatprep.subr.bf16.mxu1 %v773_v2  ;;  %v267_v9 = vld [vmem:[%s872_s26] sm:$0xff]  ;;  %v268_v11 = vld [vmem:[%s872_s26 + $0x8] sm:$0xff]  ;;  %v778_v15 = vld [vmem:[%s853_s19 + $0x30] sm:$0xff]  }
  0x15   : > { %721 = vmatprep.mubr.bf16.mxu0 %v780_v5  ;;  %725 = vmatprep.mubr.bf16.mxu1 %v781_v6  ;;  %v777_v12 = vld [vmem:[%s853_s19 + $0x28] sm:$0xff]   ;;  %v271_v14 = vld [vmem:[%s872_s26 + $0x20] sm:$0xff]  ;;  %v274_v16 = vld [vmem:[%s872_s26 + $0x38] sm:$0xff] }
  0x16   : > { %287 = vperm.xlu1 %771, %v269_v8   ;;  %277 = vperm.xlu0 %770, %v267_v9   ;;  %v272_v13 = vld [vmem:[%s872_s26 + $0x28] sm:$0xff]  ;;  %v273_v17 = vld [vmem:[%s872_s26 + $0x30] sm:$0xff]  ;;  %v779_v18 = vld [vmem:[%s853_s19 + $0x38] sm:$0xff]  }
  0x17   : > { %708 = vmatpush3.bf16.msra.mxu0 %v773_v2  ;;  %738 = vmatpush3.bf16.msra.mxu1 %v773_v2  ;;  %v782_v19 = vld [vmem:[%s864_s23 + $0x8] sm:$0xff]   ;;  %v783_v20 = vld [vmem:[%s864_s23 + $0x18] sm:$0xff]  }
  0x18   : > { %709 = vmatprep.subr.bf16.mxu0 %v774_v3  ;;  %731 = vmatprep.subr.bf16.mxu1 %v774_v3 }
  0x1a   : > { %292 = vperm.xlu1 %771, %v270_v10   ;;  %282 = vperm.xlu0 %770, %v268_v11  }
  0x1b   : > { %710 = vmatpush3.bf16.msra.mxu0 %v774_v3  ;;  %739 = vmatpush3.bf16.msra.mxu1 %v774_v3 }
  0x1c   : > { %711 = vmatprep.subr.bf16.mxu0 %v775_v4  ;;  %732 = vmatprep.subr.bf16.mxu1 %v775_v4 }
  0x1e   : > { %302 = vperm.xlu1 %771, %v272_v13   ;;  %297 = vperm.xlu0 %770, %v271_v14  }
  0x1f   : > { %712 = vmatpush3.bf16.msra.mxu0 %v775_v4  ;;  %740 = vmatpush3.bf16.msra.mxu1 %v775_v4 }
  0x20   : > { %713 = vmatprep.subr.bf16.mxu0 %v776_v7  ;;  %733 = vmatprep.subr.bf16.mxu1 %v776_v7 }
  0x22   : > { %312 = vperm.xlu1 %771, %v274_v16   ;;  %307 = vperm.xlu0 %770, %v273_v17  }
  0x23   : > { %714 = vmatpush3.bf16.msra.mxu0 %v776_v7  ;;  %741 = vmatpush3.bf16.msra.mxu1 %v776_v7 }
  0x24   : > { %715 = vmatprep.subr.bf16.mxu0 %v777_v12  ;;  %734 = vmatprep.subr.bf16.mxu1 %v777_v12 }
  0x27   : > { %716 = vmatpush3.bf16.msra.mxu0 %v777_v12  ;;  %742 = vmatpush3.bf16.msra.mxu1 %v777_v12 }
  0x28   : > { %717 = vmatprep.subr.bf16.mxu0 %v778_v15  ;;  %735 = vmatprep.subr.bf16.mxu1 %v778_v15 }
  0x2b   : > { %718 = vmatpush3.bf16.msra.mxu0 %v778_v15  ;;  %743 = vmatpush3.bf16.msra.mxu1 %v778_v15 }
  0x2c   : > { %719 = vmatprep.subr.bf16.mxu0 %v779_v18  ;;  %736 = vmatprep.subr.bf16.mxu1 %v779_v18 }
  0x2f   : > { %720 = vmatpush3.bf16.msra.mxu0 %v779_v18  ;;  %744 = vmatpush3.bf16.msra.mxu1 %v779_v18 }
  0x32   : > { %722 = vmatmul.mubr.bf16.vlgmr.msra.gmra.mrb[0].mxu0 %v782_v19  ;;  %726 = vmatmul.mubr.bf16.vlgmr.msra.gmra.mrb[0].mxu1 %v783_v20 }
  0x95   : > { %v278_v21 = vpop.permute.xlu0 %277  ;;  %v288_v22 = vpop.permute.xlu1 %287 }
  0x99   : > { %v283_v23 = vpop.permute.xlu0 %282  ;;  %v293_v24 = vpop.permute.xlu1 %292 }
  0x9d   : > { %v298_v25 = vpop.permute.xlu0 %297  ;;  %v303_v26 = vpop.permute.xlu1 %302 }
  0xa1   : > { %v308_v27 = vpop.permute.xlu0 %307  ;;  %v313_v40 = vpop.permute.xlu1 %312 }
 0x105   : > { %v723_v28 = vpop.f32.mrb[0].mxu0  ;;  %v727_v29 = vpop.f32.mrb[0].mxu1 }
 0x106   : > { %v430_v30 = vadd.f32 %v723_v28, %v288_v22  ;;  %v446_v31 = vadd.f32 %v727_v29, %v308_v27  ;;  %v421_v32 = vpop.f32.mrb[1].mxu0  ;;  %v437_v33 = vpop.f32.mrb[1].mxu1 }
 0x107   : > { %v422_v34 = vadd.f32 %v421_v32, %v278_v21  ;;  %v438_v35 = vadd.f32 %v437_v33, %v298_v25  ;;  %v724_v36 = vpop.f32.mrb[2].mxu0  ;;  %v728_v37 = vpop.f32.mrb[2].mxu1 }
 0x108   : > { %vm454_vm0 = vcmp.ge.f32.partialorder %v430_v30, 0.0  ;;  %v462_v38 = vmul.f32 0.1, %v430_v30  ;;  %vm458_vm1 = vcmp.ge.f32.partialorder %v446_v31, 0.0  ;;  %v466_v39 = vmul.f32 0.1, %v446_v31 }
 0x109   : > { %vm452_vm2 = vcmp.ge.f32.partialorder %v422_v34, 0.0  ;;  %v460_v41 = vmul.f32 0.1, %v422_v34  ;;  %vm456_vm3 = vcmp.ge.f32.partialorder %v438_v35, 0.0  ;;  %v464_v42 = vmul.f32 0.1, %v438_v35 }
 0x10a   : > { %v433_v43 = vadd.f32 %v724_v36, %v293_v24  ;;  %v449_v44 = vadd.f32 %v728_v37, %v313_v40  ;;  %v424_v45 = vpop.f32.mrb[3].mxu0  ;;  %v440_v46 = vpop.f32.mrb[3].mxu1  ;;  %v470_v47 = vsel %vm454_vm0, %v430_v30, %v462_v38  ;;  %v474_v48 = vsel %vm458_vm1, %v446_v31, %v466_v39 }
 0x10b   : > { %v425_v49 = vadd.f32 %v424_v45, %v283_v23  ;;  %v441_v50 = vadd.f32 %v440_v46, %v303_v26  ;;  %v468_v55 = vsel %vm452_vm2, %v422_v34, %v460_v41  ;;  %v472_v56 = vsel %vm456_vm3, %v438_v35, %v464_v42 }
 0x10c   : > { %vm455_vm4 = vcmp.ge.f32.partialorder %v433_v43, 0.0  ;;  %v463_v51 = vmul.f32 0.1, %v433_v43  ;;  %vm459_vm5 = vcmp.ge.f32.partialorder %v449_v44, 0.0  ;;  %v467_v52 = vmul.f32 0.1, %v449_v44 }
 0x10d   : > { %vm453_vm6 = vcmp.ge.f32.partialorder %v425_v49, 0.0  ;;  %v461_v53 = vmul.f32 0.1, %v425_v49  ;;  %vm457_vm7 = vcmp.ge.f32.partialorder %v441_v50, 0.0  ;;  %v465_v54 = vmul.f32 0.1, %v441_v50 }
 0x10e   : > { %v471_v57 = vsel %vm455_vm4, %v433_v43, %v463_v51  ;;  %v475_v58 = vsel %vm459_vm5, %v449_v44, %v467_v52 }
 0x10f   : > { %v678_v59 = vpack.c.bf16 %v471_v57, %v470_v47  ;;  %v688_v60 = vpack.c.bf16 %v475_v58, %v474_v48  ;;  %v469_v61 = vsel %vm453_vm6, %v425_v49, %v461_v53  ;;  %v473_v62 = vsel %vm457_vm7, %v441_v50, %v465_v54 }
 0x110   : > { %v673_v63 = vpack.c.bf16 %v469_v61, %v468_v55  ;;  %v683_v0 = vpack.c.bf16 %v473_v62, %v472_v56 }
 0x111   : > { %690 = vst [vmem:[%s241_s29 + $0x8] sm:$0xff] %v678_v59   ;;  %692 = vst [vmem:[%s241_s29 + $0x18] sm:$0xff] %v688_v60  }
 0x112   : > { %674 = vst [vmem:[%s241_s29] sm:$0xff] %v673_v63   ;;  %691 = vst [vmem:[%s241_s29 + $0x10] sm:$0xff] %v683_v0  }
 0x113 PF: > { %s13_s14 = sadd.s32 1, %s806_s14   ;;  %s908_s12 = smov %s802_s13 }
 0x114   : > { %p10_p5 = scmp.ge.s32.totalorder %s13_s14, 6   ;;  %s909_s13 = smov %s911_s15 }
 0x116   :  { %12 = sbr.rel (!%p10_p5) target bundleno = 2 (0x2), region = 68 }

// kernel: _lambda_.9
= control target key start
LH: loop header
LB: loop body
LE: loop exit
PB: predicated region body
PF: predicated region fallthrough
CT: control target
= control target key end

     0   :  { %s1258_s12 = smov 0   ;;  %s1260_s13 = smov 0   ;;  %s1361_s0 = inlined_call_operand.vmem [shape: bf16[4,64,512], index: 0, kind: input, shape index: {}]   ;;  %s1362_s1 = inlined_call_operand.vmem [shape: f32[4,64,1], index: 1, kind: input, shape index: {}]   ;;  %s1363_s2 = inlined_call_operand.vmem [shape: bf16[4,512,18], index: 2, kind: input, shape index: {}]   ;;  %s1364_s3 = inlined_call_operand.vmem [shape: bf16[4,64,18], index: 3, kind: output, shape index: {}]  }
   0x1   :  { %s1262_s14 = smov 0  }
   0x2 LB: > { %s25_s15 = sadd.s32 1, %s1231_s13  ;;  %p948_p0 = scmp.ge.s32.totalorder %s1235_s14, 1  ;;  %s1235_s14 = sphi %s1262_s14, %s13_s14   ;;  %s1231_s13 = sphi %s1260_s13, %s1366_s13   ;;  %s1227_s12 = sphi %s1258_s12, %s1365_s12  }
   0x3   : > { %p27_p1 = scmp.ge.s32.totalorder %s25_s15, 4  ;;  %p176_p2 = scmp.lt.s32.totalorder %s1235_s14, 5 }
   0x5   : > { %s1368_s15 = smov (%p27_p1, %s25_s15), 0  ;;  %p177_p3 = pnand %p948_p0, %p176_p2 }
   0x6   : > { %p216_p4 = scmp.lt.s32.totalorder (!%p177_p3), %s1227_s12, 3  ;;  %v1237_v0 = vmov (!%p177_p3), 0  }
   0x7   : > { %180 = sbr.rel (%p177_p3) target bundleno = 302 (0x12e), region = 32  ;;  %1155 = vset.pattern.permute.xlu0 (!%p177_p3), %v1237_v0  ;;  %1156 = vset.pattern.permute.xlu1 (!%p177_p3), %v1237_v0 }
   0xe   : > { %s1370_s12 = smov (!%p216_p4, %s1227_s12), 3 }
   0xf   : > { %s1017_s16 = sshll.u32 %s1370_s12, 8  ;;  %s1015_s20 = sshll.u32 %s1370_s12, 7 }
  0x10   : > { %s1282_s19 = scalar_lea.vmem %s1363_s2, %s1017_s16  ;;  %s1318_s23 = scalar_lea.vmem %s1361_s0, %s1015_s20 }
  0x11   : > { %v1157_v1 = vld [vmem:[%s1282_s19 + $0x40] sm:$0xff]   ;;  %v1161_v5 = vld [vmem:[%s1282_s19 + $0x48] sm:$0xff]   ;;  %v1165_v9 = vld [vmem:[%s1282_s19 + $0x50] sm:$0xff]   ;;  %s1016_s24 = sshll.u32 %s1370_s12, 6  ;;  %s1018_s28 = sshll.u32 %s1370_s12, 5 }
  0x12   : > { %v1158_v2 = vld [vmem:[%s1282_s19 + $0xc0] sm:$0xff]   ;;  %1050 = vmatprep.subr.bf16.mxu0 %v1157_v1  ;;  %v1162_v6 = vld [vmem:[%s1282_s19 + $0xc8] sm:$0xff]   ;;  %v1166_v10 = vld [vmem:[%s1282_s19 + $0xd0] sm:$0xff]   ;;  %s225_s27 = scalar_lea.vmem %s1362_s1, %s1016_s24  ;;  %s1346_s4 = scalar_lea.vmem %s1364_s3, %s1018_s28 }
  0x13   : > { %v1159_v3 = vld [vmem:[%s1282_s19] sm:$0xff]   ;;  %1090 = vmatprep.subr.bf16.mxu1 %v1158_v2  ;;  %v1163_v7 = vld [vmem:[%s1282_s19 + $0x8] sm:$0xff]   ;;  %v1167_v11 = vld [vmem:[%s1282_s19 + $0x10] sm:$0xff]  }
  0x14   : > { %v1160_v4 = vld [vmem:[%s1282_s19 + $0x80] sm:$0xff]   ;;  %1051 = vmatpush3.bf16.msra.mxu0 %v1159_v3  ;;  %v1164_v8 = vld [vmem:[%s1282_s19 + $0x88] sm:$0xff]   ;;  %v1168_v12 = vld [vmem:[%s1282_s19 + $0x90] sm:$0xff]  }
  0x15   : > { %1091 = vmatpush3.bf16.msra.mxu1 %v1160_v4  ;;  %1052 = vmatprep.subr.bf16.mxu0 %v1161_v5  ;;  %v1169_v13 = vld [vmem:[%s1282_s19 + $0x58] sm:$0xff]   ;;  %v1173_v17 = vld [vmem:[%s1282_s19 + $0x60] sm:$0xff]   ;;  %v1177_v21 = vld [vmem:[%s1282_s19 + $0x68] sm:$0xff]  }
  0x16   : > { %1092 = vmatprep.subr.bf16.mxu1 %v1162_v6  ;;  %v1170_v14 = vld [vmem:[%s1282_s19 + $0xd8] sm:$0xff]   ;;  %v1174_v18 = vld [vmem:[%s1282_s19 + $0xe0] sm:$0xff]   ;;  %v1178_v22 = vld [vmem:[%s1282_s19 + $0xe8] sm:$0xff]  }
  0x17   : > { %v1171_v15 = vld [vmem:[%s1282_s19 + $0x18] sm:$0xff]   ;;  %v1175_v19 = vld [vmem:[%s1282_s19 + $0x20] sm:$0xff]   ;;  %v1179_v23 = vld [vmem:[%s1282_s19 + $0x28] sm:$0xff]  }
  0x18   : > { %1053 = vmatpush3.bf16.msra.mxu0 %v1163_v7  ;;  %v1172_v16 = vld [vmem:[%s1282_s19 + $0x98] sm:$0xff]   ;;  %v1176_v20 = vld [vmem:[%s1282_s19 + $0xa0] sm:$0xff]   ;;  %v1180_v24 = vld [vmem:[%s1282_s19 + $0xa8] sm:$0xff]  }
  0x19   : > { %1093 = vmatpush3.bf16.msra.mxu1 %v1164_v8  ;;  %1054 = vmatprep.subr.bf16.mxu0 %v1165_v9  ;;  %v1181_v25 = vld [vmem:[%s1282_s19 + $0x70] sm:$0xff]   ;;  %v1185_v29 = vld [vmem:[%s1282_s19 + $0x78] sm:$0xff]   ;;  %v323_v43 = vld [vmem:[%s225_s27] sm:$0xff] }
  0x1a   : > { %1094 = vmatprep.subr.bf16.mxu1 %v1166_v10  ;;  %v1182_v26 = vld [vmem:[%s1282_s19 + $0xf0] sm:$0xff]   ;;  %v1186_v30 = vld [vmem:[%s1282_s19 + $0xf8] sm:$0xff]   ;;  %333 = vperm.xlu0 %1155, %v323_v43   ;;  %v324_v45 = vld [vmem:[%s225_s27 + $0x8] sm:$0xff] }
  0x1b   : > { %v1183_v27 = vld [vmem:[%s1282_s19 + $0x30] sm:$0xff]   ;;  %v1187_v31 = vld [vmem:[%s1282_s19 + $0x38] sm:$0xff]   ;;  %v327_v48 = vld [vmem:[%s225_s27 + $0x20] sm:$0xff] }
  0x1c   : > { %1055 = vmatpush3.bf16.msra.mxu0 %v1167_v11  ;;  %v1184_v28 = vld [vmem:[%s1282_s19 + $0xb0] sm:$0xff]   ;;  %v1188_v32 = vld [vmem:[%s1282_s19 + $0xb8] sm:$0xff]   ;;  %v328_v51 = vld [vmem:[%s225_s27 + $0x28] sm:$0xff] }
  0x1d   : > { %1095 = vmatpush3.bf16.msra.mxu1 %v1168_v12  ;;  %1056 = vmatprep.subr.bf16.mxu0 %v1169_v13  ;;  %v1189_v33 = vld [vmem:[%s1318_s23] ss:$16 sps:$4 sm:$0xff]   ;;  %v1191_v34 = vld [vmem:[%s1318_s23 + $0x4] ss:$16 sps:$4 sm:$0xff]   ;;  %v1192_v35 = vld [vmem:[%s1318_s23 + $0x8] ss:$16 sps:$4 sm:$0xff]  }
  0x1e   : > { %1096 = vmatprep.subr.bf16.mxu1 %v1170_v14  ;;  %v1194_v36 = vld [vmem:[%s1318_s23 + $0xc] ss:$16 sps:$4 sm:$0xff]   ;;  %675 = vmatprep.mubr.bf16.mxu0 %v1191_v34  ;;  %v1195_v37 = vld [vmem:[%s1318_s23 + $0x24] ss:$16 sps:$4 sm:$0xff]   ;;  %v1199_v39 = vld [vmem:[%s1318_s23 + $0x20] ss:$16 sps:$4 sm:$0xff]  }
  0x1f   : > { %740 = vmatprep.mubr.bf16.mxu1 %v1194_v36  ;;  %v1197_v38 = vld [vmem:[%s1318_s23 + $0x2c] ss:$16 sps:$4 sm:$0xff]   ;;  %v1200_v40 = vld [vmem:[%s1318_s23 + $0x28] ss:$16 sps:$4 sm:$0xff]   ;;  %v1201_v41 = vld [vmem:[%s1318_s23 + $0x44] ss:$16 sps:$4 sm:$0xff]   ;;  %338 = vperm.xlu0 %1155, %v324_v45  }
  0x20   : > { %1057 = vmatpush3.bf16.msra.mxu0 %v1171_v15  ;;  %v1203_v42 = vld [vmem:[%s1318_s23 + $0x4c] ss:$16 sps:$4 sm:$0xff]   ;;  %v325_v44 = vld [vmem:[%s225_s27 + $0x10] sm:$0xff]  ;;  %v1206_v49 = vld [vmem:[%s1318_s23 + $0x48] ss:$16 sps:$4 sm:$0xff]  }
  0x21   : > { %1097 = vmatpush3.bf16.msra.mxu1 %v1172_v16  ;;  %1058 = vmatprep.subr.bf16.mxu0 %v1173_v17  ;;  %v326_v46 = vld [vmem:[%s225_s27 + $0x18] sm:$0xff]  ;;  %v1205_v47 = vld [vmem:[%s1318_s23 + $0x40] ss:$16 sps:$4 sm:$0xff]   ;;  %v1207_v50 = vld [vmem:[%s1318_s23 + $0x64] ss:$16 sps:$4 sm:$0xff]  }
  0x22   : > { %1098 = vmatprep.subr.bf16.mxu1 %v1174_v18  ;;  %343 = vperm.xlu1 %1156, %v325_v44   ;;  %v1209_v52 = vld [vmem:[%s1318_s23 + $0x6c] ss:$16 sps:$4 sm:$0xff]   ;;  %v329_v53 = vld [vmem:[%s225_s27 + $0x30] sm:$0xff]  ;;  %v1212_v56 = vld [vmem:[%s1318_s23 + $0x68] ss:$16 sps:$4 sm:$0xff]  }
  0x23   : > { %353 = vperm.xlu0 %1155, %v327_v48   ;;  %v330_v54 = vld [vmem:[%s225_s27 + $0x38] sm:$0xff]  ;;  %v1211_v55 = vld [vmem:[%s1318_s23 + $0x60] ss:$16 sps:$4 sm:$0xff]  }
  0x24   : > { %1059 = vmatpush3.bf16.msra.mxu0 %v1175_v19 }
  0x25   : > { %1099 = vmatpush3.bf16.msra.mxu1 %v1176_v20  ;;  %1060 = vmatprep.subr.bf16.mxu0 %v1177_v21 }
  0x26   : > { %1100 = vmatprep.subr.bf16.mxu1 %v1178_v22  ;;  %348 = vperm.xlu1 %1156, %v326_v46  }
  0x27   : > { %363 = vperm.xlu0 %1155, %v329_v53  }
  0x28   : > { %1061 = vmatpush3.bf16.msra.mxu0 %v1179_v23 }
  0x29   : > { %1101 = vmatpush3.bf16.msra.mxu1 %v1180_v24  ;;  %1062 = vmatprep.subr.bf16.mxu0 %v1181_v25 }
  0x2a   : > { %1102 = vmatprep.subr.bf16.mxu1 %v1182_v26  ;;  %358 = vperm.xlu1 %1156, %v328_v51  }
  0x2c   : > { %1063 = vmatpush3.bf16.msra.mxu0 %v1183_v27 }
  0x2d   : > { %1103 = vmatpush3.bf16.msra.mxu1 %v1184_v28  ;;  %1064 = vmatprep.subr.bf16.mxu0 %v1185_v29 }
  0x2e   : > { %1104 = vmatprep.subr.bf16.mxu1 %v1186_v30  ;;  %368 = vperm.xlu1 %1156, %v330_v54  }
  0x30   : > { %1065 = vmatpush3.bf16.msra.mxu0 %v1187_v31 }
  0x31   : > { %1105 = vmatpush3.bf16.msra.mxu1 %v1188_v32 }
  0x33   : > { %676 = vmatmul.mubr.bf16.vlgmr.msra.gmra.mrb[0].mxu0 %v1189_v33 }
  0x34   : > { %741 = vmatmul.mubr.bf16.vlgmr.msra.gmra.mrb[0].mxu1 %v1192_v35  ;;  %683 = vmatprep.mubr.bf16.mxu0 %v1195_v37 }
  0x35   : > { %748 = vmatprep.mubr.bf16.mxu1 %v1197_v38 }
  0x3b   : > { %684 = vmatmul.mubr.bf16.gmra.mrb[4].mxu0 %v1199_v39 }
  0x3c   : > { %749 = vmatmul.mubr.bf16.gmra.mrb[4].mxu1 %v1200_v40  ;;  %691 = vmatprep.mubr.bf16.mxu0 %v1201_v41 }
  0x3d   : > { %756 = vmatprep.mubr.bf16.mxu1 %v1203_v42 }
  0x43   : > { %692 = vmatmul.mubr.bf16.gmra.mrb[8].mxu0 %v1205_v47 }
  0x44   : > { %757 = vmatmul.mubr.bf16.gmra.mrb[8].mxu1 %v1206_v49  ;;  %699 = vmatprep.mubr.bf16.mxu0 %v1207_v50 }
  0x45   : > { %764 = vmatprep.mubr.bf16.mxu1 %v1209_v52 }
  0x4b   : > { %700 = vmatmul.mubr.bf16.gmra.mrb[12].mxu0 %v1211_v55 }
  0x4c   : > { %765 = vmatmul.mubr.bf16.gmra.mrb[12].mxu1 %v1212_v56 }
  0x99   : > { %v334_v57 = vpop.permute.xlu0 %333 }
  0x9e   : > { %v339_v59 = vpop.permute.xlu0 %338 }
  0xa1   : > { %v344_v10 = vpop.permute.xlu1 %343 }
  0xa2   : > { %v354_v35 = vpop.permute.xlu0 %353 }
  0xa5   : > { %v349_v29 = vpop.permute.xlu1 %348 }
  0xa6   : > { %v364_v56 = vpop.permute.xlu0 %363 }
  0xa9   : > { %v359_v52 = vpop.permute.xlu1 %358 }
 0x106   : > { %v1066_v58 = vpop.f32.mrb[0].mxu0 }
 0x107   : > { %v1106_v60 = vpop.f32.mrb[0].mxu1  ;;  %v1067_v61 = vpop.f32.mrb[1].mxu0 }
 0x108   : > { %v1068_v62 = vadd.f32 %v1067_v61, %v1066_v58  ;;  %v1107_v63 = vpop.f32.mrb[1].mxu1  ;;  %v1069_v0 = vpop.f32.mrb[2].mxu0 }
 0x109   : > { %v1108_v1 = vadd.f32 %v1107_v63, %v1106_v60  ;;  %v1109_v2 = vpop.f32.mrb[2].mxu1  ;;  %v1070_v3 = vpop.f32.mrb[3].mxu0 }
 0x10a   : > { %v678_v4 = vadd.f32 %v1068_v62, %v334_v57  ;;  %v1071_v5 = vadd.f32 %v1070_v3, %v1069_v0  ;;  %v1110_v6 = vpop.f32.mrb[3].mxu1 }
 0x10b   : > { %v1111_v7 = vadd.f32 %v1110_v6, %v1109_v2 }
 0x10c   : > { %v743_v8 = vadd.f32 %v1108_v1, %v678_v4  ;;  %v681_v9 = vadd.f32 %v1071_v5, %v339_v59 }
 0x10e   : > { %v781_v11 = vmul.f32 0.1, %v743_v8  ;;  %v746_v12 = vadd.f32 %v1111_v7, %v681_v9  ;;  %v1072_v13 = vpop.f32.mrb[4].mxu0  ;;  %vm773_vm0 = vcmp.ge.f32.partialorder %v743_v8, 0.0 }
 0x10f   : > { %v1112_v14 = vpop.f32.mrb[4].mxu1  ;;  %v1073_v15 = vpop.f32.mrb[5].mxu0 }
 0x110   : > { %vm774_vm1 = vcmp.ge.f32.partialorder %v746_v12, 0.0  ;;  %v782_v16 = vmul.f32 0.1, %v746_v12  ;;  %v1074_v17 = vadd.f32 %v1073_v15, %v1072_v13  ;;  %v1113_v18 = vpop.f32.mrb[5].mxu1  ;;  %v1075_v19 = vpop.f32.mrb[6].mxu0  ;;  %v789_v23 = vsel %vm773_vm0, %v743_v8, %v781_v11 }
 0x111   : > { %v1114_v20 = vadd.f32 %v1113_v18, %v1112_v14  ;;  %v1115_v21 = vpop.f32.mrb[6].mxu1  ;;  %v1076_v22 = vpop.f32.mrb[7].mxu0 }
 0x112   : > { %v790_v24 = vsel %vm774_vm1, %v746_v12, %v782_v16  ;;  %v686_v25 = vadd.f32 %v1074_v17, %v344_v10  ;;  %v1077_v26 = vadd.f32 %v1076_v22, %v1075_v19  ;;  %v1116_v27 = vpop.f32.mrb[7].mxu1  ;;  %v369_v10 = vpop.permute.xlu1 %368 }
 0x113   : > { %v1030_v28 = vpack.c.bf16 %v790_v24, %v789_v23  ;;  %v1117_v30 = vadd.f32 %v1116_v27, %v1115_v21 }
 0x114   : > { %v751_v31 = vadd.f32 %v1114_v20, %v686_v25  ;;  %v689_v32 = vadd.f32 %v1077_v26, %v349_v29 }
 0x115   : > { %1031 = vst [vmem:[%s1346_s4] sm:$0xff] %v1030_v28  }
 0x116   : > { %v783_v33 = vmul.f32 0.1, %v751_v31  ;;  %v754_v34 = vadd.f32 %v1117_v30, %v689_v32  ;;  %v1078_v36 = vpop.f32.mrb[8].mxu0  ;;  %vm775_vm2 = vcmp.ge.f32.partialorder %v751_v31, 0.0 }
 0x117   : > { %v1118_v37 = vpop.f32.mrb[8].mxu1  ;;  %v1079_v38 = vpop.f32.mrb[9].mxu0 }
 0x118   : > { %vm776_vm3 = vcmp.ge.f32.partialorder %v754_v34, 0.0  ;;  %v784_v39 = vmul.f32 0.1, %v754_v34  ;;  %v1080_v40 = vadd.f32 %v1079_v38, %v1078_v36  ;;  %v1119_v41 = vpop.f32.mrb[9].mxu1  ;;  %v1081_v42 = vpop.f32.mrb[10].mxu0  ;;  %v791_v46 = vsel %vm775_vm2, %v751_v31, %v783_v33 }
 0x119   : > { %v1120_v43 = vadd.f32 %v1119_v41, %v1118_v37  ;;  %v1121_v44 = vpop.f32.mrb[10].mxu1  ;;  %v1082_v45 = vpop.f32.mrb[11].mxu0 }
 0x11a   : > { %v792_v47 = vsel %vm776_vm3, %v754_v34, %v784_v39  ;;  %v694_v48 = vadd.f32 %v1080_v40, %v354_v35  ;;  %v1083_v49 = vadd.f32 %v1082_v45, %v1081_v42  ;;  %v1122_v50 = vpop.f32.mrb[11].mxu1 }
 0x11b   : > { %v1035_v51 = vpack.c.bf16 %v792_v47, %v791_v46  ;;  %v1123_v53 = vadd.f32 %v1122_v50, %v1121_v44 }
 0x11c   : > { %v759_v54 = vadd.f32 %v1120_v43, %v694_v48  ;;  %v697_v55 = vadd.f32 %v1083_v49, %v359_v52 }
 0x11d   : > { %1047 = vst [vmem:[%s1346_s4 + $0x8] sm:$0xff] %v1035_v51  }
 0x11e   : > { %v785_v57 = vmul.f32 0.1, %v759_v54  ;;  %v762_v58 = vadd.f32 %v1123_v53, %v697_v55  ;;  %v1084_v59 = vpop.f32.mrb[12].mxu0  ;;  %vm777_vm4 = vcmp.ge.f32.partialorder %v759_v54, 0.0 }
 0x11f   : > { %v1124_v60 = vpop.f32.mrb[12].mxu1  ;;  %v1085_v61 = vpop.f32.mrb[13].mxu0 }
 0x120   : > { %vm778_vm5 = vcmp.ge.f32.partialorder %v762_v58, 0.0  ;;  %v786_v62 = vmul.f32 0.1, %v762_v58  ;;  %v1086_v63 = vadd.f32 %v1085_v61, %v1084_v59  ;;  %v1125_v0 = vpop.f32.mrb[13].mxu1  ;;  %v1087_v1 = vpop.f32.mrb[14].mxu0  ;;  %v793_v5 = vsel %vm777_vm4, %v759_v54, %v785_v57 }
 0x121   : > { %v1126_v2 = vadd.f32 %v1125_v0, %v1124_v60  ;;  %v1127_v3 = vpop.f32.mrb[14].mxu1  ;;  %v1088_v4 = vpop.f32.mrb[15].mxu0 }
 0x122   : > { %v794_v6 = vsel %vm778_vm5, %v762_v58, %v786_v62  ;;  %v702_v7 = vadd.f32 %v1086_v63, %v364_v56  ;;  %v1089_v8 = vadd.f32 %v1088_v4, %v1087_v1  ;;  %v1128_v9 = vpop.f32.mrb[15].mxu1 }
 0x123   : > { %v1040_v11 = vpack.c.bf16 %v794_v6, %v793_v5  ;;  %v1129_v12 = vadd.f32 %v1128_v9, %v1127_v3 }
 0x124   : > { %v767_v13 = vadd.f32 %v1126_v2, %v702_v7  ;;  %v705_v14 = vadd.f32 %v1089_v8, %v369_v10 }
 0x125   : > { %1048 = vst [vmem:[%s1346_s4 + $0x10] sm:$0xff] %v1040_v11  }
 0x126   : > { %v787_v15 = vmul.f32 0.1, %v767_v13  ;;  %v770_v16 = vadd.f32 %v1129_v12, %v705_v14  ;;  %vm779_vm6 = vcmp.ge.f32.partialorder %v767_v13, 0.0 }
 0x128   : > { %vm780_vm7 = vcmp.ge.f32.partialorder %v770_v16, 0.0  ;;  %v788_v17 = vmul.f32 0.1, %v770_v16  ;;  %v795_v18 = vsel %vm779_vm6, %v767_v13, %v787_v15 }
 0x12a   : > { %v796_v19 = vsel %vm780_vm7, %v770_v16, %v788_v17 }
 0x12b   : > { %v1045_v20 = vpack.c.bf16 %v796_v19, %v795_v18 }
 0x12d   : > { %1049 = vst [vmem:[%s1346_s4 + $0x18] sm:$0xff] %v1045_v20  }
 0x12e PF: > { %s13_s14 = sadd.s32 1, %s1235_s14   ;;  %s1365_s12 = smov %s1231_s13 }
 0x12f   : > { %p10_p5 = scmp.ge.s32.totalorder %s13_s14, 6   ;;  %s1366_s13 = smov %s1368_s15 }
 0x131   :  { %12 = sbr.rel (!%p10_p5) target bundleno = 2 (0x2), region = 68 }

// kernel: _lambda_.10
= control target key start
LH: loop header
LB: loop body
LE: loop exit
PB: predicated region body
PF: predicated region fallthrough
CT: control target
= control target key end

     0   :  { %s1258_s12 = smov 0   ;;  %s1260_s13 = smov 0   ;;  %s1361_s0 = inlined_call_operand.vmem [shape: bf16[4,64,512], index: 0, kind: input, shape index: {}]   ;;  %s1362_s1 = inlined_call_operand.vmem [shape: f32[4,64,1], index: 1, kind: input, shape index: {}]   ;;  %s1363_s2 = inlined_call_operand.vmem [shape: bf16[4,512,6], index: 2, kind: input, shape index: {}]   ;;  %s1364_s3 = inlined_call_operand.vmem [shape: bf16[4,64,6], index: 3, kind: output, shape index: {}]  }
   0x1   :  { %s1262_s14 = smov 0  }
   0x2 LB: > { %s25_s15 = sadd.s32 1, %s1231_s13  ;;  %p948_p0 = scmp.ge.s32.totalorder %s1235_s14, 1  ;;  %s1235_s14 = sphi %s1262_s14, %s13_s14   ;;  %s1231_s13 = sphi %s1260_s13, %s1366_s13   ;;  %s1227_s12 = sphi %s1258_s12, %s1365_s12  }
   0x3   : > { %p27_p1 = scmp.ge.s32.totalorder %s25_s15, 4  ;;  %p176_p2 = scmp.lt.s32.totalorder %s1235_s14, 5 }
   0x5   : > { %s1368_s15 = smov (%p27_p1, %s25_s15), 0  ;;  %p177_p3 = pnand %p948_p0, %p176_p2 }
   0x6   : > { %p216_p4 = scmp.lt.s32.totalorder (!%p177_p3), %s1227_s12, 3  ;;  %v1237_v0 = vmov (!%p177_p3), 0  }
   0x7   : > { %180 = sbr.rel (%p177_p3) target bundleno = 302 (0x12e), region = 32  ;;  %1155 = vset.pattern.permute.xlu0 (!%p177_p3), %v1237_v0  ;;  %1156 = vset.pattern.permute.xlu1 (!%p177_p3), %v1237_v0 }
   0xe   : > { %s1370_s12 = smov (!%p216_p4, %s1227_s12), 3 }
   0xf   : > { %s1017_s16 = sshll.u32 %s1370_s12, 8  ;;  %s1015_s20 = sshll.u32 %s1370_s12, 7 }
  0x10   : > { %s1282_s19 = scalar_lea.vmem %s1363_s2, %s1017_s16  ;;  %s1318_s23 = scalar_lea.vmem %s1361_s0, %s1015_s20 }
  0x11   : > { %v1157_v1 = vld [vmem:[%s1282_s19 + $0x40] sm:$0xff]   ;;  %v1161_v5 = vld [vmem:[%s1282_s19 + $0x48] sm:$0xff]   ;;  %v1165_v9 = vld [vmem:[%s1282_s19 + $0x50] sm:$0xff]   ;;  %s1016_s24 = sshll.u32 %s1370_s12, 6  ;;  %s1018_s28 = sshll.u32 %s1370_s12, 5 }
  0x12   : > { %v1158_v2 = vld [vmem:[%s1282_s19 + $0xc0] sm:$0xff]   ;;  %1050 = vmatprep.subr.bf16.mxu0 %v1157_v1  ;;  %v1162_v6 = vld [vmem:[%s1282_s19 + $0xc8] sm:$0xff]   ;;  %v1166_v10 = vld [vmem:[%s1282_s19 + $0xd0] sm:$0xff]   ;;  %s225_s27 = scalar_lea.vmem %s1362_s1, %s1016_s24  ;;  %s1346_s4 = scalar_lea.vmem %s1364_s3, %s1018_s28 }
  0x13   : > { %v1159_v3 = vld [vmem:[%s1282_s19] sm:$0xff]   ;;  %1090 = vmatprep.subr.bf16.mxu1 %v1158_v2  ;;  %v1163_v7 = vld [vmem:[%s1282_s19 + $0x8] sm:$0xff]   ;;  %v1167_v11 = vld [vmem:[%s1282_s19 + $0x10] sm:$0xff]  }
  0x14   : > { %v1160_v4 = vld [vmem:[%s1282_s19 + $0x80] sm:$0xff]   ;;  %1051 = vmatpush3.bf16.msra.mxu0 %v1159_v3  ;;  %v1164_v8 = vld [vmem:[%s1282_s19 + $0x88] sm:$0xff]   ;;  %v1168_v12 = vld [vmem:[%s1282_s19 + $0x90] sm:$0xff]  }
  0x15   : > { %1091 = vmatpush3.bf16.msra.mxu1 %v1160_v4  ;;  %1052 = vmatprep.subr.bf16.mxu0 %v1161_v5  ;;  %v1169_v13 = vld [vmem:[%s1282_s19 + $0x58] sm:$0xff]   ;;  %v1173_v17 = vld [vmem:[%s1282_s19 + $0x60] sm:$0xff]   ;;  %v1177_v21 = vld [vmem:[%s1282_s19 + $0x68] sm:$0xff]  }
  0x16   : > { %1092 = vmatprep.subr.bf16.mxu1 %v1162_v6  ;;  %v1170_v14 = vld [vmem:[%s1282_s19 + $0xd8] sm:$0xff]   ;;  %v1174_v18 = vld [vmem:[%s1282_s19 + $0xe0] sm:$0xff]   ;;  %v1178_v22 = vld [vmem:[%s1282_s19 + $0xe8] sm:$0xff]  }
  0x17   : > { %v1171_v15 = vld [vmem:[%s1282_s19 + $0x18] sm:$0xff]   ;;  %v1175_v19 = vld [vmem:[%s1282_s19 + $0x20] sm:$0xff]   ;;  %v1179_v23 = vld [vmem:[%s1282_s19 + $0x28] sm:$0xff]  }
  0x18   : > { %1053 = vmatpush3.bf16.msra.mxu0 %v1163_v7  ;;  %v1172_v16 = vld [vmem:[%s1282_s19 + $0x98] sm:$0xff]   ;;  %v1176_v20 = vld [vmem:[%s1282_s19 + $0xa0] sm:$0xff]   ;;  %v1180_v24 = vld [vmem:[%s1282_s19 + $0xa8] sm:$0xff]  }
  0x19   : > { %1093 = vmatpush3.bf16.msra.mxu1 %v1164_v8  ;;  %1054 = vmatprep.subr.bf16.mxu0 %v1165_v9  ;;  %v1181_v25 = vld [vmem:[%s1282_s19 + $0x70] sm:$0xff]   ;;  %v1185_v29 = vld [vmem:[%s1282_s19 + $0x78] sm:$0xff]   ;;  %v323_v43 = vld [vmem:[%s225_s27] sm:$0xff] }
  0x1a   : > { %1094 = vmatprep.subr.bf16.mxu1 %v1166_v10  ;;  %v1182_v26 = vld [vmem:[%s1282_s19 + $0xf0] sm:$0xff]   ;;  %v1186_v30 = vld [vmem:[%s1282_s19 + $0xf8] sm:$0xff]   ;;  %333 = vperm.xlu0 %1155, %v323_v43   ;;  %v324_v45 = vld [vmem:[%s225_s27 + $0x8] sm:$0xff] }
  0x1b   : > { %v1183_v27 = vld [vmem:[%s1282_s19 + $0x30] sm:$0xff]   ;;  %v1187_v31 = vld [vmem:[%s1282_s19 + $0x38] sm:$0xff]   ;;  %v327_v48 = vld [vmem:[%s225_s27 + $0x20] sm:$0xff] }
  0x1c   : > { %1055 = vmatpush3.bf16.msra.mxu0 %v1167_v11  ;;  %v1184_v28 = vld [vmem:[%s1282_s19 + $0xb0] sm:$0xff]   ;;  %v1188_v32 = vld [vmem:[%s1282_s19 + $0xb8] sm:$0xff]   ;;  %v328_v51 = vld [vmem:[%s225_s27 + $0x28] sm:$0xff] }
  0x1d   : > { %1095 = vmatpush3.bf16.msra.mxu1 %v1168_v12  ;;  %1056 = vmatprep.subr.bf16.mxu0 %v1169_v13  ;;  %v1189_v33 = vld [vmem:[%s1318_s23] ss:$16 sps:$4 sm:$0xff]   ;;  %v1191_v34 = vld [vmem:[%s1318_s23 + $0x4] ss:$16 sps:$4 sm:$0xff]   ;;  %v1192_v35 = vld [vmem:[%s1318_s23 + $0x8] ss:$16 sps:$4 sm:$0xff]  }
  0x1e   : > { %1096 = vmatprep.subr.bf16.mxu1 %v1170_v14  ;;  %v1194_v36 = vld [vmem:[%s1318_s23 + $0xc] ss:$16 sps:$4 sm:$0xff]   ;;  %675 = vmatprep.mubr.bf16.mxu0 %v1191_v34  ;;  %v1195_v37 = vld [vmem:[%s1318_s23 + $0x24] ss:$16 sps:$4 sm:$0xff]   ;;  %v1199_v39 = vld [vmem:[%s1318_s23 + $0x20] ss:$16 sps:$4 sm:$0xff]  }
  0x1f   : > { %740 = vmatprep.mubr.bf16.mxu1 %v1194_v36  ;;  %v1197_v38 = vld [vmem:[%s1318_s23 + $0x2c] ss:$16 sps:$4 sm:$0xff]   ;;  %v1200_v40 = vld [vmem:[%s1318_s23 + $0x28] ss:$16 sps:$4 sm:$0xff]   ;;  %v1201_v41 = vld [vmem:[%s1318_s23 + $0x44] ss:$16 sps:$4 sm:$0xff]   ;;  %338 = vperm.xlu0 %1155, %v324_v45  }
  0x20   : > { %1057 = vmatpush3.bf16.msra.mxu0 %v1171_v15  ;;  %v1203_v42 = vld [vmem:[%s1318_s23 + $0x4c] ss:$16 sps:$4 sm:$0xff]   ;;  %v325_v44 = vld [vmem:[%s225_s27 + $0x10] sm:$0xff]  ;;  %v1206_v49 = vld [vmem:[%s1318_s23 + $0x48] ss:$16 sps:$4 sm:$0xff]  }
  0x21   : > { %1097 = vmatpush3.bf16.msra.mxu1 %v1172_v16  ;;  %1058 = vmatprep.subr.bf16.mxu0 %v1173_v17  ;;  %v326_v46 = vld [vmem:[%s225_s27 + $0x18] sm:$0xff]  ;;  %v1205_v47 = vld [vmem:[%s1318_s23 + $0x40] ss:$16 sps:$4 sm:$0xff]   ;;  %v1207_v50 = vld [vmem:[%s1318_s23 + $0x64] ss:$16 sps:$4 sm:$0xff]  }
  0x22   : > { %1098 = vmatprep.subr.bf16.mxu1 %v1174_v18  ;;  %343 = vperm.xlu1 %1156, %v325_v44   ;;  %v1209_v52 = vld [vmem:[%s1318_s23 + $0x6c] ss:$16 sps:$4 sm:$0xff]   ;;  %v329_v53 = vld [vmem:[%s225_s27 + $0x30] sm:$0xff]  ;;  %v1212_v56 = vld [vmem:[%s1318_s23 + $0x68] ss:$16 sps:$4 sm:$0xff]  }
  0x23   : > { %353 = vperm.xlu0 %1155, %v327_v48   ;;  %v330_v54 = vld [vmem:[%s225_s27 + $0x38] sm:$0xff]  ;;  %v1211_v55 = vld [vmem:[%s1318_s23 + $0x60] ss:$16 sps:$4 sm:$0xff]  }
  0x24   : > { %1059 = vmatpush3.bf16.msra.mxu0 %v1175_v19 }
  0x25   : > { %1099 = vmatpush3.bf16.msra.mxu1 %v1176_v20  ;;  %1060 = vmatprep.subr.bf16.mxu0 %v1177_v21 }
  0x26   : > { %1100 = vmatprep.subr.bf16.mxu1 %v1178_v22  ;;  %348 = vperm.xlu1 %1156, %v326_v46  }
  0x27   : > { %363 = vperm.xlu0 %1155, %v329_v53  }
  0x28   : > { %1061 = vmatpush3.bf16.msra.mxu0 %v1179_v23 }
  0x29   : > { %1101 = vmatpush3.bf16.msra.mxu1 %v1180_v24  ;;  %1062 = vmatprep.subr.bf16.mxu0 %v1181_v25 }
  0x2a   : > { %1102 = vmatprep.subr.bf16.mxu1 %v1182_v26  ;;  %358 = vperm.xlu1 %1156, %v328_v51  }
  0x2c   : > { %1063 = vmatpush3.bf16.msra.mxu0 %v1183_v27 }
  0x2d   : > { %1103 = vmatpush3.bf16.msra.mxu1 %v1184_v28  ;;  %1064 = vmatprep.subr.bf16.mxu0 %v1185_v29 }
  0x2e   : > { %1104 = vmatprep.subr.bf16.mxu1 %v1186_v30  ;;  %368 = vperm.xlu1 %1156, %v330_v54  }
  0x30   : > { %1065 = vmatpush3.bf16.msra.mxu0 %v1187_v31 }
  0x31   : > { %1105 = vmatpush3.bf16.msra.mxu1 %v1188_v32 }
  0x33   : > { %676 = vmatmul.mubr.bf16.vlgmr.msra.gmra.mrb[0].mxu0 %v1189_v33 }
  0x34   : > { %741 = vmatmul.mubr.bf16.vlgmr.msra.gmra.mrb[0].mxu1 %v1192_v35  ;;  %683 = vmatprep.mubr.bf16.mxu0 %v1195_v37 }
  0x35   : > { %748 = vmatprep.mubr.bf16.mxu1 %v1197_v38 }
  0x3b   : > { %684 = vmatmul.mubr.bf16.gmra.mrb[4].mxu0 %v1199_v39 }
  0x3c   : > { %749 = vmatmul.mubr.bf16.gmra.mrb[4].mxu1 %v1200_v40  ;;  %691 = vmatprep.mubr.bf16.mxu0 %v1201_v41 }
  0x3d   : > { %756 = vmatprep.mubr.bf16.mxu1 %v1203_v42 }
  0x43   : > { %692 = vmatmul.mubr.bf16.gmra.mrb[8].mxu0 %v1205_v47 }
  0x44   : > { %757 = vmatmul.mubr.bf16.gmra.mrb[8].mxu1 %v1206_v49  ;;  %699 = vmatprep.mubr.bf16.mxu0 %v1207_v50 }
  0x45   : > { %764 = vmatprep.mubr.bf16.mxu1 %v1209_v52 }
  0x4b   : > { %700 = vmatmul.mubr.bf16.gmra.mrb[12].mxu0 %v1211_v55 }
  0x4c   : > { %765 = vmatmul.mubr.bf16.gmra.mrb[12].mxu1 %v1212_v56 }
  0x99   : > { %v334_v57 = vpop.permute.xlu0 %333 }
  0x9e   : > { %v339_v59 = vpop.permute.xlu0 %338 }
  0xa1   : > { %v344_v10 = vpop.permute.xlu1 %343 }
  0xa2   : > { %v354_v35 = vpop.permute.xlu0 %353 }
  0xa5   : > { %v349_v29 = vpop.permute.xlu1 %348 }
  0xa6   : > { %v364_v56 = vpop.permute.xlu0 %363 }
  0xa9   : > { %v359_v52 = vpop.permute.xlu1 %358 }
 0x106   : > { %v1066_v58 = vpop.f32.mrb[0].mxu0 }
 0x107   : > { %v1106_v60 = vpop.f32.mrb[0].mxu1  ;;  %v1067_v61 = vpop.f32.mrb[1].mxu0 }
 0x108   : > { %v1068_v62 = vadd.f32 %v1067_v61, %v1066_v58  ;;  %v1107_v63 = vpop.f32.mrb[1].mxu1  ;;  %v1069_v0 = vpop.f32.mrb[2].mxu0 }
 0x109   : > { %v1108_v1 = vadd.f32 %v1107_v63, %v1106_v60  ;;  %v1109_v2 = vpop.f32.mrb[2].mxu1  ;;  %v1070_v3 = vpop.f32.mrb[3].mxu0 }
 0x10a   : > { %v678_v4 = vadd.f32 %v1068_v62, %v334_v57  ;;  %v1071_v5 = vadd.f32 %v1070_v3, %v1069_v0  ;;  %v1110_v6 = vpop.f32.mrb[3].mxu1 }
 0x10b   : > { %v1111_v7 = vadd.f32 %v1110_v6, %v1109_v2 }
 0x10c   : > { %v743_v8 = vadd.f32 %v1108_v1, %v678_v4  ;;  %v681_v9 = vadd.f32 %v1071_v5, %v339_v59 }
 0x10e   : > { %v781_v11 = vmul.f32 0.1, %v743_v8  ;;  %v746_v12 = vadd.f32 %v1111_v7, %v681_v9  ;;  %v1072_v13 = vpop.f32.mrb[4].mxu0  ;;  %vm773_vm0 = vcmp.ge.f32.partialorder %v743_v8, 0.0 }
 0x10f   : > { %v1112_v14 = vpop.f32.mrb[4].mxu1  ;;  %v1073_v15 = vpop.f32.mrb[5].mxu0 }
 0x110   : > { %vm774_vm1 = vcmp.ge.f32.partialorder %v746_v12, 0.0  ;;  %v782_v16 = vmul.f32 0.1, %v746_v12  ;;  %v1074_v17 = vadd.f32 %v1073_v15, %v1072_v13  ;;  %v1113_v18 = vpop.f32.mrb[5].mxu1  ;;  %v1075_v19 = vpop.f32.mrb[6].mxu0  ;;  %v789_v23 = vsel %vm773_vm0, %v743_v8, %v781_v11 }
 0x111   : > { %v1114_v20 = vadd.f32 %v1113_v18, %v1112_v14  ;;  %v1115_v21 = vpop.f32.mrb[6].mxu1  ;;  %v1076_v22 = vpop.f32.mrb[7].mxu0 }
 0x112   : > { %v790_v24 = vsel %vm774_vm1, %v746_v12, %v782_v16  ;;  %v686_v25 = vadd.f32 %v1074_v17, %v344_v10  ;;  %v1077_v26 = vadd.f32 %v1076_v22, %v1075_v19  ;;  %v1116_v27 = vpop.f32.mrb[7].mxu1  ;;  %v369_v10 = vpop.permute.xlu1 %368 }
 0x113   : > { %v1030_v28 = vpack.c.bf16 %v790_v24, %v789_v23  ;;  %v1117_v30 = vadd.f32 %v1116_v27, %v1115_v21 }
 0x114   : > { %v751_v31 = vadd.f32 %v1114_v20, %v686_v25  ;;  %v689_v32 = vadd.f32 %v1077_v26, %v349_v29 }
 0x115   : > { %1031 = vst [vmem:[%s1346_s4] sm:$0xff] %v1030_v28  }
 0x116   : > { %v783_v33 = vmul.f32 0.1, %v751_v31  ;;  %v754_v34 = vadd.f32 %v1117_v30, %v689_v32  ;;  %v1078_v36 = vpop.f32.mrb[8].mxu0  ;;  %vm775_vm2 = vcmp.ge.f32.partialorder %v751_v31, 0.0 }
 0x117   : > { %v1118_v37 = vpop.f32.mrb[8].mxu1  ;;  %v1079_v38 = vpop.f32.mrb[9].mxu0 }
 0x118   : > { %vm776_vm3 = vcmp.ge.f32.partialorder %v754_v34, 0.0  ;;  %v784_v39 = vmul.f32 0.1, %v754_v34  ;;  %v1080_v40 = vadd.f32 %v1079_v38, %v1078_v36  ;;  %v1119_v41 = vpop.f32.mrb[9].mxu1  ;;  %v1081_v42 = vpop.f32.mrb[10].mxu0  ;;  %v791_v46 = vsel %vm775_vm2, %v751_v31, %v783_v33 }
 0x119   : > { %v1120_v43 = vadd.f32 %v1119_v41, %v1118_v37  ;;  %v1121_v44 = vpop.f32.mrb[10].mxu1  ;;  %v1082_v45 = vpop.f32.mrb[11].mxu0 }
 0x11a   : > { %v792_v47 = vsel %vm776_vm3, %v754_v34, %v784_v39  ;;  %v694_v48 = vadd.f32 %v1080_v40, %v354_v35  ;;  %v1083_v49 = vadd.f32 %v1082_v45, %v1081_v42  ;;  %v1122_v50 = vpop.f32.mrb[11].mxu1 }
 0x11b   : > { %v1035_v51 = vpack.c.bf16 %v792_v47, %v791_v46  ;;  %v1123_v53 = vadd.f32 %v1122_v50, %v1121_v44 }
 0x11c   : > { %v759_v54 = vadd.f32 %v1120_v43, %v694_v48  ;;  %v697_v55 = vadd.f32 %v1083_v49, %v359_v52 }
 0x11d   : > { %1047 = vst [vmem:[%s1346_s4 + $0x8] sm:$0xff] %v1035_v51  }
 0x11e   : > { %v785_v57 = vmul.f32 0.1, %v759_v54  ;;  %v762_v58 = vadd.f32 %v1123_v53, %v697_v55  ;;  %v1084_v59 = vpop.f32.mrb[12].mxu0  ;;  %vm777_vm4 = vcmp.ge.f32.partialorder %v759_v54, 0.0 }
 0x11f   : > { %v1124_v60 = vpop.f32.mrb[12].mxu1  ;;  %v1085_v61 = vpop.f32.mrb[13].mxu0 }
 0x120   : > { %vm778_vm5 = vcmp.ge.f32.partialorder %v762_v58, 0.0  ;;  %v786_v62 = vmul.f32 0.1, %v762_v58  ;;  %v1086_v63 = vadd.f32 %v1085_v61, %v1084_v59  ;;  %v1125_v0 = vpop.f32.mrb[13].mxu1  ;;  %v1087_v1 = vpop.f32.mrb[14].mxu0  ;;  %v793_v5 = vsel %vm777_vm4, %v759_v54, %v785_v57 }
 0x121   : > { %v1126_v2 = vadd.f32 %v1125_v0, %v1124_v60  ;;  %v1127_v3 = vpop.f32.mrb[14].mxu1  ;;  %v1088_v4 = vpop.f32.mrb[15].mxu0 }
 0x122   : > { %v794_v6 = vsel %vm778_vm5, %v762_v58, %v786_v62  ;;  %v702_v7 = vadd.f32 %v1086_v63, %v364_v56  ;;  %v1089_v8 = vadd.f32 %v1088_v4, %v1087_v1  ;;  %v1128_v9 = vpop.f32.mrb[15].mxu1 }
 0x123   : > { %v1040_v11 = vpack.c.bf16 %v794_v6, %v793_v5  ;;  %v1129_v12 = vadd.f32 %v1128_v9, %v1127_v3 }
 0x124   : > { %v767_v13 = vadd.f32 %v1126_v2, %v702_v7  ;;  %v705_v14 = vadd.f32 %v1089_v8, %v369_v10 }
 0x125   : > { %1048 = vst [vmem:[%s1346_s4 + $0x10] sm:$0xff] %v1040_v11  }
 0x126   : > { %v787_v15 = vmul.f32 0.1, %v767_v13  ;;  %v770_v16 = vadd.f32 %v1129_v12, %v705_v14  ;;  %vm779_vm6 = vcmp.ge.f32.partialorder %v767_v13, 0.0 }
 0x128   : > { %vm780_vm7 = vcmp.ge.f32.partialorder %v770_v16, 0.0  ;;  %v788_v17 = vmul.f32 0.1, %v770_v16  ;;  %v795_v18 = vsel %vm779_vm6, %v767_v13, %v787_v15 }
 0x12a   : > { %v796_v19 = vsel %vm780_vm7, %v770_v16, %v788_v17 }
 0x12b   : > { %v1045_v20 = vpack.c.bf16 %v796_v19, %v795_v18 }
 0x12d   : > { %1049 = vst [vmem:[%s1346_s4 + $0x18] sm:$0xff] %v1045_v20  }
 0x12e PF: > { %s13_s14 = sadd.s32 1, %s1235_s14   ;;  %s1365_s12 = smov %s1231_s13 }
 0x12f   : > { %p10_p5 = scmp.ge.s32.totalorder %s13_s14, 6   ;;  %s1366_s13 = smov %s1368_s15 }
 0x131   :  { %12 = sbr.rel (!%p10_p5) target bundleno = 2 (0x2), region = 68 }

// kernel: _lambda_.11
= control target key start
LH: loop header
LB: loop body
LE: loop exit
PB: predicated region body
PF: predicated region fallthrough
CT: control target
= control target key end

     0   :  { %v2557_v1 = vmov 0   ;;  %s3386_s4 = inlined_call_operand.vmem [shape: bf16[1,768,2], index: 4, kind: input, shape index: {}]   ;;  %s3387_s0 = inlined_call_operand.vmem [shape: bf16[1,256,768], index: 0, kind: input, shape index: {}]   ;;  %s3388_s1 = inlined_call_operand.vmem [shape: f32[1,256,1], index: 1, kind: input, shape index: {}]   ;;  %s3389_s3 = inlined_call_operand.vmem [shape: f32[1,16,1], index: 3, kind: input, shape index: {}]   ;;  %s3390_s2 = inlined_call_operand.vmem [shape: bf16[1,16,256], index: 2, kind: input, shape index: {}]   ;;  %s3391_s5 = inlined_call_operand.vmem [shape: f32[1,16,2], index: 5, kind: output, shape index: {}]  }
   0x1   :  { %v2362_v0 = vld [vmem:[%s3386_s4 + $0x40] sm:$0xff]   ;;  %2360 = vset.pattern.permute.xlu0 %v2557_v1  ;;  %2361 = vset.pattern.permute.xlu1 %v2557_v1  ;;  %v2364_v3 = vld [vmem:[%s3386_s4 + $0x48] sm:$0xff]   ;;  %v2366_v5 = vld [vmem:[%s3386_s4 + $0x50] sm:$0xff]  }
   0x2   :  { %v2363_v2 = vld [vmem:[%s3386_s4] sm:$0xff]   ;;  %1985 = vmatprep.subr.bf16.mxu0 %v2362_v0  ;;  %2343 = vmatprep.subr.bf16.mxu1 %v2362_v0  ;;  %v2365_v4 = vld [vmem:[%s3386_s4 + $0x8] sm:$0xff]   ;;  %v2367_v6 = vld [vmem:[%s3386_s4 + $0x10] sm:$0xff]  }
   0x3   :  { %1986 = vmatpush3.bf16.msra.mxu0 %v2363_v2  ;;  %2351 = vmatpush3.bf16.msra.mxu1 %v2363_v2  ;;  %v2368_v7 = vld [vmem:[%s3386_s4 + $0x58] sm:$0xff]   ;;  %v2370_v9 = vld [vmem:[%s3386_s4 + $0x60] sm:$0xff]   ;;  %v2372_v11 = vld [vmem:[%s3386_s4 + $0x68] sm:$0xff]  }
   0x4   :  { %1987 = vmatprep.subr.bf16.mxu0 %v2364_v3  ;;  %2344 = vmatprep.subr.bf16.mxu1 %v2364_v3  ;;  %v2369_v8 = vld [vmem:[%s3386_s4 + $0x18] sm:$0xff]   ;;  %v2371_v10 = vld [vmem:[%s3386_s4 + $0x20] sm:$0xff]   ;;  %v2383_v13 = vld [vmem:[%s3387_s0 + $0x1b4] ss:$24 sps:$4 sm:$0xff]  }
   0x5   :  { %v2380_v12 = vld [vmem:[%s3387_s0 + $0x4] ss:$24 sps:$4 sm:$0xff]   ;;  %v2373_v14 = vld [vmem:[%s3386_s4 + $0x28] sm:$0xff]   ;;  %v2374_v15 = vld [vmem:[%s3386_s4 + $0x70] sm:$0xff]   ;;  %1277 = vmatprep.mubr.bf16.mxu1 %v2383_v13 }
   0x6   :  { %1205 = vmatprep.mubr.bf16.mxu0 %v2380_v12  ;;  %v2375_v16 = vld [vmem:[%s3386_s4 + $0x30] sm:$0xff]   ;;  %v2376_v17 = vld [vmem:[%s3386_s4 + $0x78] sm:$0xff]   ;;  %v2402_v20 = vld [vmem:[%s3386_s4 + $0xc0] sm:$0xff]  }
   0x7   :  { %1988 = vmatpush3.bf16.msra.mxu0 %v2365_v4  ;;  %2352 = vmatpush3.bf16.msra.mxu1 %v2365_v4  ;;  %v2377_v18 = vld [vmem:[%s3386_s4 + $0x38] sm:$0xff]   ;;  %v2381_v21 = vld [vmem:[%s3387_s0 + $0x1b0] ss:$24 sps:$4 sm:$0xff]   ;;  %v2384_v22 = vld [vmem:[%s3387_s0 + $0x34] ss:$24 sps:$4 sm:$0xff]  }
   0x8   :  { %1989 = vmatprep.subr.bf16.mxu0 %v2366_v5  ;;  %2345 = vmatprep.subr.bf16.mxu1 %v2366_v5  ;;  %v2378_v19 = vld [vmem:[%s3387_s0] ss:$24 sps:$4 sm:$0xff]   ;;  %v2386_v23 = vld [vmem:[%s3387_s0 + $0x1e4] ss:$24 sps:$4 sm:$0xff]   ;;  %v2404_v25 = vld [vmem:[%s3386_s4 + $0xc8] sm:$0xff]  }
   0x9   :  { %v2403_v24 = vld [vmem:[%s3386_s4 + $0x80] sm:$0xff]   ;;  %v2388_v26 = vld [vmem:[%s3387_s0 + $0x30] ss:$24 sps:$4 sm:$0xff]   ;;  %v2392_v31 = vld [vmem:[%s3387_s0 + $0x214] ss:$24 sps:$4 sm:$0xff]  }
   0xa   :  { %v2405_v27 = vld [vmem:[%s3386_s4 + $0x88] sm:$0xff]   ;;  %v2412_v28 = vld [vmem:[%s3386_s4 + $0xd0] sm:$0xff]   ;;  %v2389_v29 = vld [vmem:[%s3387_s0 + $0x1e0] ss:$24 sps:$4 sm:$0xff]  }
   0xb   :  { %1990 = vmatpush3.bf16.msra.mxu0 %v2367_v6  ;;  %2353 = vmatpush3.bf16.msra.mxu1 %v2367_v6  ;;  %v2390_v30 = vld [vmem:[%s3387_s0 + $0x64] ss:$24 sps:$4 sm:$0xff]   ;;  %v2413_v32 = vld [vmem:[%s3386_s4 + $0x90] sm:$0xff]   ;;  %v2394_v37 = vld [vmem:[%s3387_s0 + $0x60] ss:$24 sps:$4 sm:$0xff]  }
   0xc   :  { %1991 = vmatprep.subr.bf16.mxu0 %v2368_v7  ;;  %2346 = vmatprep.subr.bf16.mxu1 %v2368_v7  ;;  %v2414_v33 = vld [vmem:[%s3386_s4 + $0xd8] sm:$0xff]   ;;  %v2423_v34 = vld [vmem:[%s3386_s4 + $0x140] sm:$0xff]   ;;  %v2395_v38 = vld [vmem:[%s3387_s0 + $0x210] ss:$24 sps:$4 sm:$0xff]  }
   0xd   :  { %v2415_v35 = vld [vmem:[%s3386_s4 + $0x98] sm:$0xff]   ;;  %v2425_v36 = vld [vmem:[%s3386_s4 + $0x100] sm:$0xff]   ;;  %v2396_v40 = vld [vmem:[%s3387_s0 + $0x94] ss:$24 sps:$4 sm:$0xff]  }
   0xe   :  { %v2422_v39 = vld [vmem:[%s3386_s4 + $0xe0] sm:$0xff]   ;;  %v2427_v41 = vld [vmem:[%s3386_s4 + $0x148] sm:$0xff]   ;;  %v2437_v49 = vld [vmem:[%s3386_s4 + $0x150] sm:$0xff]  }
   0xf   :  { %1992 = vmatpush3.bf16.msra.mxu0 %v2369_v8  ;;  %2354 = vmatpush3.bf16.msra.mxu1 %v2369_v8  ;;  %v2398_v42 = vld [vmem:[%s3387_s0 + $0x244] ss:$24 sps:$4 sm:$0xff]   ;;  %v2429_v43 = vld [vmem:[%s3386_s4 + $0x108] sm:$0xff]   ;;  %v2401_v48 = vld [vmem:[%s3387_s0 + $0x240] ss:$24 sps:$4 sm:$0xff]  }
  0x10   :  { %1993 = vmatprep.subr.bf16.mxu0 %v2370_v9  ;;  %2347 = vmatprep.subr.bf16.mxu1 %v2370_v9  ;;  %v2424_v44 = vld [vmem:[%s3386_s4 + $0xa0] sm:$0xff]   ;;  %v2426_v45 = vld [vmem:[%s3386_s4 + $0xe8] sm:$0xff]   ;;  %v2436_v52 = vld [vmem:[%s3386_s4 + $0xf0] sm:$0xff]  }
  0x11   :  { %v2428_v46 = vld [vmem:[%s3386_s4 + $0xa8] sm:$0xff]   ;;  %v2406_v50 = vld [vmem:[%s3387_s0 + $0xc4] ss:$24 sps:$4 sm:$0xff]   ;;  %v2439_v53 = vld [vmem:[%s3386_s4 + $0x110] sm:$0xff]  }
  0x12   :  { %v2400_v47 = vld [vmem:[%s3387_s0 + $0x90] ss:$24 sps:$4 sm:$0xff]   ;;  %v2408_v51 = vld [vmem:[%s3387_s0 + $0x274] ss:$24 sps:$4 sm:$0xff]   ;;  %v2441_v55 = vld [vmem:[%s3386_s4 + $0x158] sm:$0xff]  }
  0x13   :  { %1994 = vmatpush3.bf16.msra.mxu0 %v2371_v10  ;;  %2355 = vmatpush3.bf16.msra.mxu1 %v2371_v10  ;;  %v2438_v54 = vld [vmem:[%s3386_s4 + $0xb0] sm:$0xff]   ;;  %v2440_v56 = vld [vmem:[%s3386_s4 + $0xf8] sm:$0xff]   ;;  %v2450_v63 = vld [vmem:[%s3386_s4 + $0x160] sm:$0xff]  }
  0x14   :  { %1995 = vmatprep.subr.bf16.mxu0 %v2372_v11  ;;  %2348 = vmatprep.subr.bf16.mxu1 %v2372_v11  ;;  %v2443_v57 = vld [vmem:[%s3386_s4 + $0x118] sm:$0xff]   ;;  %v2411_v59 = vld [vmem:[%s3387_s0 + $0x270] ss:$24 sps:$4 sm:$0xff]   ;;  %v2416_v61 = vld [vmem:[%s3387_s0 + $0xf4] ss:$24 sps:$4 sm:$0xff]  }
  0x15   :  { %v2410_v58 = vld [vmem:[%s3387_s0 + $0xc0] ss:$24 sps:$4 sm:$0xff]   ;;  %v2418_v62 = vld [vmem:[%s3387_s0 + $0x2a4] ss:$24 sps:$4 sm:$0xff]   ;;  %v2452_v1 = vld [vmem:[%s3386_s4 + $0x168] sm:$0xff]  }
  0x16   :  { %v2442_v60 = vld [vmem:[%s3386_s4 + $0xb8] sm:$0xff]   ;;  %v2451_v0 = vld [vmem:[%s3386_s4 + $0x120] sm:$0xff]   ;;  %v2453_v2 = vld [vmem:[%s3386_s4 + $0x128] sm:$0xff]  }
  0x17   :  { %1996 = vmatpush3.bf16.msra.mxu0 %v2373_v14  ;;  %2356 = vmatpush3.bf16.msra.mxu1 %v2373_v14  ;;  %v2420_v3 = vld [vmem:[%s3387_s0 + $0xf0] ss:$24 sps:$4 sm:$0xff]   ;;  %v2421_v4 = vld [vmem:[%s3387_s0 + $0x2a0] ss:$24 sps:$4 sm:$0xff]   ;;  %v2430_v7 = vld [vmem:[%s3387_s0 + $0x124] ss:$24 sps:$4 sm:$0xff]  }
  0x18   :  { %1997 = vmatprep.subr.bf16.mxu0 %v2374_v15  ;;  %2349 = vmatprep.subr.bf16.mxu1 %v2374_v15  ;;  %v2460_v5 = vld [vmem:[%s3386_s4 + $0x170] sm:$0xff]   ;;  %v2462_v9 = vld [vmem:[%s3386_s4 + $0x178] sm:$0xff]   ;;  %v229_v13 = vld [vmem:[%s3388_s1 + $0x80] sm:$0xff] }
  0x19   :  { %v2461_v6 = vld [vmem:[%s3386_s4 + $0x130] sm:$0xff]   ;;  %v2463_v10 = vld [vmem:[%s3386_s4 + $0x138] sm:$0xff]   ;;  %v213_v14 = vld [vmem:[%s3388_s1] sm:$0xff]  ;;  %327 = vperm.xlu0 %2360, %v229_v13  }
  0x1a   :  { %v2432_v8 = vld [vmem:[%s3387_s0 + $0x2d4] ss:$24 sps:$4 sm:$0xff]   ;;  %v2434_v11 = vld [vmem:[%s3387_s0 + $0x120] ss:$24 sps:$4 sm:$0xff]   ;;  %v2435_v12 = vld [vmem:[%s3387_s0 + $0x2d0] ss:$24 sps:$4 sm:$0xff]   ;;  %247 = vperm.xlu1 %2361, %v213_v14  }
  0x1b   :  { %1998 = vmatpush3.bf16.msra.mxu0 %v2375_v16  ;;  %2357 = vmatpush3.bf16.msra.mxu1 %v2375_v16  ;;  %v2444_v15 = vld [vmem:[%s3387_s0 + $0x154] ss:$24 sps:$4 sm:$0xff]   ;;  %v2498_v13 = vld [vmem:[%s3387_s0 + $0x158] ss:$24 sps:$4 sm:$0xff]  }
  0x1c   :  { %1999 = vmatprep.subr.bf16.mxu0 %v2376_v17  ;;  %2350 = vmatprep.subr.bf16.mxu1 %v2376_v17  ;;  %v2448_v16 = vld [vmem:[%s3387_s0 + $0xc] ss:$24 sps:$4 sm:$0xff]   ;;  %v2499_v14 = vld [vmem:[%s3387_s0 + $0x100] ss:$24 sps:$4 sm:$0xff]  }
  0x1d   :  { %v230_v17 = vld [vmem:[%s3388_s1 + $0x88] sm:$0xff] }
  0x1e   :  { %332 = vperm.xlu0 %2360, %v230_v17   ;;  %v2504_v17 = vld [vmem:[%s3387_s0 + $0x188] ss:$24 sps:$4 sm:$0xff]  }
  0x1f   :  { %2000 = vmatpush3.bf16.msra.mxu0 %v2377_v18  ;;  %2358 = vmatpush3.bf16.msra.mxu1 %v2377_v18  ;;  %v214_v18 = vld [vmem:[%s3388_s1 + $0x8] sm:$0xff] }
  0x20   :  { %2097 = vmatprep.subr.bf16.mxu1 %v2402_v20  ;;  %2209 = vmatprep.subr.bf16.mxu0 %v2423_v34  ;;  %v2449_v20 = vld [vmem:[%s3387_s0 + $0x150] ss:$24 sps:$4 sm:$0xff]  }
  0x21   :  { %252 = vperm.xlu1 %2361, %v214_v18   ;;  %v218_v34 = vld [vmem:[%s3388_s1 + $0x28] sm:$0xff] }
  0x22   :  { %1206 = vmatmul.mubr.bf16.vlgmr.msra.gmra.mrb[0].mxu0 %v2378_v19  ;;  %1278 = vmatmul.mubr.bf16.vlgmr.msra.gmra.mrb[0].mxu1 %v2381_v21  ;;  %v2446_v19 = vld [vmem:[%s3387_s0 + $0x8] ss:$24 sps:$4 sm:$0xff]   ;;  %v231_v21 = vld [vmem:[%s3388_s1 + $0x90] sm:$0xff] }
  0x23   :  { %1213 = vmatprep.mubr.bf16.mxu0 %v2384_v22  ;;  %1285 = vmatprep.mubr.bf16.mxu1 %v2386_v23  ;;  %v232_v22 = vld [vmem:[%s3388_s1 + $0x98] sm:$0xff]  ;;  %v2505_v18 = vld [vmem:[%s3387_s0 + $0x130] ss:$24 sps:$4 sm:$0xff]  }
  0x24   :  { %2098 = vmatpush3.bf16.msra.mxu1 %v2403_v24  ;;  %2210 = vmatpush3.bf16.msra.mxu0 %v2425_v36  ;;  %v2454_v23 = vld [vmem:[%s3387_s0 + $0x184] ss:$24 sps:$4 sm:$0xff]   ;;  %v2469_v36 = vld [vmem:[%s3387_s0 + $0x68] ss:$24 sps:$4 sm:$0xff]  }
  0x25   :  { %2099 = vmatprep.subr.bf16.mxu1 %v2404_v25  ;;  %2211 = vmatprep.subr.bf16.mxu0 %v2427_v41  ;;  %v2456_v24 = vld [vmem:[%s3387_s0 + $0x3c] ss:$24 sps:$4 sm:$0xff]  }
  0x26   :  { %337 = vperm.xlu0 %2360, %v231_v21   ;;  %342 = vperm.xlu1 %2361, %v232_v22   ;;  %v215_v25 = vld [vmem:[%s3388_s1 + $0x10] sm:$0xff]  ;;  %v2511_v22 = vld [vmem:[%s3387_s0 + $0x160] ss:$24 sps:$4 sm:$0xff]  }
  0x27   :  { %v219_v41 = vld [vmem:[%s3388_s1 + $0x30] sm:$0xff] }
  0x28   :  { %2100 = vmatpush3.bf16.msra.mxu1 %v2405_v27  ;;  %2212 = vmatpush3.bf16.msra.mxu0 %v2429_v43  ;;  %v2458_v27 = vld [vmem:[%s3387_s0 + $0x180] ss:$24 sps:$4 sm:$0xff]  }
  0x29   :  { %2101 = vmatprep.subr.bf16.mxu1 %v2412_v28  ;;  %2213 = vmatprep.subr.bf16.mxu0 %v2437_v49  ;;  %v2459_v28 = vld [vmem:[%s3387_s0 + $0x38] ss:$24 sps:$4 sm:$0xff]   ;;  %v221_v49 = vld [vmem:[%s3388_s1 + $0x40] sm:$0xff] }
  0x2a   :  { %1214 = vmatmul.mubr.bf16.gmra.mrb[4].mxu0 %v2388_v26  ;;  %1286 = vmatmul.mubr.bf16.gmra.mrb[4].mxu1 %v2389_v29  ;;  %v216_v26 = vld [vmem:[%s3388_s1 + $0x18] sm:$0xff]  ;;  %v233_v29 = vld [vmem:[%s3388_s1 + $0xa0] sm:$0xff] }
  0x2b   :  { %1221 = vmatprep.mubr.bf16.mxu0 %v2390_v30  ;;  %1293 = vmatprep.mubr.bf16.mxu1 %v2392_v31  ;;  %v234_v30 = vld [vmem:[%s3388_s1 + $0xa8] sm:$0xff]  ;;  %v2474_v43 = vld [vmem:[%s3387_s0 + $0x98] ss:$24 sps:$4 sm:$0xff]  }
  0x2c   :  { %2102 = vmatpush3.bf16.msra.mxu1 %v2413_v32  ;;  %2214 = vmatpush3.bf16.msra.mxu0 %v2439_v53  ;;  %v2464_v31 = vld [vmem:[%s3387_s0 + $0x6c] ss:$24 sps:$4 sm:$0xff]   ;;  %v240_v53 = vld [vmem:[%s3388_s1 + $0xd8] sm:$0xff] }
  0x2d   :  { %2103 = vmatprep.subr.bf16.mxu1 %v2414_v33  ;;  %2215 = vmatprep.subr.bf16.mxu0 %v2441_v55  ;;  %v2468_v32 = vld [vmem:[%s3387_s0 + $0x14] ss:$24 sps:$4 sm:$0xff]   ;;  %v217_v33 = vld [vmem:[%s3388_s1 + $0x20] sm:$0xff]  ;;  %v2510_v21 = vld [vmem:[%s3387_s0 + $0x1b8] ss:$24 sps:$4 sm:$0xff]  }
  0x2e   :  { %257 = vperm.xlu0 %2360, %v215_v25   ;;  %262 = vperm.xlu1 %2361, %v216_v26   ;;  %v2482_v55 = vld [vmem:[%s3387_s0 + $0xfc] ss:$24 sps:$4 sm:$0xff]   ;;  %v2516_v25 = vld [vmem:[%s3387_s0 + $0x1e8] ss:$24 sps:$4 sm:$0xff]  }
  0x2f   :  { %v2517_v26 = vld [vmem:[%s3387_s0 + $0x190] ss:$24 sps:$4 sm:$0xff]  }
  0x30   :  { %2104 = vmatpush3.bf16.msra.mxu1 %v2415_v35  ;;  %2216 = vmatpush3.bf16.msra.mxu0 %v2443_v57  ;;  %v2466_v35 = vld [vmem:[%s3387_s0 + $0x10] ss:$24 sps:$4 sm:$0xff]  }
  0x31   :  { %2105 = vmatprep.subr.bf16.mxu1 %v2422_v39  ;;  %2217 = vmatprep.subr.bf16.mxu0 %v2450_v63  ;;  %v2470_v39 = vld [vmem:[%s3387_s0 + $0x9c] ss:$24 sps:$4 sm:$0xff]   ;;  %v2488_v63 = vld [vmem:[%s3387_s0 + $0x12c] ss:$24 sps:$4 sm:$0xff]  }
  0x32   :  { %1222 = vmatmul.mubr.bf16.gmra.mrb[8].mxu0 %v2394_v37  ;;  %1294 = vmatmul.mubr.bf16.gmra.mrb[8].mxu1 %v2395_v38  ;;  %v235_v37 = vld [vmem:[%s3388_s1 + $0xb0] sm:$0xff]  ;;  %v236_v38 = vld [vmem:[%s3388_s1 + $0xb8] sm:$0xff] }
  0x33   :  { %1229 = vmatprep.mubr.bf16.mxu0 %v2396_v40  ;;  %1301 = vmatprep.mubr.bf16.mxu1 %v2398_v42  ;;  %v2472_v40 = vld [vmem:[%s3387_s0 + $0x44] ss:$24 sps:$4 sm:$0xff]   ;;  %v223_v57 = vld [vmem:[%s3388_s1 + $0x50] sm:$0xff] }
  0x34   :  { %2106 = vmatpush3.bf16.msra.mxu1 %v2424_v44  ;;  %2218 = vmatpush3.bf16.msra.mxu0 %v2451_v0  ;;  %v220_v42 = vld [vmem:[%s3388_s1 + $0x38] sm:$0xff]  ;;  %v237_v44 = vld [vmem:[%s3388_s1 + $0xc0] sm:$0xff]  ;;  %v2490_v0 = vld [vmem:[%s3387_s0 + $0xd4] ss:$24 sps:$4 sm:$0xff]  }
  0x35   :  { %2107 = vmatprep.subr.bf16.mxu1 %v2426_v45  ;;  %2219 = vmatprep.subr.bf16.mxu0 %v2452_v1  ;;  %v238_v45 = vld [vmem:[%s3388_s1 + $0xc8] sm:$0xff]  ;;  %v225_v1 = vld [vmem:[%s3388_s1 + $0x60] sm:$0xff] }
  0x36   :  { %347 = vperm.xlu0 %2360, %v233_v29   ;;  %352 = vperm.xlu1 %2361, %v234_v30   ;;  %v2522_v29 = vld [vmem:[%s3387_s0 + $0x218] ss:$24 sps:$4 sm:$0xff]  }
  0x37   :  { %v2523_v30 = vld [vmem:[%s3387_s0 + $0x1c0] ss:$24 sps:$4 sm:$0xff]  }
  0x38   :  { %2108 = vmatpush3.bf16.msra.mxu1 %v2428_v46  ;;  %2220 = vmatpush3.bf16.msra.mxu0 %v2453_v2  ;;  %v2475_v46 = vld [vmem:[%s3387_s0 + $0x40] ss:$24 sps:$4 sm:$0xff]   ;;  %v226_v2 = vld [vmem:[%s3388_s1 + $0x68] sm:$0xff] }
  0x39   :  { %2109 = vmatprep.subr.bf16.mxu1 %v2436_v52  ;;  %2221 = vmatprep.subr.bf16.mxu0 %v2460_v5  ;;  %v239_v52 = vld [vmem:[%s3388_s1 + $0xd0] sm:$0xff]  ;;  %v2492_v5 = vld [vmem:[%s3387_s0 + $0x128] ss:$24 sps:$4 sm:$0xff]  }
  0x3a   :  { %1230 = vmatmul.mubr.bf16.gmra.mrb[12].mxu0 %v2400_v47  ;;  %1302 = vmatmul.mubr.bf16.gmra.mrb[12].mxu1 %v2401_v48  ;;  %v2476_v47 = vld [vmem:[%s3387_s0 + $0xcc] ss:$24 sps:$4 sm:$0xff]  }
  0x3b   :  { %1237 = vmatprep.mubr.bf16.mxu0 %v2406_v50  ;;  %1309 = vmatprep.mubr.bf16.mxu1 %v2408_v51  ;;  %v2478_v48 = vld [vmem:[%s3387_s0 + $0x74] ss:$24 sps:$4 sm:$0xff]   ;;  %v2480_v51 = vld [vmem:[%s3387_s0 + $0xc8] ss:$24 sps:$4 sm:$0xff]  }
  0x3c   :  { %2110 = vmatpush3.bf16.msra.mxu1 %v2438_v54  ;;  %2222 = vmatpush3.bf16.msra.mxu0 %v2461_v6  ;;  %v222_v50 = vld [vmem:[%s3388_s1 + $0x48] sm:$0xff] }
  0x3d   :  { %2111 = vmatprep.subr.bf16.mxu1 %v2440_v56  ;;  %2223 = vmatprep.subr.bf16.mxu0 %v2462_v9  ;;  %v2481_v54 = vld [vmem:[%s3387_s0 + $0x70] ss:$24 sps:$4 sm:$0xff]   ;;  %v2484_v56 = vld [vmem:[%s3387_s0 + $0xa4] ss:$24 sps:$4 sm:$0xff]  }
  0x3e   :  { %267 = vperm.xlu0 %2360, %v217_v33   ;;  %272 = vperm.xlu1 %2361, %v218_v34   ;;  %v2493_v6 = vld [vmem:[%s3387_s0 + $0xd0] ss:$24 sps:$4 sm:$0xff]  }
  0x3f   :  { %v227_v9 = vld [vmem:[%s3388_s1 + $0x70] sm:$0xff]  ;;  %v2528_v33 = vld [vmem:[%s3387_s0 + $0x248] ss:$24 sps:$4 sm:$0xff]  }
  0x40   :  { %2112 = vmatpush3.bf16.msra.mxu1 %v2442_v60  ;;  %2224 = vmatpush3.bf16.msra.mxu0 %v2463_v10  ;;  %v242_v60 = vld [vmem:[%s3388_s1 + $0xe8] sm:$0xff]  ;;  %v228_v10 = vld [vmem:[%s3388_s1 + $0x78] sm:$0xff] }
  0x41   :  { %v2529_v34 = vld [vmem:[%s3387_s0 + $0x1f0] ss:$24 sps:$4 sm:$0xff]  }
  0x42   :  { %1238 = vmatmul.mubr.bf16.gmra.mrb[16].mxu0 %v2410_v58  ;;  %1310 = vmatmul.mubr.bf16.gmra.mrb[16].mxu1 %v2411_v59  ;;  %v224_v58 = vld [vmem:[%s3388_s1 + $0x58] sm:$0xff]  ;;  %v241_v59 = vld [vmem:[%s3388_s1 + $0xe0] sm:$0xff] }
  0x43   :  { %1245 = vmatprep.mubr.bf16.mxu0 %v2416_v61  ;;  %1317 = vmatprep.mubr.bf16.mxu1 %v2418_v62  ;;  %v2486_v61 = vld [vmem:[%s3387_s0 + $0xf8] ss:$24 sps:$4 sm:$0xff]  }
  0x44   :  { %357 = vperm.xlu0 %2360, %v235_v37   ;;  %362 = vperm.xlu1 %2361, %v236_v38   ;;  %v2487_v62 = vld [vmem:[%s3387_s0 + $0xa0] ss:$24 sps:$4 sm:$0xff]  }
  0x45   :  { %v2534_v37 = vld [vmem:[%s3387_s0 + $0x278] ss:$24 sps:$4 sm:$0xff]  }
  0x46   :  { %v2535_v38 = vld [vmem:[%s3387_s0 + $0x220] ss:$24 sps:$4 sm:$0xff]  }
  0x48   :  { %277 = vperm.xlu0 %2360, %v219_v41   ;;  %282 = vperm.xlu1 %2361, %v220_v42   ;;  %v2540_v41 = vld [vmem:[%s3387_s0 + $0x2a8] ss:$24 sps:$4 sm:$0xff]  }
  0x49   :  { %v2541_v42 = vld [vmem:[%s3387_s0 + $0x250] ss:$24 sps:$4 sm:$0xff]  }
  0x4a   :  { %1246 = vmatmul.mubr.bf16.gmra.mrb[20].mxu0 %v2420_v3  ;;  %1318 = vmatmul.mubr.bf16.gmra.mrb[20].mxu1 %v2421_v4  ;;  %v243_v3 = vld [vmem:[%s3388_s1 + $0xf0] sm:$0xff]  ;;  %v244_v4 = vld [vmem:[%s3388_s1 + $0xf8] sm:$0xff] }
  0x4b   :  { %1253 = vmatprep.mubr.bf16.mxu0 %v2430_v7  ;;  %1325 = vmatprep.mubr.bf16.mxu1 %v2432_v8  ;;  %v2494_v7 = vld [vmem:[%s3387_s0 + $0x15c] ss:$24 sps:$4 sm:$0xff]  }
  0x4c   :  { %367 = vperm.xlu0 %2360, %v237_v44   ;;  %372 = vperm.xlu1 %2361, %v238_v45   ;;  %v2496_v8 = vld [vmem:[%s3387_s0 + $0x104] ss:$24 sps:$4 sm:$0xff]   ;;  %v2546_v45 = vld [vmem:[%s3387_s0 + $0x2d8] ss:$24 sps:$4 sm:$0xff]  }
  0x4d   :  { %v2544_v44 = vld [vmem:[%s3387_s0 + $0x284] ss:$24 sps:$4 sm:$0xff]  }
  0x50   :  { %287 = vperm.xlu0 %2360, %v221_v49   ;;  %292 = vperm.xlu1 %2361, %v222_v50   ;;  %v2551_v49 = vld [vmem:[%s3387_s0 + $0x2e4] ss:$24 sps:$4 sm:$0xff]   ;;  %v2553_v50 = vld [vmem:[%s3387_s0 + $0x2e0] ss:$24 sps:$4 sm:$0xff]  }
  0x52   :  { %1254 = vmatmul.mubr.bf16.gmra.mrb[24].mxu0 %v2434_v11  ;;  %1326 = vmatmul.mubr.bf16.gmra.mrb[24].mxu1 %v2435_v12  ;;  %v1770_v11 = vld [vmem:[%s3389_s3] sm:$0xff]  ;;  %v1771_v12 = vld [vmem:[%s3389_s3 + $0x8] sm:$0xff] }
  0x53   :  { %1261 = vmatprep.mubr.bf16.mxu0 %v2444_v15  ;;  %1366 = vmatprep.mubr.bf16.mxu1 %v2448_v16  ;;  %v2500_v15 = vld [vmem:[%s3387_s0 + $0x18c] ss:$24 sps:$4 sm:$0xff]  }
  0x54   :  { %377 = vperm.xlu0 %2360, %v239_v52   ;;  %382 = vperm.xlu1 %2361, %v240_v53   ;;  %v2502_v16 = vld [vmem:[%s3387_s0 + $0x134] ss:$24 sps:$4 sm:$0xff]  }
  0x58   :  { %297 = vperm.xlu0 %2360, %v223_v57   ;;  %302 = vperm.xlu1 %2361, %v224_v58  }
  0x5a   :  { %1262 = vmatmul.mubr.bf16.gmra.mrb[28].mxu0 %v2449_v20  ;;  %1367 = vmatmul.mubr.bf16.vlgmr.msra.gmra.mrb[28].mxu1 %v2446_v19  ;;  %v2506_v19 = vld [vmem:[%s3387_s0 + $0x1bc] ss:$24 sps:$4 sm:$0xff]  }
  0x5b   :  { %1269 = vmatprep.mubr.bf16.mxu0 %v2454_v23  ;;  %1374 = vmatprep.mubr.bf16.mxu1 %v2456_v24  ;;  %v2508_v20 = vld [vmem:[%s3387_s0 + $0x164] ss:$24 sps:$4 sm:$0xff]   ;;  %v2514_v24 = vld [vmem:[%s3387_s0 + $0x194] ss:$24 sps:$4 sm:$0xff]  }
  0x5c   :  { %387 = vperm.xlu0 %2360, %v241_v59   ;;  %392 = vperm.xlu1 %2361, %v242_v60   ;;  %v2512_v23 = vld [vmem:[%s3387_s0 + $0x1ec] ss:$24 sps:$4 sm:$0xff]  }
  0x60   :  { %307 = vperm.xlu0 %2360, %v225_v1   ;;  %312 = vperm.xlu1 %2361, %v226_v2  }
  0x62   :  { %1270 = vmatmul.mubr.bf16.gmra.mrb[32].mxu0 %v2458_v27  ;;  %1375 = vmatmul.mubr.bf16.gmra.mrb[32].mxu1 %v2459_v28  ;;  %v2518_v27 = vld [vmem:[%s3387_s0 + $0x21c] ss:$24 sps:$4 sm:$0xff]  }
  0x63   :  { %1382 = vmatprep.mubr.bf16.mxu1 %v2464_v31  ;;  %1527 = vmatprep.mubr.bf16.mxu0 %v2468_v32  ;;  %v2520_v28 = vld [vmem:[%s3387_s0 + $0x1c4] ss:$24 sps:$4 sm:$0xff]   ;;  %v2526_v32 = vld [vmem:[%s3387_s0 + $0x1f4] ss:$24 sps:$4 sm:$0xff]  }
  0x64   :  { %397 = vperm.xlu0 %2360, %v243_v3   ;;  %402 = vperm.xlu1 %2361, %v244_v4   ;;  %v2524_v31 = vld [vmem:[%s3387_s0 + $0x24c] ss:$24 sps:$4 sm:$0xff]  }
  0x68   :  { %317 = vperm.xlu0 %2360, %v227_v9   ;;  %322 = vperm.xlu1 %2361, %v228_v10  }
  0x6a   :  { %1383 = vmatmul.mubr.bf16.gmra.mrb[36].mxu1 %v2469_v36  ;;  %1528 = vmatmul.mubr.bf16.vlgmr.msra.gmra.mrb[36].mxu0 %v2466_v35  ;;  %v2530_v35 = vld [vmem:[%s3387_s0 + $0x27c] ss:$24 sps:$4 sm:$0xff]  }
  0x6b   :  { %1390 = vmatprep.mubr.bf16.mxu1 %v2470_v39  ;;  %1535 = vmatprep.mubr.bf16.mxu0 %v2472_v40  ;;  %v2532_v36 = vld [vmem:[%s3387_s0 + $0x224] ss:$24 sps:$4 sm:$0xff]   ;;  %v2538_v40 = vld [vmem:[%s3387_s0 + $0x254] ss:$24 sps:$4 sm:$0xff]  }
  0x6c   :  { %1774 = vperm.xlu0 %2360, %v1770_v11   ;;  %1779 = vperm.xlu1 %2361, %v1771_v12   ;;  %v2536_v39 = vld [vmem:[%s3387_s0 + $0x2ac] ss:$24 sps:$4 sm:$0xff]  }
  0x72   :  { %1391 = vmatmul.mubr.bf16.gmra.mrb[40].mxu1 %v2474_v43  ;;  %1536 = vmatmul.mubr.bf16.gmra.mrb[40].mxu0 %v2475_v46  ;;  %v2542_v43 = vld [vmem:[%s3387_s0 + $0x2dc] ss:$24 sps:$4 sm:$0xff]   ;;  %v2547_v46 = vld [vmem:[%s3387_s0 + $0x280] ss:$24 sps:$4 sm:$0xff]  }
  0x73   :  { %1398 = vmatprep.mubr.bf16.mxu1 %v2476_v47  ;;  %1543 = vmatprep.mubr.bf16.mxu0 %v2478_v48  ;;  %v2548_v47 = vld [vmem:[%s3387_s0 + $0x2b4] ss:$24 sps:$4 sm:$0xff]   ;;  %v2550_v48 = vld [vmem:[%s3387_s0 + $0x2b0] ss:$24 sps:$4 sm:$0xff]  }
  0x7a   :  { %1399 = vmatmul.mubr.bf16.gmra.mrb[44].mxu1 %v2480_v51  ;;  %1544 = vmatmul.mubr.bf16.gmra.mrb[44].mxu0 %v2481_v54 }
  0x7b   :  { %1406 = vmatprep.mubr.bf16.mxu1 %v2482_v55  ;;  %1551 = vmatprep.mubr.bf16.mxu0 %v2484_v56 }
  0x82   :  { %1407 = vmatmul.mubr.bf16.gmra.mrb[48].mxu1 %v2486_v61  ;;  %1552 = vmatmul.mubr.bf16.gmra.mrb[48].mxu0 %v2487_v62 }
  0x83   :  { %1414 = vmatprep.mubr.bf16.mxu1 %v2488_v63  ;;  %1559 = vmatprep.mubr.bf16.mxu0 %v2490_v0 }
  0x8a   :  { %1415 = vmatmul.mubr.bf16.gmra.mrb[52].mxu1 %v2492_v5  ;;  %1560 = vmatmul.mubr.bf16.gmra.mrb[52].mxu0 %v2493_v6 }
  0x8b   :  { %1422 = vmatprep.mubr.bf16.mxu1 %v2494_v7  ;;  %1567 = vmatprep.mubr.bf16.mxu0 %v2496_v8 }
  0x92   :  { %1423 = vmatmul.mubr.bf16.gmra.mrb[56].mxu1 %v2498_v13  ;;  %1568 = vmatmul.mubr.bf16.gmra.mrb[56].mxu0 %v2499_v14 }
  0x93   :  { %1430 = vmatprep.mubr.bf16.mxu1 %v2500_v15  ;;  %1575 = vmatprep.mubr.bf16.mxu0 %v2502_v16 }
  0x98   :  { %v3122_v51 = vpop.permute.xlu0 %327 }
  0x99   :  { %v3124_v52 = vpop.permute.xlu1 %247 }
  0x9a   :  { %1431 = vmatmul.mubr.bf16.gmra.mrb[60].mxu1 %v2504_v17  ;;  %1576 = vmatmul.mubr.bf16.gmra.mrb[60].mxu0 %v2505_v18 }
  0x9b   :  { %1438 = vmatprep.mubr.bf16.mxu1 %v2506_v19  ;;  %1583 = vmatprep.mubr.bf16.mxu0 %v2508_v20 }
  0x9d   :  { %v3126_v53 = vpop.permute.xlu0 %332 }
  0xa0   :  { %v3128_v54 = vpop.permute.xlu1 %252 }
  0xa2   :  { %1439 = vmatmul.mubr.bf16.gmra.mrb[64].mxu1 %v2510_v21  ;;  %1584 = vmatmul.mubr.bf16.gmra.mrb[64].mxu0 %v2511_v22 }
  0xa3   :  { %1446 = vmatprep.mubr.bf16.mxu1 %v2512_v23  ;;  %1591 = vmatprep.mubr.bf16.mxu0 %v2514_v24 }
  0xa5   :  { %v3138_v3 = vpop.permute.xlu0 %337  ;;  %v3140_v4 = vpop.permute.xlu1 %342 }
  0xaa   :  { %1447 = vmatmul.mubr.bf16.gmra.mrb[68].mxu1 %v2516_v25  ;;  %1592 = vmatmul.mubr.bf16.gmra.mrb[68].mxu0 %v2517_v26 }
  0xab   :  { %1454 = vmatprep.mubr.bf16.mxu1 %v2518_v27  ;;  %1599 = vmatprep.mubr.bf16.mxu0 %v2520_v28 }
  0xad   :  { %v3150_v17 = vpop.permute.xlu0 %257  ;;  %v3152_v18 = vpop.permute.xlu1 %262 }
  0xb2   :  { %1455 = vmatmul.mubr.bf16.gmra.mrb[72].mxu1 %v2522_v29  ;;  %1600 = vmatmul.mubr.bf16.gmra.mrb[72].mxu0 %v2523_v30 }
  0xb3   :  { %1462 = vmatprep.mubr.bf16.mxu1 %v2524_v31  ;;  %1607 = vmatprep.mubr.bf16.mxu0 %v2526_v32 }
  0xb5   :  { %v3162_v31 = vpop.permute.xlu0 %347  ;;  %v3164_v32 = vpop.permute.xlu1 %352 }
  0xba   :  { %1463 = vmatmul.mubr.bf16.gmra.mrb[76].mxu1 %v2528_v33  ;;  %1608 = vmatmul.mubr.bf16.gmra.mrb[76].mxu0 %v2529_v34 }
  0xbb   :  { %1470 = vmatprep.mubr.bf16.mxu1 %v2530_v35  ;;  %1615 = vmatprep.mubr.bf16.mxu0 %v2532_v36 }
  0xc2   :  { %1471 = vmatmul.mubr.bf16.gmra.mrb[80].mxu1 %v2534_v37  ;;  %1616 = vmatmul.mubr.bf16.gmra.mrb[80].mxu0 %v2535_v38 }
  0xc3   :  { %1478 = vmatprep.mubr.bf16.mxu1 %v2536_v39  ;;  %1623 = vmatprep.mubr.bf16.mxu0 %v2538_v40 }
  0xca   :  { %1479 = vmatmul.mubr.bf16.gmra.mrb[84].mxu1 %v2540_v41  ;;  %1624 = vmatmul.mubr.bf16.gmra.mrb[84].mxu0 %v2541_v42 }
  0xcb   :  { %1486 = vmatprep.mubr.bf16.mxu1 %v2542_v43  ;;  %1631 = vmatprep.mubr.bf16.mxu0 %v2544_v44 }
  0xd2   :  { %1487 = vmatmul.mubr.bf16.gmra.mrb[88].mxu1 %v2546_v45  ;;  %1632 = vmatmul.mubr.bf16.gmra.mrb[88].mxu0 %v2547_v46  ;;  %v3174_v45 = vpop.permute.xlu0 %267  ;;  %v3176_v46 = vpop.permute.xlu1 %272 }
  0xd3   :  { %1639 = vmatprep.mubr.bf16.mxu0 %v2548_v47 }
  0xda   :  { %1640 = vmatmul.mubr.bf16.gmra.mrb[92].mxu0 %v2550_v48 }
  0xdb   :  { %1647 = vmatprep.mubr.bf16.mxu0 %v2551_v49 }
  0xe2   :  { %1648 = vmatmul.mubr.bf16.gmra.mrb[96].mxu0 %v2553_v50 }
  0xf5   :  { %v2001_v55 = vpop.f32.mrb[0].mxu0  ;;  %v2055_v56 = vpop.f32.mrb[0].mxu1 }
  0xf6   :  { %v2002_v57 = vpop.f32.mrb[1].mxu0  ;;  %v2056_v58 = vpop.f32.mrb[1].mxu1 }
  0xf7   :  { %v3130_v59 = vadd.f32 %v2002_v57, %v2001_v55  ;;  %v2004_v60 = vpop.f32.mrb[2].mxu0  ;;  %v3132_v61 = vadd.f32 %v2056_v58, %v2055_v56  ;;  %v2058_v62 = vpop.f32.mrb[2].mxu1 }
  0xf8   :  { %v2005_v63 = vpop.f32.mrb[3].mxu0  ;;  %v2059_v0 = vpop.f32.mrb[3].mxu1 }
  0xf9   :  { %v3134_v1 = vadd.f32 %v2005_v63, %v2004_v60  ;;  %v3136_v2 = vadd.f32 %v2059_v0, %v2058_v62 }
  0xfd   :  { %v2007_v5 = vpop.f32.mrb[4].mxu0  ;;  %v2061_v6 = vpop.f32.mrb[4].mxu1 }
  0xfe   :  { %v2008_v7 = vpop.f32.mrb[5].mxu0  ;;  %v2062_v8 = vpop.f32.mrb[5].mxu1 }
  0xff   :  { %v3142_v9 = vadd.f32 %v2008_v7, %v2007_v5  ;;  %v2010_v10 = vpop.f32.mrb[6].mxu0  ;;  %v3144_v11 = vadd.f32 %v2062_v8, %v2061_v6  ;;  %v2064_v12 = vpop.f32.mrb[6].mxu1 }
 0x100   :  { %v2011_v13 = vpop.f32.mrb[7].mxu0  ;;  %v2065_v14 = vpop.f32.mrb[7].mxu1 }
 0x101   :  { %v3146_v15 = vadd.f32 %v2011_v13, %v2010_v10  ;;  %v3148_v16 = vadd.f32 %v2065_v14, %v2064_v12  ;;  %v3186_v5 = vpop.permute.xlu0 %357  ;;  %v3188_v6 = vpop.permute.xlu1 %362 }
 0x105   :  { %v2013_v19 = vpop.f32.mrb[8].mxu0  ;;  %v2067_v20 = vpop.f32.mrb[8].mxu1 }
 0x106   :  { %v2014_v21 = vpop.f32.mrb[9].mxu0  ;;  %v2068_v22 = vpop.f32.mrb[9].mxu1 }
 0x107   :  { %v3154_v23 = vadd.f32 %v2014_v21, %v2013_v19  ;;  %v2016_v24 = vpop.f32.mrb[10].mxu0  ;;  %v3156_v25 = vadd.f32 %v2068_v22, %v2067_v20  ;;  %v2070_v26 = vpop.f32.mrb[10].mxu1 }
 0x108   :  { %v2017_v27 = vpop.f32.mrb[11].mxu0  ;;  %v2071_v28 = vpop.f32.mrb[11].mxu1 }
 0x109   :  { %v3158_v29 = vadd.f32 %v2017_v27, %v2016_v24  ;;  %v3160_v30 = vadd.f32 %v2071_v28, %v2070_v26  ;;  %v3198_v27 = vpop.permute.xlu0 %277  ;;  %v3200_v28 = vpop.permute.xlu1 %282 }
 0x10d   :  { %v2019_v33 = vpop.f32.mrb[12].mxu0  ;;  %v2073_v34 = vpop.f32.mrb[12].mxu1 }
 0x10e   :  { %v2020_v35 = vpop.f32.mrb[13].mxu0  ;;  %v2074_v36 = vpop.f32.mrb[13].mxu1 }
 0x10f   :  { %v3166_v37 = vadd.f32 %v2020_v35, %v2019_v33  ;;  %v2022_v38 = vpop.f32.mrb[14].mxu0  ;;  %v3168_v39 = vadd.f32 %v2074_v36, %v2073_v34  ;;  %v2076_v40 = vpop.f32.mrb[14].mxu1 }
 0x110   :  { %v2023_v41 = vpop.f32.mrb[15].mxu0  ;;  %v2077_v42 = vpop.f32.mrb[15].mxu1 }
 0x111   :  { %v3170_v43 = vadd.f32 %v2023_v41, %v2022_v38  ;;  %v3172_v44 = vadd.f32 %v2077_v42, %v2076_v40 }
 0x115   :  { %v2025_v47 = vpop.f32.mrb[16].mxu0  ;;  %v2079_v48 = vpop.f32.mrb[16].mxu1 }
 0x116   :  { %v2026_v49 = vpop.f32.mrb[17].mxu0  ;;  %v2080_v50 = vpop.f32.mrb[17].mxu1 }
 0x117   :  { %v3178_v55 = vadd.f32 %v2026_v49, %v2025_v47  ;;  %v2028_v56 = vpop.f32.mrb[18].mxu0  ;;  %v3180_v57 = vadd.f32 %v2080_v50, %v2079_v48  ;;  %v2082_v58 = vpop.f32.mrb[18].mxu1 }
 0x118   :  { %v2029_v60 = vpop.f32.mrb[19].mxu0  ;;  %v2083_v62 = vpop.f32.mrb[19].mxu1 }
 0x119   :  { %3392 = vst [vmem:[#allocation2_spill] sm:$0xff] %v3180_v57  ;;  %v3182_v63 = vadd.f32 %v2029_v60, %v2028_v56  ;;  %v3184_v0 = vadd.f32 %v2083_v62, %v2082_v58  ;;  %v3210_v56 = vpop.permute.xlu0 %367  ;;  %v3212_v58 = vpop.permute.xlu1 %372 }
 0x11b   :  { %3393 = vst [vmem:[#allocation3_spill] sm:$0xff] %v3184_v0 }
 0x11d   :  { %v2031_v7 = vpop.f32.mrb[20].mxu0  ;;  %v2085_v8 = vpop.f32.mrb[20].mxu1 }
 0x11e   :  { %v2032_v10 = vpop.f32.mrb[21].mxu0  ;;  %v2086_v12 = vpop.f32.mrb[21].mxu1 }
 0x11f   :  { %v3190_v13 = vadd.f32 %v2032_v10, %v2031_v7  ;;  %v2034_v14 = vpop.f32.mrb[22].mxu0  ;;  %v3192_v19 = vadd.f32 %v2086_v12, %v2085_v8  ;;  %v2088_v20 = vpop.f32.mrb[22].mxu1  ;;  %v1208_v10 = vadd.f32 %v3130_v59, %v3124_v52 }
 0x120   :  { %v2035_v21 = vpop.f32.mrb[23].mxu0  ;;  %v2089_v22 = vpop.f32.mrb[23].mxu1 }
 0x121   :  { %3394 = vst [vmem:[#allocation4_spill] sm:$0xff] %v3192_v19  ;;  %v3194_v24 = vadd.f32 %v2035_v21, %v2034_v14  ;;  %v3196_v26 = vadd.f32 %v2089_v22, %v2088_v20 }
 0x123   :  { %3395 = vst [vmem:[#allocation5_spill] sm:$0xff] %v3196_v26 }
 0x125   :  { %v2037_v33 = vpop.f32.mrb[24].mxu0  ;;  %v2091_v34 = vpop.f32.mrb[24].mxu1 }
 0x126   :  { %v2038_v35 = vpop.f32.mrb[25].mxu0  ;;  %v2092_v36 = vpop.f32.mrb[25].mxu1 }
 0x127   :  { %v3202_v38 = vadd.f32 %v2038_v35, %v2037_v33  ;;  %v2040_v40 = vpop.f32.mrb[26].mxu0  ;;  %v3204_v41 = vadd.f32 %v2092_v36, %v2091_v34  ;;  %v2094_v42 = vpop.f32.mrb[26].mxu1  ;;  %v1211_v34 = vadd.f32 %v3134_v1, %v3128_v54 }
 0x128   :  { %v2041_v47 = vpop.f32.mrb[27].mxu0  ;;  %v2095_v48 = vpop.f32.mrb[27].mxu1 }
 0x129   :  { %3396 = vst [vmem:[#allocation6_spill] sm:$0xff] %v3204_v41  ;;  %v3206_v49 = vadd.f32 %v2041_v47, %v2040_v40  ;;  %v3208_v50 = vadd.f32 %v2095_v48, %v2094_v42  ;;  %v3222_v47 = vpop.permute.xlu0 %287  ;;  %v3224_v48 = vpop.permute.xlu1 %292 }
 0x12b   :  { %3397 = vst [vmem:[#allocation7_spill] sm:$0xff] %v3208_v50 }
 0x12d   :  { %v2043_v60 = vpop.f32.mrb[28].mxu0  ;;  %v2113_v62 = vpop.f32.mrb[28].mxu1 }
 0x12e   :  { %v2044_v7 = vpop.f32.mrb[29].mxu0  ;;  %v2114_v8 = vpop.f32.mrb[29].mxu1 }
 0x12f   :  { %v3216_v12 = vadd.f32 %v2044_v7, %v2043_v60  ;;  %v2115_v14 = vadd.f32 %v2114_v8, %v2113_v62  ;;  %v2046_v20 = vpop.f32.mrb[30].mxu0  ;;  %v2116_v21 = vpop.f32.mrb[30].mxu1  ;;  %v1216_v7 = vadd.f32 %v3142_v9, %v3150_v17 }
 0x130   :  { %v2047_v22 = vpop.f32.mrb[31].mxu0  ;;  %v2117_v33 = vpop.f32.mrb[31].mxu1 }
 0x131   :  { %v1369_v35 = vadd.f32 %v2115_v14, %v1208_v10  ;;  %v3220_v36 = vadd.f32 %v2047_v22, %v2046_v20  ;;  %v2118_v40 = vadd.f32 %v2117_v33, %v2116_v21  ;;  %v1219_v20 = vadd.f32 %v3146_v15, %v3152_v18  ;;  %v3236_v41 = vpop.permute.xlu1 %382 }
 0x132   :  { %3398 = vst [vmem:[#allocation8_spill] sm:$0xff] %v3236_v41  ;;  %v1227_v18 = vadd.f32 %v3158_v29, %v3176_v46 }
 0x133   :  { %v1372_v42 = vadd.f32 %v2118_v40, %v1211_v34  ;;  %v3234_v40 = vpop.permute.xlu0 %377 }
 0x135   :  { %v2049_v52 = vpop.f32.mrb[32].mxu0  ;;  %v2119_v59 = vpop.f32.mrb[32].mxu1 }
 0x136   :  { %v2050_v60 = vpop.f32.mrb[33].mxu0  ;;  %v2120_v62 = vpop.f32.mrb[33].mxu1 }
 0x137   :  { %v3228_v8 = vadd.f32 %v2050_v60, %v2049_v52  ;;  %v2121_v50 = vadd.f32 %v2120_v62, %v2119_v59  ;;  %v2052_v54 = vpop.f32.mrb[34].mxu0  ;;  %v2122_v1 = vpop.f32.mrb[34].mxu1  ;;  %v1224_v60 = vadd.f32 %v3154_v23, %v3174_v45  ;;  %v2556_v23 = vld [vmem:[%s3390_s2 + $0x4] ss:$8 sps:$4 sm:$0xff]  }
 0x138   :  { %v2053_v10 = vpop.f32.mrb[35].mxu0  ;;  %v2123_v14 = vpop.f32.mrb[35].mxu1  ;;  %1824 = vmatprep.mubr.bf16.mxu1 %v2556_v23 }
 0x139   :  { %v1377_v21 = vadd.f32 %v2121_v50, %v1216_v7  ;;  %v3232_v22 = vadd.f32 %v2053_v10, %v2052_v54  ;;  %v2124_v33 = vadd.f32 %v2123_v14, %v2122_v1  ;;  %v3242_v41 = vpop.permute.xlu0 %297  ;;  %v3244_v57 = vpop.permute.xlu1 %302 }
 0x13b   :  { %v1380_v34 = vadd.f32 %v2124_v33, %v1219_v20 }
 0x13d   :  { %v2125_v9 = vpop.f32.mrb[36].mxu1  ;;  %v2225_v17 = vpop.f32.mrb[36].mxu0 }
 0x13e   :  { %v2126_v52 = vpop.f32.mrb[37].mxu1  ;;  %v2226_v59 = vpop.f32.mrb[37].mxu0 }
 0x13f   :  { %v2127_v62 = vadd.f32 %v2126_v52, %v2125_v9  ;;  %v2227_v26 = vadd.f32 %v2226_v59, %v2225_v17  ;;  %v2128_v19 = vpop.f32.mrb[38].mxu1  ;;  %v2228_v15 = vpop.f32.mrb[38].mxu0 }
 0x140   :  { %v2129_v50 = vpop.f32.mrb[39].mxu1  ;;  %v2229_v7 = vpop.f32.mrb[39].mxu0 }
 0x141   :  { %v1385_v54 = vadd.f32 %v2127_v62, %v1224_v60  ;;  %v1530_v1 = vadd.f32 %v2227_v26, %v1369_v35  ;;  %v2130_v10 = vadd.f32 %v2129_v50, %v2128_v19  ;;  %v2230_v14 = vadd.f32 %v2229_v7, %v2228_v15  ;;  %v3261_v23 = vpop.permute.xlu1 %392 }
 0x142   :  { %v1232_v19 = vadd.f32 %v3166_v37, %v3198_v27  ;;  %v1235_v62 = vadd.f32 %v3170_v43, %v3200_v28 }
 0x143   :  { %v1688_v20 = vmul.f32 0.1, %v1530_v1  ;;  %v1388_v33 = vadd.f32 %v2130_v10, %v1227_v18  ;;  %v1533_v0 = vadd.f32 %v2230_v14, %v1372_v42  ;;  %vm1656_vm0 = vcmp.ge.f32.partialorder %v1530_v1, 0.0 }
 0x145   :  { %vm1657_vm1 = vcmp.ge.f32.partialorder %v1533_v0, 0.0  ;;  %v1689_v29 = vmul.f32 0.1, %v1533_v0  ;;  %v2131_v45 = vpop.f32.mrb[40].mxu1  ;;  %v2231_v46 = vpop.f32.mrb[40].mxu0  ;;  %v3251_v42 = vsel %vm1656_vm0, %v1530_v1, %v1688_v20 }
 0x146   :  { %v2132_v26 = vpop.f32.mrb[41].mxu1  ;;  %v2232_v35 = vpop.f32.mrb[41].mxu0 }
 0x147   :  { %v3253_v9 = vsel %vm1657_vm1, %v1533_v0, %v1689_v29  ;;  %v2133_v17 = vadd.f32 %v2132_v26, %v2131_v45  ;;  %v2233_v52 = vadd.f32 %v2232_v35, %v2231_v46  ;;  %v2134_v59 = vpop.f32.mrb[42].mxu1  ;;  %v2234_v60 = vpop.f32.mrb[42].mxu0  ;;  %v1240_v45 = vadd.f32 %v3178_v55, %v3222_v47 }
 0x148   :  { %v2135_v15 = vpop.f32.mrb[43].mxu1  ;;  %v2235_v18 = vpop.f32.mrb[43].mxu0 }
 0x149   :  { %v1393_v37 = vadd.f32 %v2133_v17, %v1232_v19  ;;  %v1538_v27 = vadd.f32 %v2233_v52, %v1377_v21  ;;  %v2136_v7 = vadd.f32 %v2135_v15, %v2134_v59  ;;  %v2236_v10 = vadd.f32 %v2235_v18, %v2234_v60  ;;  %v3259_v20 = vpop.permute.xlu0 %387 }
 0x14a   :  { %v1243_v59 = vadd.f32 %v3182_v63, %v3224_v48  ;;  %v1248_v63 = vadd.f32 %v3190_v13, %v3242_v41 }
 0x14b   :  { %v1690_v1 = vmul.f32 0.1, %v1538_v27  ;;  %v1396_v14 = vadd.f32 %v2136_v7, %v1235_v62  ;;  %v1541_v0 = vadd.f32 %v2236_v10, %v1380_v34  ;;  %vm1658_vm2 = vcmp.ge.f32.partialorder %v1538_v27, 0.0 }
 0x14d   :  { %vm1659_vm3 = vcmp.ge.f32.partialorder %v1541_v0, 0.0  ;;  %v1691_v29 = vmul.f32 0.1, %v1541_v0  ;;  %v2137_v43 = vpop.f32.mrb[44].mxu1  ;;  %v2237_v28 = vpop.f32.mrb[44].mxu0  ;;  %v3265_v21 = vsel %vm1658_vm2, %v1538_v27, %v1690_v1 }
 0x14e   :  { %v2138_v46 = vpop.f32.mrb[45].mxu1  ;;  %v2238_v19 = vpop.f32.mrb[45].mxu0 }
 0x14f   :  { %v3267_v26 = vsel %vm1659_vm3, %v1541_v0, %v1691_v29  ;;  %v2139_v35 = vadd.f32 %v2138_v46, %v2137_v43  ;;  %v2239_v34 = vadd.f32 %v2238_v19, %v2237_v28  ;;  %v2140_v17 = vpop.f32.mrb[46].mxu1  ;;  %v2240_v52 = vpop.f32.mrb[46].mxu0 }
 0x150   :  { %v2141_v60 = vpop.f32.mrb[47].mxu1  ;;  %v2241_v62 = vpop.f32.mrb[47].mxu0 }
 0x151   :  { %v1401_v18 = vadd.f32 %v2139_v35, %v1240_v45  ;;  %v1546_v55 = vadd.f32 %v2239_v34, %v1385_v54  ;;  %v2142_v47 = vadd.f32 %v2141_v60, %v2140_v17  ;;  %v2242_v7 = vadd.f32 %v2241_v62, %v2240_v52  ;;  %v308_v0 = vpop.permute.xlu0 %307  ;;  %v313_v29 = vpop.permute.xlu1 %312 }
 0x152   :  { %v1251_v17 = vadd.f32 %v3194_v24, %v3244_v57 }
 0x153   :  { %v1692_v27 = vmul.f32 0.1, %v1546_v55  ;;  %v1404_v10 = vadd.f32 %v2142_v47, %v1243_v59  ;;  %v1549_v1 = vadd.f32 %v2242_v7, %v1388_v33  ;;  %vm1660_vm4 = vcmp.ge.f32.partialorder %v1546_v55, 0.0 }
 0x155   :  { %vm1661_vm5 = vcmp.ge.f32.partialorder %v1549_v1, 0.0  ;;  %v1693_v43 = vmul.f32 0.1, %v1549_v1  ;;  %v2143_v28 = vpop.f32.mrb[48].mxu1  ;;  %v2243_v46 = vpop.f32.mrb[48].mxu0  ;;  %v3275_v15 = vsel %vm1660_vm4, %v1546_v55, %v1692_v27 }
 0x156   :  { %v2144_v48 = vpop.f32.mrb[49].mxu1  ;;  %v2244_v19 = vpop.f32.mrb[49].mxu0 }
 0x157   :  { %v3277_v54 = vsel %vm1661_vm5, %v1549_v1, %v1693_v43  ;;  %v2145_v45 = vadd.f32 %v2144_v48, %v2143_v28  ;;  %v2245_v35 = vadd.f32 %v2244_v19, %v2243_v46  ;;  %v2146_v34 = vpop.f32.mrb[50].mxu1  ;;  %v2246_v33 = vpop.f32.mrb[50].mxu0  ;;  %v1256_v46 = vadd.f32 %v3202_v38, %v308_v0 }
 0x158   :  { %v2147_v52 = vpop.f32.mrb[51].mxu1  ;;  %v2247_v59 = vpop.f32.mrb[51].mxu0 }
 0x159   :  { %v1409_v62 = vadd.f32 %v2145_v45, %v1248_v63  ;;  %v1554_v13 = vadd.f32 %v2245_v35, %v1393_v37  ;;  %v2148_v41 = vadd.f32 %v2147_v52, %v2146_v34  ;;  %v2248_v47 = vadd.f32 %v2247_v59, %v2246_v33  ;;  %v3283_v1 = vpop.permute.xlu0 %397  ;;  %v3285_v43 = vpop.permute.xlu1 %402 }
 0x15a   :  { %v1259_v33 = vadd.f32 %v3206_v49, %v313_v29 }
 0x15b   :  { %v1694_v55 = vmul.f32 0.1, %v1554_v13  ;;  %v1412_v7 = vadd.f32 %v2148_v41, %v1251_v17  ;;  %v1557_v27 = vadd.f32 %v2248_v47, %v1396_v14  ;;  %vm1662_vm6 = vcmp.ge.f32.partialorder %v1554_v13, 0.0 }
 0x15d   :  { %vm1663_vm7 = vcmp.ge.f32.partialorder %v1557_v27, 0.0  ;;  %v1695_v28 = vmul.f32 0.1, %v1557_v27  ;;  %v2149_v57 = vpop.f32.mrb[52].mxu1  ;;  %v2249_v24 = vpop.f32.mrb[52].mxu0  ;;  %v3288_v63 = vsel %vm1662_vm6, %v1554_v13, %v1694_v55 }
 0x15e   :  { %v2150_v48 = vpop.f32.mrb[53].mxu1  ;;  %v2250_v19 = vpop.f32.mrb[53].mxu0 }
 0x15f   :  { %v3290_v37 = vsel %vm1663_vm7, %v1557_v27, %v1695_v28  ;;  %v2151_v45 = vadd.f32 %v2150_v48, %v2149_v57  ;;  %v2251_v35 = vadd.f32 %v2250_v19, %v2249_v24  ;;  %v2152_v14 = vpop.f32.mrb[54].mxu1  ;;  %v2252_v34 = vpop.f32.mrb[54].mxu0 }
 0x160   :  { %v2153_v17 = vpop.f32.mrb[55].mxu1  ;;  %v2253_v52 = vpop.f32.mrb[55].mxu0  ;;  %v1757_v59 = vpack.c.bf16 %v3290_v37, %v3288_v63 }
 0x161   :  { %v1417_v41 = vadd.f32 %v2151_v45, %v1256_v46  ;;  %v1562_v47 = vadd.f32 %v2251_v35, %v1401_v18  ;;  %v2154_v38 = vadd.f32 %v2153_v17, %v2152_v14  ;;  %v2254_v0 = vadd.f32 %v2253_v52, %v2252_v34  ;;  %v318_v60 = vpop.permute.xlu0 %317  ;;  %v323_v28 = vpop.permute.xlu1 %322 }
 0x162   :  { %v1264_v49 = vadd.f32 %v3216_v12, %v318_v60 }
 0x163   :  { %v1696_v13 = vmul.f32 0.1, %v1562_v47  ;;  %v1420_v55 = vadd.f32 %v2154_v38, %v1259_v33  ;;  %v1565_v27 = vadd.f32 %v2254_v0, %v1404_v10  ;;  %vm1664_vm8 = vcmp.ge.f32.partialorder %v1562_v47, 0.0 }
 0x164   :  { %v1267_v10 = vadd.f32 %v3220_v36, %v323_v28  ;;  %v1272_v36 = vadd.f32 %v3228_v8, %v3122_v51 }
 0x165   :  { %vm1665_vm9 = vcmp.ge.f32.partialorder %v1565_v27, 0.0  ;;  %v1697_v57 = vmul.f32 0.1, %v1565_v27  ;;  %v2155_v24 = vpop.f32.mrb[56].mxu1  ;;  %v2255_v48 = vpop.f32.mrb[56].mxu0  ;;  %v3296_v50 = vsel %vm1664_vm8, %v1562_v47, %v1696_v13 }
 0x166   :  { %v2156_v29 = vpop.f32.mrb[57].mxu1  ;;  %v2256_v19 = vpop.f32.mrb[57].mxu0 }
 0x167   :  { %v3298_v46 = vsel %vm1665_vm9, %v1565_v27, %v1697_v57  ;;  %v2157_v18 = vadd.f32 %v2156_v29, %v2155_v24  ;;  %v2257_v45 = vadd.f32 %v2256_v19, %v2255_v48  ;;  %v2158_v35 = vpop.f32.mrb[58].mxu1  ;;  %v2258_v14 = vpop.f32.mrb[58].mxu0 }
 0x168   :  { %v2159_v34 = vpop.f32.mrb[59].mxu1  ;;  %v2259_v33 = vpop.f32.mrb[59].mxu0  ;;  %v1758_v17 = vpack.c.bf16 %v3298_v46, %v3296_v50 }
 0x169   :  { %v1425_v52 = vadd.f32 %v2157_v18, %v1264_v49  ;;  %v1570_v38 = vadd.f32 %v2257_v45, %v1409_v62  ;;  %v2160_v12 = vadd.f32 %v2159_v34, %v2158_v35  ;;  %v2260_v60 = vadd.f32 %v2259_v33, %v2258_v14 }
 0x16b   :  { %v1698_v0 = vmul.f32 0.1, %v1570_v38  ;;  %v1428_v47 = vadd.f32 %v2160_v12, %v1267_v10  ;;  %v1573_v13 = vadd.f32 %v2260_v60, %v1412_v7  ;;  %vm1666_vm10 = vcmp.ge.f32.partialorder %v1570_v38, 0.0 }
 0x16c   :  { %v1275_v7 = vadd.f32 %v3232_v22, %v3126_v53  ;;  %v1280_v53 = vadd.f32 %v3132_v61, %v3138_v3 }
 0x16d   :  { %vm1667_vm11 = vcmp.ge.f32.partialorder %v1573_v13, 0.0  ;;  %v1699_v27 = vmul.f32 0.1, %v1573_v13  ;;  %v2161_v57 = vpop.f32.mrb[60].mxu1  ;;  %v2261_v24 = vpop.f32.mrb[60].mxu0  ;;  %v3305_v29 = vsel %vm1666_vm10, %v1570_v38, %v1698_v0 }
 0x16e   :  { %v2162_v28 = vpop.f32.mrb[61].mxu1  ;;  %v2262_v48 = vpop.f32.mrb[61].mxu0 }
 0x16f   :  { %v3307_v19 = vsel %vm1667_vm11, %v1573_v13, %v1699_v27  ;;  %v2163_v62 = vadd.f32 %v2162_v28, %v2161_v57  ;;  %v2263_v49 = vadd.f32 %v2262_v48, %v2261_v24  ;;  %v2164_v18 = vpop.f32.mrb[62].mxu1  ;;  %v2264_v45 = vpop.f32.mrb[62].mxu0 }
 0x170   :  { %v2165_v35 = vpop.f32.mrb[63].mxu1  ;;  %v2265_v14 = vpop.f32.mrb[63].mxu0  ;;  %v1759_v10 = vpack.c.bf16 %v3307_v19, %v3305_v29 }
 0x171   :  { %v1433_v34 = vadd.f32 %v2163_v62, %v1272_v36  ;;  %v1578_v51 = vadd.f32 %v2263_v49, %v1417_v41  ;;  %v2166_v8 = vadd.f32 %v2165_v35, %v2164_v18  ;;  %v2266_v33 = vadd.f32 %v2265_v14, %v2264_v45 }
 0x173   :  { %v1700_v38 = vmul.f32 0.1, %v1578_v51  ;;  %v1436_v12 = vadd.f32 %v2166_v8, %v1275_v7  ;;  %v1581_v60 = vadd.f32 %v2266_v33, %v1420_v55  ;;  %vm1668_vm12 = vcmp.ge.f32.partialorder %v1578_v51, 0.0 }
 0x174   :  { %v1283_v55 = vadd.f32 %v3136_v2, %v3140_v4  ;;  %v1288_v2 = vadd.f32 %v3144_v11, %v3162_v31 }
 0x175   :  { %vm1669_vm13 = vcmp.ge.f32.partialorder %v1581_v60, 0.0  ;;  %v1701_v0 = vmul.f32 0.1, %v1581_v60  ;;  %v2167_v13 = vpop.f32.mrb[64].mxu1  ;;  %v2267_v27 = vpop.f32.mrb[64].mxu0  ;;  %v3315_v24 = vsel %vm1668_vm12, %v1578_v51, %v1700_v38 }
 0x176   :  { %v2168_v22 = vpop.f32.mrb[65].mxu1  ;;  %v2268_v57 = vpop.f32.mrb[65].mxu0 }
 0x177   :  { %v3317_v28 = vsel %vm1669_vm13, %v1581_v60, %v1701_v0  ;;  %v2169_v41 = vadd.f32 %v2168_v22, %v2167_v13  ;;  %v2269_v36 = vadd.f32 %v2268_v57, %v2267_v27  ;;  %v2170_v48 = vpop.f32.mrb[66].mxu1  ;;  %v2270_v62 = vpop.f32.mrb[66].mxu0 }
 0x178   :  { %v2171_v49 = vpop.f32.mrb[67].mxu1  ;;  %v2271_v18 = vpop.f32.mrb[67].mxu0  ;;  %v1760_v45 = vpack.c.bf16 %v3317_v28, %v3315_v24 }
 0x179   :  { %v1441_v7 = vadd.f32 %v2169_v41, %v1280_v53  ;;  %v1586_v61 = vadd.f32 %v2269_v36, %v1425_v52  ;;  %v2172_v3 = vadd.f32 %v2171_v49, %v2170_v48  ;;  %v2272_v35 = vadd.f32 %v2271_v18, %v2270_v62 }
 0x17b   :  { %v1702_v14 = vmul.f32 0.1, %v1586_v61  ;;  %v1444_v51 = vadd.f32 %v2172_v3, %v1283_v55  ;;  %v1589_v8 = vadd.f32 %v2272_v35, %v1428_v47  ;;  %vm1670_vm14 = vcmp.ge.f32.partialorder %v1586_v61, 0.0 }
 0x17c   :  { %v1291_v47 = vadd.f32 %v3148_v16, %v3164_v32  ;;  %v1296_v16 = vadd.f32 %v3156_v25, %v3186_v5 }
 0x17d   :  { %vm1671_vm15 = vcmp.ge.f32.partialorder %v1589_v8, 0.0  ;;  %v1703_v33 = vmul.f32 0.1, %v1589_v8  ;;  %v2173_v38 = vpop.f32.mrb[68].mxu1  ;;  %v2273_v60 = vpop.f32.mrb[68].mxu0  ;;  %v3325_v13 = vsel %vm1670_vm14, %v1586_v61, %v1702_v14 }
 0x17e   :  { %v2174_v4 = vpop.f32.mrb[69].mxu1  ;;  %v2274_v0 = vpop.f32.mrb[69].mxu0 }
 0x17f   :  { %v3327_v27 = vsel %vm1671_vm15, %v1589_v8, %v1703_v33  ;;  %v2175_v52 = vadd.f32 %v2174_v4, %v2173_v38  ;;  %v2275_v53 = vadd.f32 %v2274_v0, %v2273_v60  ;;  %v2176_v22 = vpop.f32.mrb[70].mxu1  ;;  %v2276_v57 = vpop.f32.mrb[70].mxu0  ;;  %v1299_v0 = vadd.f32 %v3160_v30, %v3188_v6 }
 0x180   :  { %v2177_v41 = vpop.f32.mrb[71].mxu1  ;;  %v2277_v36 = vpop.f32.mrb[71].mxu0  ;;  %v1761_v48 = vpack.c.bf16 %v3327_v27, %v3325_v13  ;;  %v1304_v6 = vadd.f32 %v3168_v39, %v3210_v56 }
 0x181   :  { %v1449_v62 = vadd.f32 %v2175_v52, %v1288_v2  ;;  %v1594_v11 = vadd.f32 %v2275_v53, %v1433_v34  ;;  %v2178_v31 = vadd.f32 %v2177_v41, %v2176_v22  ;;  %v2278_v55 = vadd.f32 %v2277_v36, %v2276_v57 }
 0x183   :  { %v1704_v49 = vmul.f32 0.1, %v1594_v11  ;;  %v1452_v18 = vadd.f32 %v2178_v31, %v1291_v47  ;;  %v1597_v61 = vadd.f32 %v2278_v55, %v1436_v12  ;;  %vm1672_vm0 = vcmp.ge.f32.partialorder %v1594_v11, 0.0 }
 0x184   :  { %v3399_v31 = vpack.c.bf16 %v3253_v9, %v3251_v42  ;;  %v1307_v42 = vadd.f32 %v3172_v44, %v3212_v58  ;;  %v3401_v58 = vld [vmem:[#allocation2_spill] sm:$0xff] }
 0x185   :  { %vm1673_vm1 = vcmp.ge.f32.partialorder %v1597_v61, 0.0  ;;  %v1705_v3 = vmul.f32 0.1, %v1597_v61  ;;  %v2179_v35 = vpop.f32.mrb[72].mxu1  ;;  %v2279_v14 = vpop.f32.mrb[72].mxu0  ;;  %v1736_v34 = vsel %vm1672_vm0, %v1594_v11, %v1704_v49 }
 0x186   :  { %v2180_v32 = vpop.f32.mrb[73].mxu1  ;;  %v2280_v8 = vpop.f32.mrb[73].mxu0 }
 0x187   :  { %v2181_v33 = vadd.f32 %v2180_v32, %v2179_v35  ;;  %v2281_v38 = vadd.f32 %v2280_v8, %v2279_v14  ;;  %v2182_v60 = vpop.f32.mrb[74].mxu1  ;;  %v2282_v2 = vpop.f32.mrb[74].mxu0  ;;  %v1737_v4 = vsel %vm1673_vm1, %v1597_v61, %v1705_v3 }
 0x188   :  { %v2183_v12 = vpop.f32.mrb[75].mxu1  ;;  %v2283_v52 = vpop.f32.mrb[75].mxu0  ;;  %v1762_v53 = vpack.c.bf16 %v1737_v4, %v1736_v34  ;;  %v3400_v4 = vpack.c.bf16 %v3267_v26, %v3265_v21 }
 0x189   :  { %v1457_v22 = vadd.f32 %v2181_v33, %v1296_v16  ;;  %v1602_v57 = vadd.f32 %v2281_v38, %v1441_v7  ;;  %v2184_v47 = vadd.f32 %v2183_v12, %v2182_v60  ;;  %v2284_v41 = vadd.f32 %v2283_v52, %v2282_v2 }
 0x18a   :  { %2321 = vmatprep.subr.bf16.mxu1 %v1762_v53  ;;  %v1312_v52 = vadd.f32 %v3401_v58, %v3234_v40 }
 0x18b   :  { %v1706_v25 = vmul.f32 0.1, %v1602_v57  ;;  %v1460_v5 = vadd.f32 %v2184_v47, %v1299_v0  ;;  %v1605_v36 = vadd.f32 %v2284_v41, %v1444_v51  ;;  %2322 = vmatpush3.bf16.msra.mxu1 %v3399_v31  ;;  %vm1674_vm2 = vcmp.ge.f32.partialorder %v1602_v57, 0.0  ;;  %v3402_v31 = vld [vmem:[#allocation8_spill] sm:$0xff] }
 0x18d   :  { %vm1675_vm3 = vcmp.ge.f32.partialorder %v1605_v36, 0.0  ;;  %v1707_v11 = vmul.f32 0.1, %v1605_v36  ;;  %v2185_v55 = vpop.f32.mrb[76].mxu1  ;;  %v2285_v30 = vpop.f32.mrb[76].mxu0  ;;  %v1738_v16 = vsel %vm1674_vm2, %v1602_v57, %v1706_v25 }
 0x18e   :  { %v2186_v49 = vpop.f32.mrb[77].mxu1  ;;  %v2286_v7 = vpop.f32.mrb[77].mxu0 }
 0x18f   :  { %v2187_v61 = vadd.f32 %v2186_v49, %v2185_v55  ;;  %v2287_v3 = vadd.f32 %v2286_v7, %v2285_v30  ;;  %v2188_v35 = vpop.f32.mrb[78].mxu1  ;;  %v2288_v14 = vpop.f32.mrb[78].mxu0  ;;  %v1739_v51 = vsel %vm1675_vm3, %v1605_v36, %v1707_v11  ;;  %v3403_v11 = vld [vmem:[#allocation3_spill] sm:$0xff] }
 0x190   :  { %v2189_v9 = vpop.f32.mrb[79].mxu1  ;;  %v2289_v32 = vpop.f32.mrb[79].mxu0  ;;  %v1763_v8 = vpack.c.bf16 %v1739_v51, %v1738_v16  ;;  %v1315_v21 = vadd.f32 %v3403_v11, %v3402_v31 }
 0x191   :  { %v1465_v33 = vadd.f32 %v2187_v61, %v1304_v6  ;;  %v1610_v38 = vadd.f32 %v2287_v3, %v1449_v62  ;;  %v2190_v60 = vadd.f32 %v2189_v9, %v2188_v35  ;;  %v2290_v2 = vadd.f32 %v2289_v32, %v2288_v14  ;;  %v3405_v9 = vld [vmem:[#allocation4_spill] sm:$0xff] }
 0x192   :  { %2323 = vmatprep.subr.bf16.mxu1 %v1763_v8  ;;  %v3404_v14 = vpack.c.bf16 %v3277_v54, %v3275_v15  ;;  %v1320_v32 = vadd.f32 %v3405_v9, %v3259_v20 }
 0x193   :  { %v1708_v39 = vmul.f32 0.1, %v1610_v38  ;;  %v1468_v56 = vadd.f32 %v2190_v60, %v1307_v42  ;;  %v1613_v34 = vadd.f32 %v2290_v2, %v1452_v18  ;;  %2324 = vmatpush3.bf16.msra.mxu1 %v3400_v4  ;;  %vm1676_vm4 = vcmp.ge.f32.partialorder %v1610_v38, 0.0  ;;  %v3406_v4 = vld [vmem:[#allocation5_spill] sm:$0xff] }
 0x194   :  { %v1323_v15 = vadd.f32 %v3406_v4, %v3261_v23 }
 0x195   :  { %vm1677_vm5 = vcmp.ge.f32.partialorder %v1613_v34, 0.0  ;;  %v1709_v0 = vmul.f32 0.1, %v1613_v34  ;;  %v2191_v12 = vpop.f32.mrb[80].mxu1  ;;  %v2291_v44 = vpop.f32.mrb[80].mxu0  ;;  %v1740_v36 = vsel %vm1676_vm4, %v1610_v38, %v1708_v39 }
 0x196   :  { %v2192_v53 = vpop.f32.mrb[81].mxu1  ;;  %v2292_v62 = vpop.f32.mrb[81].mxu0 }
 0x197   :  { %v2193_v57 = vadd.f32 %v2192_v53, %v2191_v12  ;;  %v2293_v47 = vadd.f32 %v2292_v62, %v2291_v44  ;;  %v2194_v41 = vpop.f32.mrb[82].mxu1  ;;  %v2294_v25 = vpop.f32.mrb[82].mxu0  ;;  %v1741_v18 = vsel %vm1677_vm5, %v1613_v34, %v1709_v0 }
 0x198   :  { %v2195_v26 = vpop.f32.mrb[83].mxu1  ;;  %v2295_v55 = vpop.f32.mrb[83].mxu0  ;;  %v1764_v30 = vpack.c.bf16 %v1741_v18, %v1740_v36 }
 0x199   :  { %v1473_v6 = vadd.f32 %v2193_v57, %v1312_v52  ;;  %v1618_v49 = vadd.f32 %v2293_v47, %v1457_v22  ;;  %v2196_v7 = vadd.f32 %v2195_v26, %v2194_v41  ;;  %v2296_v61 = vadd.f32 %v2295_v55, %v2294_v25  ;;  %v3407_v25 = vld [vmem:[#allocation6_spill] sm:$0xff] }
 0x19a   :  { %2325 = vmatprep.subr.bf16.mxu1 %v1764_v30  ;;  %v1328_v36 = vadd.f32 %v3407_v25, %v3283_v1  ;;  %v3408_v30 = vld [vmem:[#allocation7_spill] sm:$0xff]  ;;  %v1780_v25 = vpop.permute.xlu1 %1779 }
 0x19b   :  { %v1710_v40 = vmul.f32 0.1, %v1618_v49  ;;  %v1476_v3 = vadd.f32 %v2196_v7, %v1315_v21  ;;  %v1621_v35 = vadd.f32 %v2296_v61, %v1460_v5  ;;  %2326 = vmatpush3.bf16.msra.mxu1 %v3404_v14  ;;  %vm1678_vm6 = vcmp.ge.f32.partialorder %v1618_v49, 0.0 }
 0x19c   :  { %v1331_v63 = vadd.f32 %v3408_v30, %v3285_v43 }
 0x19d   :  { %vm1679_vm7 = vcmp.ge.f32.partialorder %v1621_v35, 0.0  ;;  %v1711_v16 = vmul.f32 0.1, %v1621_v35  ;;  %v2197_v51 = vpop.f32.mrb[84].mxu1  ;;  %v2297_v42 = vpop.f32.mrb[84].mxu0  ;;  %v1742_v34 = vsel %vm1678_vm6, %v1618_v49, %v1710_v40 }
 0x19e   :  { %v2198_v8 = vpop.f32.mrb[85].mxu1  ;;  %v2298_v22 = vpop.f32.mrb[85].mxu0 }
 0x19f   :  { %v2199_v38 = vadd.f32 %v2198_v8, %v2197_v51  ;;  %v2299_v60 = vadd.f32 %v2298_v22, %v2297_v42  ;;  %v2200_v2 = vpop.f32.mrb[86].mxu1  ;;  %v2300_v39 = vpop.f32.mrb[86].mxu0  ;;  %v1743_v5 = vsel %vm1679_vm7, %v1621_v35, %v1711_v16 }
 0x1a0   :  { %v2201_v54 = vpop.f32.mrb[87].mxu1  ;;  %v2301_v0 = vpop.f32.mrb[87].mxu0  ;;  %v1765_v12 = vpack.c.bf16 %v1743_v5, %v1742_v34 }
 0x1a1   :  { %v1481_v44 = vadd.f32 %v2199_v38, %v1320_v32  ;;  %v1626_v58 = vadd.f32 %v2299_v60, %v1465_v33  ;;  %v2202_v52 = vadd.f32 %v2201_v54, %v2200_v2  ;;  %v2302_v53 = vadd.f32 %v2301_v0, %v2300_v39 }
 0x1a2   :  { %2327 = vmatprep.subr.bf16.mxu1 %v1765_v12 }
 0x1a3   :  { %v1712_v20 = vmul.f32 0.1, %v1626_v58  ;;  %v1484_v62 = vadd.f32 %v2202_v52, %v1323_v15  ;;  %v1629_v57 = vadd.f32 %v2302_v53, %v1468_v56  ;;  %2328 = vmatpush3.bf16.msra.mxu1 %v1757_v59  ;;  %vm1680_vm8 = vcmp.ge.f32.partialorder %v1626_v58, 0.0 }
 0x1a5   :  { %vm1681_vm9 = vcmp.ge.f32.partialorder %v1629_v57, 0.0  ;;  %v1713_v47 = vmul.f32 0.1, %v1629_v57  ;;  %v2203_v41 = vpop.f32.mrb[88].mxu1  ;;  %v2303_v23 = vpop.f32.mrb[88].mxu0  ;;  %v1744_v55 = vsel %vm1680_vm8, %v1626_v58, %v1712_v20 }
 0x1a6   :  { %v2204_v18 = vpop.f32.mrb[89].mxu1  ;;  %v2304_v33 = vpop.f32.mrb[89].mxu0  ;;  %v2554_v20 = vld [vmem:[%s3390_s2] ss:$8 sps:$4 sm:$0xff]  }
 0x1a7   :  { %v2205_v31 = vadd.f32 %v2204_v18, %v2203_v41  ;;  %v2305_v11 = vadd.f32 %v2304_v33, %v2303_v23  ;;  %v2206_v21 = vpop.f32.mrb[90].mxu1  ;;  %v2306_v26 = vpop.f32.mrb[90].mxu0  ;;  %v1745_v56 = vsel %vm1681_vm9, %v1629_v57, %v1713_v47 }
 0x1a8   :  { %v2207_v37 = vpop.f32.mrb[91].mxu1  ;;  %v2307_v59 = vpop.f32.mrb[91].mxu0  ;;  %v1766_v49 = vpack.c.bf16 %v1745_v56, %v1744_v55 }
 0x1a9   :  { %v1489_v7 = vadd.f32 %v2205_v31, %v1328_v36  ;;  %v1634_v61 = vadd.f32 %v2305_v11, %v1473_v6  ;;  %v2208_v40 = vadd.f32 %v2207_v37, %v2206_v21  ;;  %v2308_v35 = vadd.f32 %v2307_v59, %v2306_v26 }
 0x1aa   :  { %2329 = vmatprep.subr.bf16.mxu1 %v1766_v49 }
 0x1ab   :  { %v1714_v1 = vmul.f32 0.1, %v1634_v61  ;;  %v1492_v14 = vadd.f32 %v2208_v40, %v1331_v63  ;;  %v1637_v16 = vadd.f32 %v2308_v35, %v1476_v3  ;;  %2330 = vmatpush3.bf16.msra.mxu1 %v1758_v17  ;;  %vm1682_vm10 = vcmp.ge.f32.partialorder %v1634_v61, 0.0 }
 0x1ad   :  { %vm1683_vm11 = vcmp.ge.f32.partialorder %v1637_v16, 0.0  ;;  %v1715_v51 = vmul.f32 0.1, %v1637_v16  ;;  %v2309_v42 = vpop.f32.mrb[92].mxu0  ;;  %v1746_v8 = vsel %vm1682_vm10, %v1634_v61, %v1714_v1 }
 0x1ae   :  { %v2310_v43 = vpop.f32.mrb[93].mxu0 }
 0x1af   :  { %v2311_v9 = vadd.f32 %v2310_v43, %v2309_v42  ;;  %v2312_v32 = vpop.f32.mrb[94].mxu0  ;;  %v1747_v22 = vsel %vm1683_vm11, %v1637_v16, %v1715_v51 }
 0x1b0   :  { %v2313_v6 = vpop.f32.mrb[95].mxu0  ;;  %v1767_v38 = vpack.c.bf16 %v1747_v22, %v1746_v8 }
 0x1b1   :  { %v1642_v60 = vadd.f32 %v2311_v9, %v1481_v44  ;;  %v2314_v2 = vadd.f32 %v2313_v6, %v2312_v32 }
 0x1b2   :  { %2331 = vmatprep.subr.bf16.mxu1 %v1767_v38 }
 0x1b3   :  { %v1716_v39 = vmul.f32 0.1, %v1642_v60  ;;  %v1645_v3 = vadd.f32 %v2314_v2, %v1484_v62  ;;  %2332 = vmatpush3.bf16.msra.mxu1 %v1759_v10  ;;  %vm1684_vm12 = vcmp.ge.f32.partialorder %v1642_v60, 0.0 }
 0x1b5   :  { %vm1685_vm13 = vcmp.ge.f32.partialorder %v1645_v3, 0.0  ;;  %v1717_v50 = vmul.f32 0.1, %v1645_v3  ;;  %v2315_v46 = vpop.f32.mrb[96].mxu0  ;;  %v1748_v4 = vsel %vm1684_vm12, %v1642_v60, %v1716_v39 }
 0x1b6   :  { %v2316_v17 = vpop.f32.mrb[97].mxu0 }
 0x1b7   :  { %v2317_v34 = vadd.f32 %v2316_v17, %v2315_v46  ;;  %v2318_v5 = vpop.f32.mrb[98].mxu0  ;;  %v1749_v15 = vsel %vm1685_vm13, %v1645_v3, %v1717_v50 }
 0x1b8   :  { %v2319_v54 = vpop.f32.mrb[99].mxu0  ;;  %v1768_v0 = vpack.c.bf16 %v1749_v15, %v1748_v4 }
 0x1b9   :  { %v1650_v12 = vadd.f32 %v2317_v34, %v1489_v7  ;;  %v2320_v44 = vadd.f32 %v2319_v54, %v2318_v5 }
 0x1ba   :  { %2333 = vmatprep.subr.bf16.mxu1 %v1768_v0 }
 0x1bb   :  { %v1718_v58 = vmul.f32 0.1, %v1650_v12  ;;  %v1653_v52 = vadd.f32 %v2320_v44, %v1492_v14  ;;  %2334 = vmatpush3.bf16.msra.mxu1 %v1760_v45  ;;  %vm1686_vm14 = vcmp.ge.f32.partialorder %v1650_v12, 0.0  ;;  %v1775_v45 = vpop.permute.xlu0 %1774 }
 0x1bd   :  { %vm1687_vm15 = vcmp.ge.f32.partialorder %v1653_v52, 0.0  ;;  %v1719_v29 = vmul.f32 0.1, %v1653_v52  ;;  %v1750_v19 = vsel %vm1686_vm14, %v1650_v12, %v1718_v58 }
 0x1bf   :  { %v1751_v10 = vsel %vm1687_vm15, %v1653_v52, %v1719_v29 }
 0x1c0   :  { %v1769_v53 = vpack.c.bf16 %v1751_v10, %v1750_v19 }
 0x1c2   :  { %2335 = vmatprep.subr.bf16.mxu1 %v1769_v53 }
 0x1c3   :  { %2336 = vmatpush3.bf16.msra.mxu1 %v1761_v48 }
 0x1c6   :  { %1825 = vmatmul.mubr.bf16.vlgmr.msra.gmra.mrb[92].mxu1 %v2554_v20 }
 0x299   :  { %v2337_v62 = vpop.f32.mrb[92].mxu1 }
 0x29a   :  { %v2338_v57 = vpop.f32.mrb[93].mxu1 }
 0x29b   :  { %v2339_v24 = vadd.f32 %v2338_v57, %v2337_v62  ;;  %v2340_v28 = vpop.f32.mrb[94].mxu1 }
 0x29c   :  { %v2341_v47 = vpop.f32.mrb[95].mxu1 }
 0x29d   :  { %v1827_v41 = vadd.f32 %v2339_v24, %v1775_v45  ;;  %v2342_v23 = vadd.f32 %v2341_v47, %v2340_v28 }
 0x29f   :  { %1833 = vst [vmem:[%s3391_s5] sm:$0xff] %v1827_v41  ;;  %v1830_v36 = vadd.f32 %v2342_v23, %v1780_v25 }
 0x2a1   :  { %1834 = vst [vmem:[%s3391_s5 + $0x8] sm:$0xff] %v1830_v36 }

</bundles_post_ra>
